<compile_context>
chip_gen: v6e
topology: v6e:2x2x1
jax: 0.10.0
libtpu: 0.0.40
codegen_flags: <defaults>
</compile_context>

<pallas_src>
import jax
import jax.numpy as jnp
from jax.experimental import pallas as pl
from jax.experimental.pallas import tpu as pltpu

# ----------------------------- config (small) -----------------------------
B = 2            # batch
S = 8            # max sequence length
H = 32           # hidden size
NH = 4           # attention heads
HD = H // NH     # head dim
FF = 64          # intermediate (FFN) size
LAYERS = 2       # encoder layers
VOCAB = 100
MAXPOS = 16
TYPES = 2
NUM_CLASSES = 5
PAD_CLASSES = 128          # lane-dense classifier output, sliced back in wrapper
QKV_PAD = 128              # lane-dense fused QKV weight (3*H = 96, padded to 128)
NEG = -10000.0
EPS = 1e-12
BS = B * S
ATTN_SCALE = 1.0 / float(HD) ** 0.5


# ----------------------------- in-kernel helpers -----------------------------
def _layernorm(x, g, b):
    mu = jnp.mean(x, axis=-1, keepdims=True)
    var = jnp.mean((x - mu) ** 2, axis=-1, keepdims=True)
    return (x - mu) * jax.lax.rsqrt(var + EPS) * g + b


def _gelu(x):
    # tanh-approximation GELU (EUP-friendly).
    # TODO(synk): HF BERT default 'gelu' is the exact erf form (~1e-3 divergence).
    c = 0.7978845608028654  # sqrt(2/pi)
    return 0.5 * x * (1.0 + jnp.tanh(c * (x + 0.044715 * x * x * x)))


def _softmax(x):
    m = jnp.max(x, axis=-1, keepdims=True)
    e = jnp.exp(x - m)
    # approx reciprocal hits the EUP slot; exact divide differs at ~1e-3 relative.
    return e * pl.reciprocal(jnp.sum(e, axis=-1, keepdims=True), approx=True)


def _mm(a, w):
    # bf16 operands, f32 accumulation on the MXU; never re-cast bf16 values.
    if a.dtype != jnp.bfloat16:
        a = a.astype(jnp.bfloat16)
    if w.dtype != jnp.bfloat16:
        w = w.astype(jnp.bfloat16)
    return jnp.dot(a, w, preferred_element_type=jnp.float32)


# ----------------------------- the fused kernel -----------------------------
def fused_slu_kernel(ids_ref, len_ref,                       # SMEM scalars
                     word_ref, postype_ref, embg_ref, embb_ref,
                     wqkv_ref, bqkv_ref, wo_ref, bo_ref, ln1g_ref, ln1b_ref,
                     wi_ref, bi_ref, wf_ref, bf_ref, ln2g_ref, ln2b_ref,
                     wp_ref, bp_ref, wc_ref, bc_ref,
                     out_ref):
    # ---- embedding gather: dynamic leading-axis reads of the [VOCAB, 1, H] table ----
    rows = [word_ref[ids_ref[i]] for i in range(BS)]          # each [1, H] f32
    emb = jnp.concatenate(rows, axis=0)                       # [BS, H]
    emb = emb + jnp.concatenate([postype_ref[...]] * B, axis=0)   # + pos + type-0 emb
    x = _layernorm(emb, embg_ref[...], embb_ref[...])         # f32 [BS, H]

    # ---- per-batch additive key bias, [1, S], added via implicit sublane broadcast ----
    col = jax.lax.broadcasted_iota(jnp.int32, (1, S), 1)
    bias = [jnp.where(col < len_ref[b], 0.0, NEG) for b in range(B)]   # f32 [1, S]

    # ---- encoder layers (static unroll, all weights resident in VMEM) ----
    for l in range(LAYERS):
        xb = x.astype(jnp.bfloat16)

        # fused QKV projection: one lane-dense [BS, 128] matmul
        qkv = _mm(xb, wqkv_ref[l]) + bqkv_ref[l]              # f32 [BS, 128]
        q = (qkv[:, 0 * H:1 * H] * ATTN_SCALE).astype(jnp.bfloat16)
        k = qkv[:, 1 * H:2 * H].astype(jnp.bfloat16)
        v = qkv[:, 2 * H:3 * H].astype(jnp.bfloat16)

        # per-(batch, head) score tiles; no explicit transpose (contract last dims)
        score_tiles = []
        for b in range(B):
            r = slice(b * S, (b + 1) * S)
            for h in range(NH):
                c = slice(h * HD, (h + 1) * HD)
                s_bh = jax.lax.dot_general(
                    q[r, c], k[r, c],
                    dimension_numbers=(((1,), (1,)), ((), ())),   # q @ k^T
                    preferred_element_type=jnp.float32)           # [S, S]
                score_tiles.append(s_bh + bias[b])
        scores = jnp.concatenate(score_tiles, axis=0)             # [B*NH*S, S]

        # ONE softmax over all heads & batches of this layer
        p = _softmax(scores).astype(jnp.bfloat16)

        # context per (batch, head), packed back into lanes -> [BS, H]
        ctx_rows = []
        for b in range(B):
            r = slice(b * S, (b + 1) * S)
            head_ctx = []
            for h in range(NH):
                i = b * NH + h
                c = slice(h * HD, (h + 1) * HD)
                p_bh = p[i * S:(i + 1) * S, :]                    # [S, S] bf16
                head_ctx.append(_mm(p_bh, v[r, c]))               # [S, HD]
            ctx_rows.append(jnp.concatenate(head_ctx, axis=1))    # [S, H]
        ctx = jnp.concatenate(ctx_rows, axis=0)                   # [BS, H] (vregs only)

        # single output projection + residual + LN, then FFN + residual + LN
        attn = _mm(ctx, wo_ref[l]) + bo_ref[l]
        x = _layernorm(x + attn, ln1g_ref[l], ln1b_ref[l])
        hmid = _gelu(_mm(x, wi_ref[l]) + bi_ref[l])
        ffn = _mm(hmid, wf_ref[l]) + bf_ref[l]
        x = _layernorm(x + ffn, ln2g_ref[l], ln2b_ref[l])

    # ---- pooler + classifier on the whole slab (dropout = identity at inference) ----
    pooled = jnp.tanh(_mm(x, wp_ref[...]) + bp_ref[...])          # [BS, H]
    out_ref[...] = _mm(pooled, wc_ref[...]) + bc_ref[...]         # lane-dense [BS, 128]


# ----------------------------- params -----------------------------
def init_params(key):
    keys = iter(jax.random.split(key, 64))

    def dense(i, o):
        return 0.02 * jax.random.normal(next(keys), (i, o), jnp.float32)

    word_emb = 0.02 * jax.random.normal(next(keys), (VOCAB, H), jnp.float32)
    pos_emb = 0.02 * jax.random.normal(next(keys), (MAXPOS, H), jnp.float32)
    type_emb = 0.02 * jax.random.normal(next(keys), (TYPES, H), jnp.float32)

    params = {
        # [VOCAB, 1, H] so the kernel can gather rows via dynamic leading-axis index
        "word_emb_3d": word_emb.reshape(VOCAB, 1, H),
        # position + token-type(0) embedding rows pre-summed (single-segment inputs)
        "pos_type": pos_emb[:S] + type_emb[0][None, :],
        "emb_ln_g": jnp.ones((1, H), jnp.float32),
        "emb_ln_b": jnp.zeros((1, H), jnp.float32),
    }

    per_layer = []
    for _ in range(LAYERS):
        wq, wk, wv = dense(H, H), dense(H, H), dense(H, H)
        wqkv = (jnp.zeros((H, QKV_PAD), jnp.float32)
                .at[:, 0:H].set(wq).at[:, H:2 * H].set(wk).at[:, 2 * H:3 * H].set(wv))
        per_layer.append((
            wqkv.astype(jnp.bfloat16), jnp.zeros((1, QKV_PAD), jnp.float32),      # qkv
            dense(H, H).astype(jnp.bfloat16), jnp.zeros((1, H), jnp.float32),     # attn out proj
            jnp.ones((1, H), jnp.float32), jnp.zeros((1, H), jnp.float32),        # ln1
            dense(H, FF).astype(jnp.bfloat16), jnp.zeros((1, FF), jnp.float32),   # intermediate
            dense(FF, H).astype(jnp.bfloat16), jnp.zeros((1, H), jnp.float32),    # ffn out
            jnp.ones((1, H), jnp.float32), jnp.zeros((1, H), jnp.float32),        # ln2
        ))
    # stack each parameter along a leading [LAYERS, ...] axis
    params["stacked"] = tuple(jnp.stack(ps, axis=0) for ps in zip(*per_layer))

    params["wp"] = dense(H, H).astype(jnp.bfloat16)               # pooler
    params["bp"] = jnp.zeros((1, H), jnp.float32)
    wc = dense(H, NUM_CLASSES)
    # lane-dense classifier: zero-pad output lanes to 128, slice back in wrapper
    params["wc_pad"] = (jnp.zeros((H, PAD_CLASSES), jnp.float32)
                        .at[:, :NUM_CLASSES].set(wc)).astype(jnp.bfloat16)
    params["bc_pad"] = jnp.zeros((1, PAD_CLASSES), jnp.float32)
    return params


# ----------------------------- full forward -----------------------------
def slu_forward(params, input_ids, text_lengths):
    ids_flat = input_ids.reshape(BS).astype(jnp.int32)
    lens = text_lengths.astype(jnp.int32)

    smem = pl.BlockSpec(memory_space=pltpu.MemorySpace.SMEM)
    vmem = pl.BlockSpec(memory_space=pltpu.MemorySpace.VMEM)

    out = pl.pallas_call(
        fused_slu_kernel,
        out_shape=jax.ShapeDtypeStruct((BS, PAD_CLASSES), jnp.float32),
        in_specs=[smem, smem] + [vmem] * 20,
        out_specs=vmem,
    )(ids_flat, lens,
      params["word_emb_3d"], params["pos_type"],
      params["emb_ln_g"], params["emb_ln_b"],
      *params["stacked"],
      params["wp"], params["bp"], params["wc_pad"], params["bc_pad"])

    # rows ::S are the CLS rows of each batch; lanes :NUM_CLASSES are the real logits
    return out[::S, :NUM_CLASSES]


# ----------------------------- main -----------------------------
if __name__ == "__main__":
    key = jax.random.PRNGKey(0)
    k_ids, k_params = jax.random.split(key)

    input_text = jax.random.randint(k_ids, (B, S), 0, VOCAB, dtype=jnp.int32)
    text_lengths = jnp.array([8, 5], dtype=jnp.int32)

    params = init_params(k_params)
    logits = jax.jit(slu_forward)(params, input_text, text_lengths)
    logits = jax.block_until_ready(logits)

    assert logits.shape == (B, NUM_CLASSES), logits.shape
    assert bool(jnp.all(jnp.isfinite(logits)))
    print("KERNEL_OK")
</pallas_src>

<mosaic_0001>
module attributes {stable_mosaic.version = 11 : i64} {
  func.func @fused_slu_kernel(%arg0: memref<16xi32, #tpu.memory_space<smem>>, %arg1: memref<2xi32, #tpu.memory_space<smem>>, %arg2: memref<100x1x32xf32, #tpu.memory_space<vmem>>, %arg3: memref<8x32xf32, #tpu.memory_space<vmem>>, %arg4: memref<1x32xf32, #tpu.memory_space<vmem>>, %arg5: memref<1x32xf32, #tpu.memory_space<vmem>>, %arg6: memref<2x32x128xbf16, #tpu.memory_space<vmem>>, %arg7: memref<2x1x128xf32, #tpu.memory_space<vmem>>, %arg8: memref<2x32x32xbf16, #tpu.memory_space<vmem>>, %arg9: memref<2x1x32xf32, #tpu.memory_space<vmem>>, %arg10: memref<2x1x32xf32, #tpu.memory_space<vmem>>, %arg11: memref<2x1x32xf32, #tpu.memory_space<vmem>>, %arg12: memref<2x32x64xbf16, #tpu.memory_space<vmem>>, %arg13: memref<2x1x64xf32, #tpu.memory_space<vmem>>, %arg14: memref<2x64x32xbf16, #tpu.memory_space<vmem>>, %arg15: memref<2x1x32xf32, #tpu.memory_space<vmem>>, %arg16: memref<2x1x32xf32, #tpu.memory_space<vmem>>, %arg17: memref<2x1x32xf32, #tpu.memory_space<vmem>>, %arg18: memref<32x32xbf16, #tpu.memory_space<vmem>>, %arg19: memref<1x32xf32, #tpu.memory_space<vmem>>, %arg20: memref<32x128xbf16, #tpu.memory_space<vmem>>, %arg21: memref<1x128xf32, #tpu.memory_space<vmem>>, %arg22: memref<16x128xf32, #tpu.memory_space<vmem>>) attributes {dimension_semantics = [], scalar_prefetch = 0 : i64, scratch_operands = 0 : i64, tpu.core_type = #tpu.core_type<tc>} {
    %c0 = arith.constant 0 : index
    %0 = memref.load %arg0[%c0] : memref<16xi32, #tpu.memory_space<smem>>
    %1 = arith.index_cast %0 : i32 to index
    %c0_0 = arith.constant 0 : index
    %c0_1 = arith.constant 0 : index
    %2 = vector.load %arg2[%1, %c0_0, %c0_1] : memref<100x1x32xf32, #tpu.memory_space<vmem>>, vector<1x1x32xf32>
    %3 = vector.shape_cast %2 : vector<1x1x32xf32> to vector<1x32xf32>
    %c1 = arith.constant 1 : index
    %4 = memref.load %arg0[%c1] : memref<16xi32, #tpu.memory_space<smem>>
    %5 = arith.index_cast %4 : i32 to index
    %c0_2 = arith.constant 0 : index
    %c0_3 = arith.constant 0 : index
    %6 = vector.load %arg2[%5, %c0_2, %c0_3] : memref<100x1x32xf32, #tpu.memory_space<vmem>>, vector<1x1x32xf32>
    %7 = vector.shape_cast %6 : vector<1x1x32xf32> to vector<1x32xf32>
    %c2 = arith.constant 2 : index
    %8 = memref.load %arg0[%c2] : memref<16xi32, #tpu.memory_space<smem>>
    %9 = arith.index_cast %8 : i32 to index
    %c0_4 = arith.constant 0 : index
    %c0_5 = arith.constant 0 : index
    %10 = vector.load %arg2[%9, %c0_4, %c0_5] : memref<100x1x32xf32, #tpu.memory_space<vmem>>, vector<1x1x32xf32>
    %11 = vector.shape_cast %10 : vector<1x1x32xf32> to vector<1x32xf32>
    %c3 = arith.constant 3 : index
    %12 = memref.load %arg0[%c3] : memref<16xi32, #tpu.memory_space<smem>>
    %13 = arith.index_cast %12 : i32 to index
    %c0_6 = arith.constant 0 : index
    %c0_7 = arith.constant 0 : index
    %14 = vector.load %arg2[%13, %c0_6, %c0_7] : memref<100x1x32xf32, #tpu.memory_space<vmem>>, vector<1x1x32xf32>
    %15 = vector.shape_cast %14 : vector<1x1x32xf32> to vector<1x32xf32>
    %c4 = arith.constant 4 : index
    %16 = memref.load %arg0[%c4] : memref<16xi32, #tpu.memory_space<smem>>
    %17 = arith.index_cast %16 : i32 to index
    %c0_8 = arith.constant 0 : index
    %c0_9 = arith.constant 0 : index
    %18 = vector.load %arg2[%17, %c0_8, %c0_9] : memref<100x1x32xf32, #tpu.memory_space<vmem>>, vector<1x1x32xf32>
    %19 = vector.shape_cast %18 : vector<1x1x32xf32> to vector<1x32xf32>
    %c5 = arith.constant 5 : index
    %20 = memref.load %arg0[%c5] : memref<16xi32, #tpu.memory_space<smem>>
    %21 = arith.index_cast %20 : i32 to index
    %c0_10 = arith.constant 0 : index
    %c0_11 = arith.constant 0 : index
    %22 = vector.load %arg2[%21, %c0_10, %c0_11] : memref<100x1x32xf32, #tpu.memory_space<vmem>>, vector<1x1x32xf32>
    %23 = vector.shape_cast %22 : vector<1x1x32xf32> to vector<1x32xf32>
    %c6 = arith.constant 6 : index
    %24 = memref.load %arg0[%c6] : memref<16xi32, #tpu.memory_space<smem>>
    %25 = arith.index_cast %24 : i32 to index
    %c0_12 = arith.constant 0 : index
    %c0_13 = arith.constant 0 : index
    %26 = vector.load %arg2[%25, %c0_12, %c0_13] : memref<100x1x32xf32, #tpu.memory_space<vmem>>, vector<1x1x32xf32>
    %27 = vector.shape_cast %26 : vector<1x1x32xf32> to vector<1x32xf32>
    %c7 = arith.constant 7 : index
    %28 = memref.load %arg0[%c7] : memref<16xi32, #tpu.memory_space<smem>>
    %29 = arith.index_cast %28 : i32 to index
    %c0_14 = arith.constant 0 : index
    %c0_15 = arith.constant 0 : index
    %30 = vector.load %arg2[%29, %c0_14, %c0_15] : memref<100x1x32xf32, #tpu.memory_space<vmem>>, vector<1x1x32xf32>
    %31 = vector.shape_cast %30 : vector<1x1x32xf32> to vector<1x32xf32>
    %c8 = arith.constant 8 : index
    %32 = memref.load %arg0[%c8] : memref<16xi32, #tpu.memory_space<smem>>
    %33 = arith.index_cast %32 : i32 to index
    %c0_16 = arith.constant 0 : index
    %c0_17 = arith.constant 0 : index
    %34 = vector.load %arg2[%33, %c0_16, %c0_17] : memref<100x1x32xf32, #tpu.memory_space<vmem>>, vector<1x1x32xf32>
    %35 = vector.shape_cast %34 : vector<1x1x32xf32> to vector<1x32xf32>
    %c9 = arith.constant 9 : index
    %36 = memref.load %arg0[%c9] : memref<16xi32, #tpu.memory_space<smem>>
    %37 = arith.index_cast %36 : i32 to index
    %c0_18 = arith.constant 0 : index
    %c0_19 = arith.constant 0 : index
    %38 = vector.load %arg2[%37, %c0_18, %c0_19] : memref<100x1x32xf32, #tpu.memory_space<vmem>>, vector<1x1x32xf32>
    %39 = vector.shape_cast %38 : vector<1x1x32xf32> to vector<1x32xf32>
    %c10 = arith.constant 10 : index
    %40 = memref.load %arg0[%c10] : memref<16xi32, #tpu.memory_space<smem>>
    %41 = arith.index_cast %40 : i32 to index
    %c0_20 = arith.constant 0 : index
    %c0_21 = arith.constant 0 : index
    %42 = vector.load %arg2[%41, %c0_20, %c0_21] : memref<100x1x32xf32, #tpu.memory_space<vmem>>, vector<1x1x32xf32>
    %43 = vector.shape_cast %42 : vector<1x1x32xf32> to vector<1x32xf32>
    %c11 = arith.constant 11 : index
    %44 = memref.load %arg0[%c11] : memref<16xi32, #tpu.memory_space<smem>>
    %45 = arith.index_cast %44 : i32 to index
    %c0_22 = arith.constant 0 : index
    %c0_23 = arith.constant 0 : index
    %46 = vector.load %arg2[%45, %c0_22, %c0_23] : memref<100x1x32xf32, #tpu.memory_space<vmem>>, vector<1x1x32xf32>
    %47 = vector.shape_cast %46 : vector<1x1x32xf32> to vector<1x32xf32>
    %c12 = arith.constant 12 : index
    %48 = memref.load %arg0[%c12] : memref<16xi32, #tpu.memory_space<smem>>
    %49 = arith.index_cast %48 : i32 to index
    %c0_24 = arith.constant 0 : index
    %c0_25 = arith.constant 0 : index
    %50 = vector.load %arg2[%49, %c0_24, %c0_25] : memref<100x1x32xf32, #tpu.memory_space<vmem>>, vector<1x1x32xf32>
    %51 = vector.shape_cast %50 : vector<1x1x32xf32> to vector<1x32xf32>
    %c13 = arith.constant 13 : index
    %52 = memref.load %arg0[%c13] : memref<16xi32, #tpu.memory_space<smem>>
    %53 = arith.index_cast %52 : i32 to index
    %c0_26 = arith.constant 0 : index
    %c0_27 = arith.constant 0 : index
    %54 = vector.load %arg2[%53, %c0_26, %c0_27] : memref<100x1x32xf32, #tpu.memory_space<vmem>>, vector<1x1x32xf32>
    %55 = vector.shape_cast %54 : vector<1x1x32xf32> to vector<1x32xf32>
    %c14 = arith.constant 14 : index
    %56 = memref.load %arg0[%c14] : memref<16xi32, #tpu.memory_space<smem>>
    %57 = arith.index_cast %56 : i32 to index
    %c0_28 = arith.constant 0 : index
    %c0_29 = arith.constant 0 : index
    %58 = vector.load %arg2[%57, %c0_28, %c0_29] : memref<100x1x32xf32, #tpu.memory_space<vmem>>, vector<1x1x32xf32>
    %59 = vector.shape_cast %58 : vector<1x1x32xf32> to vector<1x32xf32>
    %c15 = arith.constant 15 : index
    %60 = memref.load %arg0[%c15] : memref<16xi32, #tpu.memory_space<smem>>
    %61 = arith.index_cast %60 : i32 to index
    %c0_30 = arith.constant 0 : index
    %c0_31 = arith.constant 0 : index
    %62 = vector.load %arg2[%61, %c0_30, %c0_31] : memref<100x1x32xf32, #tpu.memory_space<vmem>>, vector<1x1x32xf32>
    %63 = vector.shape_cast %62 : vector<1x1x32xf32> to vector<1x32xf32>
    %64 = tpu.concatenate %3, %7, %11, %15, %19, %23, %27, %31, %35, %39, %43, %47, %51, %55, %59, %63 in 0 : vector<1x32xf32>, vector<1x32xf32>, vector<1x32xf32>, vector<1x32xf32>, vector<1x32xf32>, vector<1x32xf32>, vector<1x32xf32>, vector<1x32xf32>, vector<1x32xf32>, vector<1x32xf32>, vector<1x32xf32>, vector<1x32xf32>, vector<1x32xf32>, vector<1x32xf32>, vector<1x32xf32>, vector<1x32xf32> -> vector<16x32xf32>
    %c0_32 = arith.constant 0 : index
    %c0_33 = arith.constant 0 : index
    %65 = vector.load %arg3[%c0_32, %c0_33] : memref<8x32xf32, #tpu.memory_space<vmem>>, vector<8x32xf32>
    %66 = tpu.concatenate %65, %65 in 0 : vector<8x32xf32>, vector<8x32xf32> -> vector<16x32xf32>
    %67 = arith.addf %64, %66 : vector<16x32xf32>
    %c0_34 = arith.constant 0 : index
    %c0_35 = arith.constant 0 : index
    %68 = vector.load %arg4[%c0_34, %c0_35] : memref<1x32xf32, #tpu.memory_space<vmem>>, vector<1x32xf32>
    %c0_36 = arith.constant 0 : index
    %c0_37 = arith.constant 0 : index
    %69 = vector.load %arg5[%c0_36, %c0_37] : memref<1x32xf32, #tpu.memory_space<vmem>>, vector<1x32xf32>
    %cst = arith.constant dense<0.000000e+00> : vector<16xf32>
    %70 = vector.multi_reduction <add>, %67, %cst [1] : vector<16x32xf32> to vector<16xf32>
    %71 = vector.shape_cast %70 : vector<16xf32> to vector<16x1xf32>
    %cst_38 = arith.constant 3.200000e+01 : f32
    %72 = vector.broadcast %cst_38 : f32 to vector<16x1xf32>
    %73 = arith.divf %71, %72 : vector<16x1xf32>
    %74 = vector.broadcast %73 : vector<16x1xf32> to vector<16x32xf32>
    %75 = arith.subf %67, %74 : vector<16x32xf32>
    %76 = arith.mulf %75, %75 : vector<16x32xf32>
    %cst_39 = arith.constant dense<0.000000e+00> : vector<16xf32>
    %77 = vector.multi_reduction <add>, %76, %cst_39 [1] : vector<16x32xf32> to vector<16xf32>
    %78 = vector.shape_cast %77 : vector<16xf32> to vector<16x1xf32>
    %cst_40 = arith.constant 3.200000e+01 : f32
    %79 = vector.broadcast %cst_40 : f32 to vector<16x1xf32>
    %80 = arith.divf %78, %79 : vector<16x1xf32>
    %81 = vector.broadcast %73 : vector<16x1xf32> to vector<16x32xf32>
    %82 = arith.subf %67, %81 : vector<16x32xf32>
    %cst_41 = arith.constant 9.99999996E-13 : f32
    %83 = vector.broadcast %cst_41 : f32 to vector<16x1xf32>
    %84 = arith.addf %80, %83 : vector<16x1xf32>
    %85 = math.rsqrt %84 : vector<16x1xf32>
    %86 = vector.broadcast %85 : vector<16x1xf32> to vector<16x32xf32>
    %87 = arith.mulf %82, %86 : vector<16x32xf32>
    %88 = vector.broadcast %68 : vector<1x32xf32> to vector<16x32xf32>
    %89 = arith.mulf %87, %88 : vector<16x32xf32>
    %90 = vector.broadcast %69 : vector<1x32xf32> to vector<16x32xf32>
    %91 = arith.addf %89, %90 : vector<16x32xf32>
    %92 = tpu.iota {dimensions = array<i32: 1>} : vector<1x8xi32>
    %c0_42 = arith.constant 0 : index
    %93 = memref.load %arg1[%c0_42] : memref<2xi32, #tpu.memory_space<smem>>
    %94 = vector.broadcast %93 : i32 to vector<1x8xi32>
    %95 = arith.cmpi slt, %92, %94 : vector<1x8xi32>
    %cst_43 = arith.constant 0.000000e+00 : f32
    %cst_44 = arith.constant -1.000000e+04 : f32
    %96 = vector.broadcast %cst_43 : f32 to vector<1x8xf32>
    %97 = vector.broadcast %cst_44 : f32 to vector<1x8xf32>
    %98 = arith.select %95, %96, %97 : vector<1x8xi1>, vector<1x8xf32>
    %c1_45 = arith.constant 1 : index
    %99 = memref.load %arg1[%c1_45] : memref<2xi32, #tpu.memory_space<smem>>
    %100 = vector.broadcast %99 : i32 to vector<1x8xi32>
    %101 = arith.cmpi slt, %92, %100 : vector<1x8xi32>
    %cst_46 = arith.constant 0.000000e+00 : f32
    %cst_47 = arith.constant -1.000000e+04 : f32
    %102 = vector.broadcast %cst_46 : f32 to vector<1x8xf32>
    %103 = vector.broadcast %cst_47 : f32 to vector<1x8xf32>
    %104 = arith.select %101, %102, %103 : vector<1x8xi1>, vector<1x8xf32>
    %105 = arith.truncf %91 : vector<16x32xf32> to vector<16x32xbf16>
    %c0_48 = arith.constant 0 : index
    %c0_49 = arith.constant 0 : index
    %c0_50 = arith.constant 0 : index
    %106 = vector.load %arg6[%c0_48, %c0_49, %c0_50] : memref<2x32x128xbf16, #tpu.memory_space<vmem>>, vector<1x32x128xbf16>
    %107 = vector.shape_cast %106 : vector<1x32x128xbf16> to vector<32x128xbf16>
    %cst_51 = arith.constant dense<0.000000e+00> : vector<16x128xf32>
    %108 = tpu.matmul %105, %107, %cst_51 {dimension_numbers = #tpu.dot_dimension_numbers<[1], [0], [0], [1], [0, 0, 1, 1], [], []>} : vector<16x32xbf16>, vector<32x128xbf16>, vector<16x128xf32> -> vector<16x128xf32>
    %c0_52 = arith.constant 0 : index
    %c0_53 = arith.constant 0 : index
    %c0_54 = arith.constant 0 : index
    %109 = vector.load %arg7[%c0_52, %c0_53, %c0_54] : memref<2x1x128xf32, #tpu.memory_space<vmem>>, vector<1x1x128xf32>
    %110 = vector.shape_cast %109 : vector<1x1x128xf32> to vector<1x128xf32>
    %111 = vector.broadcast %110 : vector<1x128xf32> to vector<16x128xf32>
    %112 = arith.addf %108, %111 : vector<16x128xf32>
    %113 = vector.extract_strided_slice %112 {offsets = [0, 0], sizes = [16, 32], strides = [1, 1]} : vector<16x128xf32> to vector<16x32xf32>
    %cst_55 = arith.constant 0.353553385 : f32
    %114 = vector.broadcast %cst_55 : f32 to vector<16x32xf32>
    %115 = arith.mulf %113, %114 : vector<16x32xf32>
    %116 = arith.truncf %115 : vector<16x32xf32> to vector<16x32xbf16>
    %117 = vector.extract_strided_slice %112 {offsets = [0, 32], sizes = [16, 32], strides = [1, 1]} : vector<16x128xf32> to vector<16x32xf32>
    %118 = arith.truncf %117 : vector<16x32xf32> to vector<16x32xbf16>
    %119 = vector.extract_strided_slice %112 {offsets = [0, 64], sizes = [16, 32], strides = [1, 1]} : vector<16x128xf32> to vector<16x32xf32>
    %120 = arith.truncf %119 : vector<16x32xf32> to vector<16x32xbf16>
    %121 = vector.extract_strided_slice %116 {offsets = [0, 0], sizes = [8, 8], strides = [1, 1]} : vector<16x32xbf16> to vector<8x8xbf16>
    %122 = vector.extract_strided_slice %118 {offsets = [0, 0], sizes = [8, 8], strides = [1, 1]} : vector<16x32xbf16> to vector<8x8xbf16>
    %cst_56 = arith.constant dense<0.000000e+00> : vector<8x8xf32>
    %123 = tpu.matmul %121, %122, %cst_56 {dimension_numbers = #tpu.dot_dimension_numbers<[1], [1], [0], [0], [0, 0, 1, 0], [], []>} : vector<8x8xbf16>, vector<8x8xbf16>, vector<8x8xf32> -> vector<8x8xf32>
    %124 = vector.broadcast %98 : vector<1x8xf32> to vector<8x8xf32>
    %125 = arith.addf %123, %124 : vector<8x8xf32>
    %126 = vector.extract_strided_slice %116 {offsets = [0, 8], sizes = [8, 8], strides = [1, 1]} : vector<16x32xbf16> to vector<8x8xbf16>
    %127 = vector.extract_strided_slice %118 {offsets = [0, 8], sizes = [8, 8], strides = [1, 1]} : vector<16x32xbf16> to vector<8x8xbf16>
    %cst_57 = arith.constant dense<0.000000e+00> : vector<8x8xf32>
    %128 = tpu.matmul %126, %127, %cst_57 {dimension_numbers = #tpu.dot_dimension_numbers<[1], [1], [0], [0], [0, 0, 1, 0], [], []>} : vector<8x8xbf16>, vector<8x8xbf16>, vector<8x8xf32> -> vector<8x8xf32>
    %129 = vector.broadcast %98 : vector<1x8xf32> to vector<8x8xf32>
    %130 = arith.addf %128, %129 : vector<8x8xf32>
    %131 = vector.extract_strided_slice %116 {offsets = [0, 16], sizes = [8, 8], strides = [1, 1]} : vector<16x32xbf16> to vector<8x8xbf16>
    %132 = vector.extract_strided_slice %118 {offsets = [0, 16], sizes = [8, 8], strides = [1, 1]} : vector<16x32xbf16> to vector<8x8xbf16>
    %cst_58 = arith.constant dense<0.000000e+00> : vector<8x8xf32>
    %133 = tpu.matmul %131, %132, %cst_58 {dimension_numbers = #tpu.dot_dimension_numbers<[1], [1], [0], [0], [0, 0, 1, 0], [], []>} : vector<8x8xbf16>, vector<8x8xbf16>, vector<8x8xf32> -> vector<8x8xf32>
    %134 = vector.broadcast %98 : vector<1x8xf32> to vector<8x8xf32>
    %135 = arith.addf %133, %134 : vector<8x8xf32>
    %136 = vector.extract_strided_slice %116 {offsets = [0, 24], sizes = [8, 8], strides = [1, 1]} : vector<16x32xbf16> to vector<8x8xbf16>
    %137 = vector.extract_strided_slice %118 {offsets = [0, 24], sizes = [8, 8], strides = [1, 1]} : vector<16x32xbf16> to vector<8x8xbf16>
    %cst_59 = arith.constant dense<0.000000e+00> : vector<8x8xf32>
    %138 = tpu.matmul %136, %137, %cst_59 {dimension_numbers = #tpu.dot_dimension_numbers<[1], [1], [0], [0], [0, 0, 1, 0], [], []>} : vector<8x8xbf16>, vector<8x8xbf16>, vector<8x8xf32> -> vector<8x8xf32>
    %139 = vector.broadcast %98 : vector<1x8xf32> to vector<8x8xf32>
    %140 = arith.addf %138, %139 : vector<8x8xf32>
    %141 = vector.extract_strided_slice %116 {offsets = [8, 0], sizes = [8, 8], strides = [1, 1]} : vector<16x32xbf16> to vector<8x8xbf16>
    %142 = vector.extract_strided_slice %118 {offsets = [8, 0], sizes = [8, 8], strides = [1, 1]} : vector<16x32xbf16> to vector<8x8xbf16>
    %cst_60 = arith.constant dense<0.000000e+00> : vector<8x8xf32>
    %143 = tpu.matmul %141, %142, %cst_60 {dimension_numbers = #tpu.dot_dimension_numbers<[1], [1], [0], [0], [0, 0, 1, 0], [], []>} : vector<8x8xbf16>, vector<8x8xbf16>, vector<8x8xf32> -> vector<8x8xf32>
    %144 = vector.broadcast %104 : vector<1x8xf32> to vector<8x8xf32>
    %145 = arith.addf %143, %144 : vector<8x8xf32>
    %146 = vector.extract_strided_slice %116 {offsets = [8, 8], sizes = [8, 8], strides = [1, 1]} : vector<16x32xbf16> to vector<8x8xbf16>
    %147 = vector.extract_strided_slice %118 {offsets = [8, 8], sizes = [8, 8], strides = [1, 1]} : vector<16x32xbf16> to vector<8x8xbf16>
    %cst_61 = arith.constant dense<0.000000e+00> : vector<8x8xf32>
    %148 = tpu.matmul %146, %147, %cst_61 {dimension_numbers = #tpu.dot_dimension_numbers<[1], [1], [0], [0], [0, 0, 1, 0], [], []>} : vector<8x8xbf16>, vector<8x8xbf16>, vector<8x8xf32> -> vector<8x8xf32>
    %149 = vector.broadcast %104 : vector<1x8xf32> to vector<8x8xf32>
    %150 = arith.addf %148, %149 : vector<8x8xf32>
    %151 = vector.extract_strided_slice %116 {offsets = [8, 16], sizes = [8, 8], strides = [1, 1]} : vector<16x32xbf16> to vector<8x8xbf16>
    %152 = vector.extract_strided_slice %118 {offsets = [8, 16], sizes = [8, 8], strides = [1, 1]} : vector<16x32xbf16> to vector<8x8xbf16>
    %cst_62 = arith.constant dense<0.000000e+00> : vector<8x8xf32>
    %153 = tpu.matmul %151, %152, %cst_62 {dimension_numbers = #tpu.dot_dimension_numbers<[1], [1], [0], [0], [0, 0, 1, 0], [], []>} : vector<8x8xbf16>, vector<8x8xbf16>, vector<8x8xf32> -> vector<8x8xf32>
    %154 = vector.broadcast %104 : vector<1x8xf32> to vector<8x8xf32>
    %155 = arith.addf %153, %154 : vector<8x8xf32>
    %156 = vector.extract_strided_slice %116 {offsets = [8, 24], sizes = [8, 8], strides = [1, 1]} : vector<16x32xbf16> to vector<8x8xbf16>
    %157 = vector.extract_strided_slice %118 {offsets = [8, 24], sizes = [8, 8], strides = [1, 1]} : vector<16x32xbf16> to vector<8x8xbf16>
    %cst_63 = arith.constant dense<0.000000e+00> : vector<8x8xf32>
    %158 = tpu.matmul %156, %157, %cst_63 {dimension_numbers = #tpu.dot_dimension_numbers<[1], [1], [0], [0], [0, 0, 1, 0], [], []>} : vector<8x8xbf16>, vector<8x8xbf16>, vector<8x8xf32> -> vector<8x8xf32>
    %159 = vector.broadcast %104 : vector<1x8xf32> to vector<8x8xf32>
    %160 = arith.addf %158, %159 : vector<8x8xf32>
    %161 = tpu.concatenate %125, %130, %135, %140, %145, %150, %155, %160 in 0 : vector<8x8xf32>, vector<8x8xf32>, vector<8x8xf32>, vector<8x8xf32>, vector<8x8xf32>, vector<8x8xf32>, vector<8x8xf32>, vector<8x8xf32> -> vector<64x8xf32>
    %cst_64 = arith.constant dense<0xFF800000> : vector<64xf32>
    %162 = vector.multi_reduction <maximumf>, %161, %cst_64 [1] : vector<64x8xf32> to vector<64xf32>
    %163 = vector.shape_cast %162 : vector<64xf32> to vector<64x1xf32>
    %164 = vector.broadcast %163 : vector<64x1xf32> to vector<64x8xf32>
    %165 = arith.subf %161, %164 : vector<64x8xf32>
    %166 = math.exp %165 : vector<64x8xf32>
    %cst_65 = arith.constant dense<0.000000e+00> : vector<64xf32>
    %167 = vector.multi_reduction <add>, %166, %cst_65 [1] : vector<64x8xf32> to vector<64xf32>
    %168 = vector.shape_cast %167 : vector<64xf32> to vector<64x1xf32>
    %169 = tpu.reciprocal %168 {approx = true} : vector<64x1xf32> -> vector<64x1xf32>
    %170 = vector.broadcast %169 : vector<64x1xf32> to vector<64x8xf32>
    %171 = arith.mulf %166, %170 : vector<64x8xf32>
    %172 = arith.truncf %171 : vector<64x8xf32> to vector<64x8xbf16>
    %173 = vector.extract_strided_slice %172 {offsets = [0, 0], sizes = [8, 8], strides = [1, 1]} : vector<64x8xbf16> to vector<8x8xbf16>
    %174 = vector.extract_strided_slice %120 {offsets = [0, 0], sizes = [8, 8], strides = [1, 1]} : vector<16x32xbf16> to vector<8x8xbf16>
    %cst_66 = arith.constant dense<0.000000e+00> : vector<8x8xf32>
    %175 = tpu.matmul %173, %174, %cst_66 {dimension_numbers = #tpu.dot_dimension_numbers<[1], [0], [0], [1], [0, 0, 1, 1], [], []>} : vector<8x8xbf16>, vector<8x8xbf16>, vector<8x8xf32> -> vector<8x8xf32>
    %176 = vector.extract_strided_slice %172 {offsets = [8, 0], sizes = [8, 8], strides = [1, 1]} : vector<64x8xbf16> to vector<8x8xbf16>
    %177 = vector.extract_strided_slice %120 {offsets = [0, 8], sizes = [8, 8], strides = [1, 1]} : vector<16x32xbf16> to vector<8x8xbf16>
    %cst_67 = arith.constant dense<0.000000e+00> : vector<8x8xf32>
    %178 = tpu.matmul %176, %177, %cst_67 {dimension_numbers = #tpu.dot_dimension_numbers<[1], [0], [0], [1], [0, 0, 1, 1], [], []>} : vector<8x8xbf16>, vector<8x8xbf16>, vector<8x8xf32> -> vector<8x8xf32>
    %179 = vector.extract_strided_slice %172 {offsets = [16, 0], sizes = [8, 8], strides = [1, 1]} : vector<64x8xbf16> to vector<8x8xbf16>
    %180 = vector.extract_strided_slice %120 {offsets = [0, 16], sizes = [8, 8], strides = [1, 1]} : vector<16x32xbf16> to vector<8x8xbf16>
    %cst_68 = arith.constant dense<0.000000e+00> : vector<8x8xf32>
    %181 = tpu.matmul %179, %180, %cst_68 {dimension_numbers = #tpu.dot_dimension_numbers<[1], [0], [0], [1], [0, 0, 1, 1], [], []>} : vector<8x8xbf16>, vector<8x8xbf16>, vector<8x8xf32> -> vector<8x8xf32>
    %182 = vector.extract_strided_slice %172 {offsets = [24, 0], sizes = [8, 8], strides = [1, 1]} : vector<64x8xbf16> to vector<8x8xbf16>
    %183 = vector.extract_strided_slice %120 {offsets = [0, 24], sizes = [8, 8], strides = [1, 1]} : vector<16x32xbf16> to vector<8x8xbf16>
    %cst_69 = arith.constant dense<0.000000e+00> : vector<8x8xf32>
    %184 = tpu.matmul %182, %183, %cst_69 {dimension_numbers = #tpu.dot_dimension_numbers<[1], [0], [0], [1], [0, 0, 1, 1], [], []>} : vector<8x8xbf16>, vector<8x8xbf16>, vector<8x8xf32> -> vector<8x8xf32>
    %185 = tpu.concatenate %175, %178, %181, %184 in 1 : vector<8x8xf32>, vector<8x8xf32>, vector<8x8xf32>, vector<8x8xf32> -> vector<8x32xf32>
    %186 = vector.extract_strided_slice %172 {offsets = [32, 0], sizes = [8, 8], strides = [1, 1]} : vector<64x8xbf16> to vector<8x8xbf16>
    %187 = vector.extract_strided_slice %120 {offsets = [8, 0], sizes = [8, 8], strides = [1, 1]} : vector<16x32xbf16> to vector<8x8xbf16>
    %cst_70 = arith.constant dense<0.000000e+00> : vector<8x8xf32>
    %188 = tpu.matmul %186, %187, %cst_70 {dimension_numbers = #tpu.dot_dimension_numbers<[1], [0], [0], [1], [0, 0, 1, 1], [], []>} : vector<8x8xbf16>, vector<8x8xbf16>, vector<8x8xf32> -> vector<8x8xf32>
    %189 = vector.extract_strided_slice %172 {offsets = [40, 0], sizes = [8, 8], strides = [1, 1]} : vector<64x8xbf16> to vector<8x8xbf16>
    %190 = vector.extract_strided_slice %120 {offsets = [8, 8], sizes = [8, 8], strides = [1, 1]} : vector<16x32xbf16> to vector<8x8xbf16>
    %cst_71 = arith.constant dense<0.000000e+00> : vector<8x8xf32>
    %191 = tpu.matmul %189, %190, %cst_71 {dimension_numbers = #tpu.dot_dimension_numbers<[1], [0], [0], [1], [0, 0, 1, 1], [], []>} : vector<8x8xbf16>, vector<8x8xbf16>, vector<8x8xf32> -> vector<8x8xf32>
    %192 = vector.extract_strided_slice %172 {offsets = [48, 0], sizes = [8, 8], strides = [1, 1]} : vector<64x8xbf16> to vector<8x8xbf16>
    %193 = vector.extract_strided_slice %120 {offsets = [8, 16], sizes = [8, 8], strides = [1, 1]} : vector<16x32xbf16> to vector<8x8xbf16>
    %cst_72 = arith.constant dense<0.000000e+00> : vector<8x8xf32>
    %194 = tpu.matmul %192, %193, %cst_72 {dimension_numbers = #tpu.dot_dimension_numbers<[1], [0], [0], [1], [0, 0, 1, 1], [], []>} : vector<8x8xbf16>, vector<8x8xbf16>, vector<8x8xf32> -> vector<8x8xf32>
    %195 = vector.extract_strided_slice %172 {offsets = [56, 0], sizes = [8, 8], strides = [1, 1]} : vector<64x8xbf16> to vector<8x8xbf16>
    %196 = vector.extract_strided_slice %120 {offsets = [8, 24], sizes = [8, 8], strides = [1, 1]} : vector<16x32xbf16> to vector<8x8xbf16>
    %cst_73 = arith.constant dense<0.000000e+00> : vector<8x8xf32>
    %197 = tpu.matmul %195, %196, %cst_73 {dimension_numbers = #tpu.dot_dimension_numbers<[1], [0], [0], [1], [0, 0, 1, 1], [], []>} : vector<8x8xbf16>, vector<8x8xbf16>, vector<8x8xf32> -> vector<8x8xf32>
    %198 = tpu.concatenate %188, %191, %194, %197 in 1 : vector<8x8xf32>, vector<8x8xf32>, vector<8x8xf32>, vector<8x8xf32> -> vector<8x32xf32>
    %199 = tpu.concatenate %185, %198 in 0 : vector<8x32xf32>, vector<8x32xf32> -> vector<16x32xf32>
    %c0_74 = arith.constant 0 : index
    %c0_75 = arith.constant 0 : index
    %c0_76 = arith.constant 0 : index
    %200 = vector.load %arg8[%c0_74, %c0_75, %c0_76] : memref<2x32x32xbf16, #tpu.memory_space<vmem>>, vector<1x32x32xbf16>
    %201 = vector.shape_cast %200 : vector<1x32x32xbf16> to vector<32x32xbf16>
    %202 = arith.truncf %199 : vector<16x32xf32> to vector<16x32xbf16>
    %cst_77 = arith.constant dense<0.000000e+00> : vector<16x32xf32>
    %203 = tpu.matmul %202, %201, %cst_77 {dimension_numbers = #tpu.dot_dimension_numbers<[1], [0], [0], [1], [0, 0, 1, 1], [], []>} : vector<16x32xbf16>, vector<32x32xbf16>, vector<16x32xf32> -> vector<16x32xf32>
    %c0_78 = arith.constant 0 : index
    %c0_79 = arith.constant 0 : index
    %c0_80 = arith.constant 0 : index
    %204 = vector.load %arg9[%c0_78, %c0_79, %c0_80] : memref<2x1x32xf32, #tpu.memory_space<vmem>>, vector<1x1x32xf32>
    %205 = vector.shape_cast %204 : vector<1x1x32xf32> to vector<1x32xf32>
    %206 = vector.broadcast %205 : vector<1x32xf32> to vector<16x32xf32>
    %207 = arith.addf %203, %206 : vector<16x32xf32>
    %208 = arith.addf %91, %207 : vector<16x32xf32>
    %c0_81 = arith.constant 0 : index
    %c0_82 = arith.constant 0 : index
    %c0_83 = arith.constant 0 : index
    %209 = vector.load %arg10[%c0_81, %c0_82, %c0_83] : memref<2x1x32xf32, #tpu.memory_space<vmem>>, vector<1x1x32xf32>
    %210 = vector.shape_cast %209 : vector<1x1x32xf32> to vector<1x32xf32>
    %c0_84 = arith.constant 0 : index
    %c0_85 = arith.constant 0 : index
    %c0_86 = arith.constant 0 : index
    %211 = vector.load %arg11[%c0_84, %c0_85, %c0_86] : memref<2x1x32xf32, #tpu.memory_space<vmem>>, vector<1x1x32xf32>
    %212 = vector.shape_cast %211 : vector<1x1x32xf32> to vector<1x32xf32>
    %cst_87 = arith.constant dense<0.000000e+00> : vector<16xf32>
    %213 = vector.multi_reduction <add>, %208, %cst_87 [1] : vector<16x32xf32> to vector<16xf32>
    %214 = vector.shape_cast %213 : vector<16xf32> to vector<16x1xf32>
    %cst_88 = arith.constant 3.200000e+01 : f32
    %215 = vector.broadcast %cst_88 : f32 to vector<16x1xf32>
    %216 = arith.divf %214, %215 : vector<16x1xf32>
    %217 = vector.broadcast %216 : vector<16x1xf32> to vector<16x32xf32>
    %218 = arith.subf %208, %217 : vector<16x32xf32>
    %219 = arith.mulf %218, %218 : vector<16x32xf32>
    %cst_89 = arith.constant dense<0.000000e+00> : vector<16xf32>
    %220 = vector.multi_reduction <add>, %219, %cst_89 [1] : vector<16x32xf32> to vector<16xf32>
    %221 = vector.shape_cast %220 : vector<16xf32> to vector<16x1xf32>
    %cst_90 = arith.constant 3.200000e+01 : f32
    %222 = vector.broadcast %cst_90 : f32 to vector<16x1xf32>
    %223 = arith.divf %221, %222 : vector<16x1xf32>
    %224 = vector.broadcast %216 : vector<16x1xf32> to vector<16x32xf32>
    %225 = arith.subf %208, %224 : vector<16x32xf32>
    %cst_91 = arith.constant 9.99999996E-13 : f32
    %226 = vector.broadcast %cst_91 : f32 to vector<16x1xf32>
    %227 = arith.addf %223, %226 : vector<16x1xf32>
    %228 = math.rsqrt %227 : vector<16x1xf32>
    %229 = vector.broadcast %228 : vector<16x1xf32> to vector<16x32xf32>
    %230 = arith.mulf %225, %229 : vector<16x32xf32>
    %231 = vector.broadcast %210 : vector<1x32xf32> to vector<16x32xf32>
    %232 = arith.mulf %230, %231 : vector<16x32xf32>
    %233 = vector.broadcast %212 : vector<1x32xf32> to vector<16x32xf32>
    %234 = arith.addf %232, %233 : vector<16x32xf32>
    %c0_92 = arith.constant 0 : index
    %c0_93 = arith.constant 0 : index
    %c0_94 = arith.constant 0 : index
    %235 = vector.load %arg12[%c0_92, %c0_93, %c0_94] : memref<2x32x64xbf16, #tpu.memory_space<vmem>>, vector<1x32x64xbf16>
    %236 = vector.shape_cast %235 : vector<1x32x64xbf16> to vector<32x64xbf16>
    %237 = arith.truncf %234 : vector<16x32xf32> to vector<16x32xbf16>
    %cst_95 = arith.constant dense<0.000000e+00> : vector<16x64xf32>
    %238 = tpu.matmul %237, %236, %cst_95 {dimension_numbers = #tpu.dot_dimension_numbers<[1], [0], [0], [1], [0, 0, 1, 1], [], []>} : vector<16x32xbf16>, vector<32x64xbf16>, vector<16x64xf32> -> vector<16x64xf32>
    %c0_96 = arith.constant 0 : index
    %c0_97 = arith.constant 0 : index
    %c0_98 = arith.constant 0 : index
    %239 = vector.load %arg13[%c0_96, %c0_97, %c0_98] : memref<2x1x64xf32, #tpu.memory_space<vmem>>, vector<1x1x64xf32>
    %240 = vector.shape_cast %239 : vector<1x1x64xf32> to vector<1x64xf32>
    %241 = vector.broadcast %240 : vector<1x64xf32> to vector<16x64xf32>
    %242 = arith.addf %238, %241 : vector<16x64xf32>
    %cst_99 = arith.constant 5.000000e-01 : f32
    %243 = vector.broadcast %cst_99 : f32 to vector<16x64xf32>
    %244 = arith.mulf %243, %242 : vector<16x64xf32>
    %cst_100 = arith.constant 4.471500e-02 : f32
    %245 = vector.broadcast %cst_100 : f32 to vector<16x64xf32>
    %246 = arith.mulf %245, %242 : vector<16x64xf32>
    %247 = arith.mulf %246, %242 : vector<16x64xf32>
    %248 = arith.mulf %247, %242 : vector<16x64xf32>
    %249 = arith.addf %242, %248 : vector<16x64xf32>
    %cst_101 = arith.constant 0.797884583 : f32
    %250 = vector.broadcast %cst_101 : f32 to vector<16x64xf32>
    %251 = arith.mulf %250, %249 : vector<16x64xf32>
    %252 = math.tanh %251 : vector<16x64xf32>
    %cst_102 = arith.constant 1.000000e+00 : f32
    %253 = vector.broadcast %cst_102 : f32 to vector<16x64xf32>
    %254 = arith.addf %253, %252 : vector<16x64xf32>
    %255 = arith.mulf %244, %254 : vector<16x64xf32>
    %c0_103 = arith.constant 0 : index
    %c0_104 = arith.constant 0 : index
    %c0_105 = arith.constant 0 : index
    %256 = vector.load %arg14[%c0_103, %c0_104, %c0_105] : memref<2x64x32xbf16, #tpu.memory_space<vmem>>, vector<1x64x32xbf16>
    %257 = vector.shape_cast %256 : vector<1x64x32xbf16> to vector<64x32xbf16>
    %258 = arith.truncf %255 : vector<16x64xf32> to vector<16x64xbf16>
    %cst_106 = arith.constant dense<0.000000e+00> : vector<16x32xf32>
    %259 = tpu.matmul %258, %257, %cst_106 {dimension_numbers = #tpu.dot_dimension_numbers<[1], [0], [0], [1], [0, 0, 1, 1], [], []>} : vector<16x64xbf16>, vector<64x32xbf16>, vector<16x32xf32> -> vector<16x32xf32>
    %c0_107 = arith.constant 0 : index
    %c0_108 = arith.constant 0 : index
    %c0_109 = arith.constant 0 : index
    %260 = vector.load %arg15[%c0_107, %c0_108, %c0_109] : memref<2x1x32xf32, #tpu.memory_space<vmem>>, vector<1x1x32xf32>
    %261 = vector.shape_cast %260 : vector<1x1x32xf32> to vector<1x32xf32>
    %262 = vector.broadcast %261 : vector<1x32xf32> to vector<16x32xf32>
    %263 = arith.addf %259, %262 : vector<16x32xf32>
    %264 = arith.addf %234, %263 : vector<16x32xf32>
    %c0_110 = arith.constant 0 : index
    %c0_111 = arith.constant 0 : index
    %c0_112 = arith.constant 0 : index
    %265 = vector.load %arg16[%c0_110, %c0_111, %c0_112] : memref<2x1x32xf32, #tpu.memory_space<vmem>>, vector<1x1x32xf32>
    %266 = vector.shape_cast %265 : vector<1x1x32xf32> to vector<1x32xf32>
    %c0_113 = arith.constant 0 : index
    %c0_114 = arith.constant 0 : index
    %c0_115 = arith.constant 0 : index
    %267 = vector.load %arg17[%c0_113, %c0_114, %c0_115] : memref<2x1x32xf32, #tpu.memory_space<vmem>>, vector<1x1x32xf32>
    %268 = vector.shape_cast %267 : vector<1x1x32xf32> to vector<1x32xf32>
    %cst_116 = arith.constant dense<0.000000e+00> : vector<16xf32>
    %269 = vector.multi_reduction <add>, %264, %cst_116 [1] : vector<16x32xf32> to vector<16xf32>
    %270 = vector.shape_cast %269 : vector<16xf32> to vector<16x1xf32>
    %cst_117 = arith.constant 3.200000e+01 : f32
    %271 = vector.broadcast %cst_117 : f32 to vector<16x1xf32>
    %272 = arith.divf %270, %271 : vector<16x1xf32>
    %273 = vector.broadcast %272 : vector<16x1xf32> to vector<16x32xf32>
    %274 = arith.subf %264, %273 : vector<16x32xf32>
    %275 = arith.mulf %274, %274 : vector<16x32xf32>
    %cst_118 = arith.constant dense<0.000000e+00> : vector<16xf32>
    %276 = vector.multi_reduction <add>, %275, %cst_118 [1] : vector<16x32xf32> to vector<16xf32>
    %277 = vector.shape_cast %276 : vector<16xf32> to vector<16x1xf32>
    %cst_119 = arith.constant 3.200000e+01 : f32
    %278 = vector.broadcast %cst_119 : f32 to vector<16x1xf32>
    %279 = arith.divf %277, %278 : vector<16x1xf32>
    %280 = vector.broadcast %272 : vector<16x1xf32> to vector<16x32xf32>
    %281 = arith.subf %264, %280 : vector<16x32xf32>
    %cst_120 = arith.constant 9.99999996E-13 : f32
    %282 = vector.broadcast %cst_120 : f32 to vector<16x1xf32>
    %283 = arith.addf %279, %282 : vector<16x1xf32>
    %284 = math.rsqrt %283 : vector<16x1xf32>
    %285 = vector.broadcast %284 : vector<16x1xf32> to vector<16x32xf32>
    %286 = arith.mulf %281, %285 : vector<16x32xf32>
    %287 = vector.broadcast %266 : vector<1x32xf32> to vector<16x32xf32>
    %288 = arith.mulf %286, %287 : vector<16x32xf32>
    %289 = vector.broadcast %268 : vector<1x32xf32> to vector<16x32xf32>
    %290 = arith.addf %288, %289 : vector<16x32xf32>
    %291 = arith.truncf %290 : vector<16x32xf32> to vector<16x32xbf16>
    %c1_121 = arith.constant 1 : index
    %c0_122 = arith.constant 0 : index
    %c0_123 = arith.constant 0 : index
    %292 = vector.load %arg6[%c1_121, %c0_122, %c0_123] : memref<2x32x128xbf16, #tpu.memory_space<vmem>>, vector<1x32x128xbf16>
    %293 = vector.shape_cast %292 : vector<1x32x128xbf16> to vector<32x128xbf16>
    %cst_124 = arith.constant dense<0.000000e+00> : vector<16x128xf32>
    %294 = tpu.matmul %291, %293, %cst_124 {dimension_numbers = #tpu.dot_dimension_numbers<[1], [0], [0], [1], [0, 0, 1, 1], [], []>} : vector<16x32xbf16>, vector<32x128xbf16>, vector<16x128xf32> -> vector<16x128xf32>
    %c1_125 = arith.constant 1 : index
    %c0_126 = arith.constant 0 : index
    %c0_127 = arith.constant 0 : index
    %295 = vector.load %arg7[%c1_125, %c0_126, %c0_127] : memref<2x1x128xf32, #tpu.memory_space<vmem>>, vector<1x1x128xf32>
    %296 = vector.shape_cast %295 : vector<1x1x128xf32> to vector<1x128xf32>
    %297 = vector.broadcast %296 : vector<1x128xf32> to vector<16x128xf32>
    %298 = arith.addf %294, %297 : vector<16x128xf32>
    %299 = vector.extract_strided_slice %298 {offsets = [0, 0], sizes = [16, 32], strides = [1, 1]} : vector<16x128xf32> to vector<16x32xf32>
    %cst_128 = arith.constant 0.353553385 : f32
    %300 = vector.broadcast %cst_128 : f32 to vector<16x32xf32>
    %301 = arith.mulf %299, %300 : vector<16x32xf32>
    %302 = arith.truncf %301 : vector<16x32xf32> to vector<16x32xbf16>
    %303 = vector.extract_strided_slice %298 {offsets = [0, 32], sizes = [16, 32], strides = [1, 1]} : vector<16x128xf32> to vector<16x32xf32>
    %304 = arith.truncf %303 : vector<16x32xf32> to vector<16x32xbf16>
    %305 = vector.extract_strided_slice %298 {offsets = [0, 64], sizes = [16, 32], strides = [1, 1]} : vector<16x128xf32> to vector<16x32xf32>
    %306 = arith.truncf %305 : vector<16x32xf32> to vector<16x32xbf16>
    %307 = vector.extract_strided_slice %302 {offsets = [0, 0], sizes = [8, 8], strides = [1, 1]} : vector<16x32xbf16> to vector<8x8xbf16>
    %308 = vector.extract_strided_slice %304 {offsets = [0, 0], sizes = [8, 8], strides = [1, 1]} : vector<16x32xbf16> to vector<8x8xbf16>
    %cst_129 = arith.constant dense<0.000000e+00> : vector<8x8xf32>
    %309 = tpu.matmul %307, %308, %cst_129 {dimension_numbers = #tpu.dot_dimension_numbers<[1], [1], [0], [0], [0, 0, 1, 0], [], []>} : vector<8x8xbf16>, vector<8x8xbf16>, vector<8x8xf32> -> vector<8x8xf32>
    %310 = vector.broadcast %98 : vector<1x8xf32> to vector<8x8xf32>
    %311 = arith.addf %309, %310 : vector<8x8xf32>
    %312 = vector.extract_strided_slice %302 {offsets = [0, 8], sizes = [8, 8], strides = [1, 1]} : vector<16x32xbf16> to vector<8x8xbf16>
    %313 = vector.extract_strided_slice %304 {offsets = [0, 8], sizes = [8, 8], strides = [1, 1]} : vector<16x32xbf16> to vector<8x8xbf16>
    %cst_130 = arith.constant dense<0.000000e+00> : vector<8x8xf32>
    %314 = tpu.matmul %312, %313, %cst_130 {dimension_numbers = #tpu.dot_dimension_numbers<[1], [1], [0], [0], [0, 0, 1, 0], [], []>} : vector<8x8xbf16>, vector<8x8xbf16>, vector<8x8xf32> -> vector<8x8xf32>
    %315 = vector.broadcast %98 : vector<1x8xf32> to vector<8x8xf32>
    %316 = arith.addf %314, %315 : vector<8x8xf32>
    %317 = vector.extract_strided_slice %302 {offsets = [0, 16], sizes = [8, 8], strides = [1, 1]} : vector<16x32xbf16> to vector<8x8xbf16>
    %318 = vector.extract_strided_slice %304 {offsets = [0, 16], sizes = [8, 8], strides = [1, 1]} : vector<16x32xbf16> to vector<8x8xbf16>
    %cst_131 = arith.constant dense<0.000000e+00> : vector<8x8xf32>
    %319 = tpu.matmul %317, %318, %cst_131 {dimension_numbers = #tpu.dot_dimension_numbers<[1], [1], [0], [0], [0, 0, 1, 0], [], []>} : vector<8x8xbf16>, vector<8x8xbf16>, vector<8x8xf32> -> vector<8x8xf32>
    %320 = vector.broadcast %98 : vector<1x8xf32> to vector<8x8xf32>
    %321 = arith.addf %319, %320 : vector<8x8xf32>
    %322 = vector.extract_strided_slice %302 {offsets = [0, 24], sizes = [8, 8], strides = [1, 1]} : vector<16x32xbf16> to vector<8x8xbf16>
    %323 = vector.extract_strided_slice %304 {offsets = [0, 24], sizes = [8, 8], strides = [1, 1]} : vector<16x32xbf16> to vector<8x8xbf16>
    %cst_132 = arith.constant dense<0.000000e+00> : vector<8x8xf32>
    %324 = tpu.matmul %322, %323, %cst_132 {dimension_numbers = #tpu.dot_dimension_numbers<[1], [1], [0], [0], [0, 0, 1, 0], [], []>} : vector<8x8xbf16>, vector<8x8xbf16>, vector<8x8xf32> -> vector<8x8xf32>
    %325 = vector.broadcast %98 : vector<1x8xf32> to vector<8x8xf32>
    %326 = arith.addf %324, %325 : vector<8x8xf32>
    %327 = vector.extract_strided_slice %302 {offsets = [8, 0], sizes = [8, 8], strides = [1, 1]} : vector<16x32xbf16> to vector<8x8xbf16>
    %328 = vector.extract_strided_slice %304 {offsets = [8, 0], sizes = [8, 8], strides = [1, 1]} : vector<16x32xbf16> to vector<8x8xbf16>
    %cst_133 = arith.constant dense<0.000000e+00> : vector<8x8xf32>
    %329 = tpu.matmul %327, %328, %cst_133 {dimension_numbers = #tpu.dot_dimension_numbers<[1], [1], [0], [0], [0, 0, 1, 0], [], []>} : vector<8x8xbf16>, vector<8x8xbf16>, vector<8x8xf32> -> vector<8x8xf32>
    %330 = vector.broadcast %104 : vector<1x8xf32> to vector<8x8xf32>
    %331 = arith.addf %329, %330 : vector<8x8xf32>
    %332 = vector.extract_strided_slice %302 {offsets = [8, 8], sizes = [8, 8], strides = [1, 1]} : vector<16x32xbf16> to vector<8x8xbf16>
    %333 = vector.extract_strided_slice %304 {offsets = [8, 8], sizes = [8, 8], strides = [1, 1]} : vector<16x32xbf16> to vector<8x8xbf16>
    %cst_134 = arith.constant dense<0.000000e+00> : vector<8x8xf32>
    %334 = tpu.matmul %332, %333, %cst_134 {dimension_numbers = #tpu.dot_dimension_numbers<[1], [1], [0], [0], [0, 0, 1, 0], [], []>} : vector<8x8xbf16>, vector<8x8xbf16>, vector<8x8xf32> -> vector<8x8xf32>
    %335 = vector.broadcast %104 : vector<1x8xf32> to vector<8x8xf32>
    %336 = arith.addf %334, %335 : vector<8x8xf32>
    %337 = vector.extract_strided_slice %302 {offsets = [8, 16], sizes = [8, 8], strides = [1, 1]} : vector<16x32xbf16> to vector<8x8xbf16>
    %338 = vector.extract_strided_slice %304 {offsets = [8, 16], sizes = [8, 8], strides = [1, 1]} : vector<16x32xbf16> to vector<8x8xbf16>
    %cst_135 = arith.constant dense<0.000000e+00> : vector<8x8xf32>
    %339 = tpu.matmul %337, %338, %cst_135 {dimension_numbers = #tpu.dot_dimension_numbers<[1], [1], [0], [0], [0, 0, 1, 0], [], []>} : vector<8x8xbf16>, vector<8x8xbf16>, vector<8x8xf32> -> vector<8x8xf32>
    %340 = vector.broadcast %104 : vector<1x8xf32> to vector<8x8xf32>
    %341 = arith.addf %339, %340 : vector<8x8xf32>
    %342 = vector.extract_strided_slice %302 {offsets = [8, 24], sizes = [8, 8], strides = [1, 1]} : vector<16x32xbf16> to vector<8x8xbf16>
    %343 = vector.extract_strided_slice %304 {offsets = [8, 24], sizes = [8, 8], strides = [1, 1]} : vector<16x32xbf16> to vector<8x8xbf16>
    %cst_136 = arith.constant dense<0.000000e+00> : vector<8x8xf32>
    %344 = tpu.matmul %342, %343, %cst_136 {dimension_numbers = #tpu.dot_dimension_numbers<[1], [1], [0], [0], [0, 0, 1, 0], [], []>} : vector<8x8xbf16>, vector<8x8xbf16>, vector<8x8xf32> -> vector<8x8xf32>
    %345 = vector.broadcast %104 : vector<1x8xf32> to vector<8x8xf32>
    %346 = arith.addf %344, %345 : vector<8x8xf32>
    %347 = tpu.concatenate %311, %316, %321, %326, %331, %336, %341, %346 in 0 : vector<8x8xf32>, vector<8x8xf32>, vector<8x8xf32>, vector<8x8xf32>, vector<8x8xf32>, vector<8x8xf32>, vector<8x8xf32>, vector<8x8xf32> -> vector<64x8xf32>
    %cst_137 = arith.constant dense<0xFF800000> : vector<64xf32>
    %348 = vector.multi_reduction <maximumf>, %347, %cst_137 [1] : vector<64x8xf32> to vector<64xf32>
    %349 = vector.shape_cast %348 : vector<64xf32> to vector<64x1xf32>
    %350 = vector.broadcast %349 : vector<64x1xf32> to vector<64x8xf32>
    %351 = arith.subf %347, %350 : vector<64x8xf32>
    %352 = math.exp %351 : vector<64x8xf32>
    %cst_138 = arith.constant dense<0.000000e+00> : vector<64xf32>
    %353 = vector.multi_reduction <add>, %352, %cst_138 [1] : vector<64x8xf32> to vector<64xf32>
    %354 = vector.shape_cast %353 : vector<64xf32> to vector<64x1xf32>
    %355 = tpu.reciprocal %354 {approx = true} : vector<64x1xf32> -> vector<64x1xf32>
    %356 = vector.broadcast %355 : vector<64x1xf32> to vector<64x8xf32>
    %357 = arith.mulf %352, %356 : vector<64x8xf32>
    %358 = arith.truncf %357 : vector<64x8xf32> to vector<64x8xbf16>
    %359 = vector.extract_strided_slice %358 {offsets = [0, 0], sizes = [8, 8], strides = [1, 1]} : vector<64x8xbf16> to vector<8x8xbf16>
    %360 = vector.extract_strided_slice %306 {offsets = [0, 0], sizes = [8, 8], strides = [1, 1]} : vector<16x32xbf16> to vector<8x8xbf16>
    %cst_139 = arith.constant dense<0.000000e+00> : vector<8x8xf32>
    %361 = tpu.matmul %359, %360, %cst_139 {dimension_numbers = #tpu.dot_dimension_numbers<[1], [0], [0], [1], [0, 0, 1, 1], [], []>} : vector<8x8xbf16>, vector<8x8xbf16>, vector<8x8xf32> -> vector<8x8xf32>
    %362 = vector.extract_strided_slice %358 {offsets = [8, 0], sizes = [8, 8], strides = [1, 1]} : vector<64x8xbf16> to vector<8x8xbf16>
    %363 = vector.extract_strided_slice %306 {offsets = [0, 8], sizes = [8, 8], strides = [1, 1]} : vector<16x32xbf16> to vector<8x8xbf16>
    %cst_140 = arith.constant dense<0.000000e+00> : vector<8x8xf32>
    %364 = tpu.matmul %362, %363, %cst_140 {dimension_numbers = #tpu.dot_dimension_numbers<[1], [0], [0], [1], [0, 0, 1, 1], [], []>} : vector<8x8xbf16>, vector<8x8xbf16>, vector<8x8xf32> -> vector<8x8xf32>
    %365 = vector.extract_strided_slice %358 {offsets = [16, 0], sizes = [8, 8], strides = [1, 1]} : vector<64x8xbf16> to vector<8x8xbf16>
    %366 = vector.extract_strided_slice %306 {offsets = [0, 16], sizes = [8, 8], strides = [1, 1]} : vector<16x32xbf16> to vector<8x8xbf16>
    %cst_141 = arith.constant dense<0.000000e+00> : vector<8x8xf32>
    %367 = tpu.matmul %365, %366, %cst_141 {dimension_numbers = #tpu.dot_dimension_numbers<[1], [0], [0], [1], [0, 0, 1, 1], [], []>} : vector<8x8xbf16>, vector<8x8xbf16>, vector<8x8xf32> -> vector<8x8xf32>
    %368 = vector.extract_strided_slice %358 {offsets = [24, 0], sizes = [8, 8], strides = [1, 1]} : vector<64x8xbf16> to vector<8x8xbf16>
    %369 = vector.extract_strided_slice %306 {offsets = [0, 24], sizes = [8, 8], strides = [1, 1]} : vector<16x32xbf16> to vector<8x8xbf16>
    %cst_142 = arith.constant dense<0.000000e+00> : vector<8x8xf32>
    %370 = tpu.matmul %368, %369, %cst_142 {dimension_numbers = #tpu.dot_dimension_numbers<[1], [0], [0], [1], [0, 0, 1, 1], [], []>} : vector<8x8xbf16>, vector<8x8xbf16>, vector<8x8xf32> -> vector<8x8xf32>
    %371 = tpu.concatenate %361, %364, %367, %370 in 1 : vector<8x8xf32>, vector<8x8xf32>, vector<8x8xf32>, vector<8x8xf32> -> vector<8x32xf32>
    %372 = vector.extract_strided_slice %358 {offsets = [32, 0], sizes = [8, 8], strides = [1, 1]} : vector<64x8xbf16> to vector<8x8xbf16>
    %373 = vector.extract_strided_slice %306 {offsets = [8, 0], sizes = [8, 8], strides = [1, 1]} : vector<16x32xbf16> to vector<8x8xbf16>
    %cst_143 = arith.constant dense<0.000000e+00> : vector<8x8xf32>
    %374 = tpu.matmul %372, %373, %cst_143 {dimension_numbers = #tpu.dot_dimension_numbers<[1], [0], [0], [1], [0, 0, 1, 1], [], []>} : vector<8x8xbf16>, vector<8x8xbf16>, vector<8x8xf32> -> vector<8x8xf32>
    %375 = vector.extract_strided_slice %358 {offsets = [40, 0], sizes = [8, 8], strides = [1, 1]} : vector<64x8xbf16> to vector<8x8xbf16>
    %376 = vector.extract_strided_slice %306 {offsets = [8, 8], sizes = [8, 8], strides = [1, 1]} : vector<16x32xbf16> to vector<8x8xbf16>
    %cst_144 = arith.constant dense<0.000000e+00> : vector<8x8xf32>
    %377 = tpu.matmul %375, %376, %cst_144 {dimension_numbers = #tpu.dot_dimension_numbers<[1], [0], [0], [1], [0, 0, 1, 1], [], []>} : vector<8x8xbf16>, vector<8x8xbf16>, vector<8x8xf32> -> vector<8x8xf32>
    %378 = vector.extract_strided_slice %358 {offsets = [48, 0], sizes = [8, 8], strides = [1, 1]} : vector<64x8xbf16> to vector<8x8xbf16>
    %379 = vector.extract_strided_slice %306 {offsets = [8, 16], sizes = [8, 8], strides = [1, 1]} : vector<16x32xbf16> to vector<8x8xbf16>
    %cst_145 = arith.constant dense<0.000000e+00> : vector<8x8xf32>
    %380 = tpu.matmul %378, %379, %cst_145 {dimension_numbers = #tpu.dot_dimension_numbers<[1], [0], [0], [1], [0, 0, 1, 1], [], []>} : vector<8x8xbf16>, vector<8x8xbf16>, vector<8x8xf32> -> vector<8x8xf32>
    %381 = vector.extract_strided_slice %358 {offsets = [56, 0], sizes = [8, 8], strides = [1, 1]} : vector<64x8xbf16> to vector<8x8xbf16>
    %382 = vector.extract_strided_slice %306 {offsets = [8, 24], sizes = [8, 8], strides = [1, 1]} : vector<16x32xbf16> to vector<8x8xbf16>
    %cst_146 = arith.constant dense<0.000000e+00> : vector<8x8xf32>
    %383 = tpu.matmul %381, %382, %cst_146 {dimension_numbers = #tpu.dot_dimension_numbers<[1], [0], [0], [1], [0, 0, 1, 1], [], []>} : vector<8x8xbf16>, vector<8x8xbf16>, vector<8x8xf32> -> vector<8x8xf32>
    %384 = tpu.concatenate %374, %377, %380, %383 in 1 : vector<8x8xf32>, vector<8x8xf32>, vector<8x8xf32>, vector<8x8xf32> -> vector<8x32xf32>
    %385 = tpu.concatenate %371, %384 in 0 : vector<8x32xf32>, vector<8x32xf32> -> vector<16x32xf32>
    %c1_147 = arith.constant 1 : index
    %c0_148 = arith.constant 0 : index
    %c0_149 = arith.constant 0 : index
    %386 = vector.load %arg8[%c1_147, %c0_148, %c0_149] : memref<2x32x32xbf16, #tpu.memory_space<vmem>>, vector<1x32x32xbf16>
    %387 = vector.shape_cast %386 : vector<1x32x32xbf16> to vector<32x32xbf16>
    %388 = arith.truncf %385 : vector<16x32xf32> to vector<16x32xbf16>
    %cst_150 = arith.constant dense<0.000000e+00> : vector<16x32xf32>
    %389 = tpu.matmul %388, %387, %cst_150 {dimension_numbers = #tpu.dot_dimension_numbers<[1], [0], [0], [1], [0, 0, 1, 1], [], []>} : vector<16x32xbf16>, vector<32x32xbf16>, vector<16x32xf32> -> vector<16x32xf32>
    %c1_151 = arith.constant 1 : index
    %c0_152 = arith.constant 0 : index
    %c0_153 = arith.constant 0 : index
    %390 = vector.load %arg9[%c1_151, %c0_152, %c0_153] : memref<2x1x32xf32, #tpu.memory_space<vmem>>, vector<1x1x32xf32>
    %391 = vector.shape_cast %390 : vector<1x1x32xf32> to vector<1x32xf32>
    %392 = vector.broadcast %391 : vector<1x32xf32> to vector<16x32xf32>
    %393 = arith.addf %389, %392 : vector<16x32xf32>
    %394 = arith.addf %290, %393 : vector<16x32xf32>
    %c1_154 = arith.constant 1 : index
    %c0_155 = arith.constant 0 : index
    %c0_156 = arith.constant 0 : index
    %395 = vector.load %arg10[%c1_154, %c0_155, %c0_156] : memref<2x1x32xf32, #tpu.memory_space<vmem>>, vector<1x1x32xf32>
    %396 = vector.shape_cast %395 : vector<1x1x32xf32> to vector<1x32xf32>
    %c1_157 = arith.constant 1 : index
    %c0_158 = arith.constant 0 : index
    %c0_159 = arith.constant 0 : index
    %397 = vector.load %arg11[%c1_157, %c0_158, %c0_159] : memref<2x1x32xf32, #tpu.memory_space<vmem>>, vector<1x1x32xf32>
    %398 = vector.shape_cast %397 : vector<1x1x32xf32> to vector<1x32xf32>
    %cst_160 = arith.constant dense<0.000000e+00> : vector<16xf32>
    %399 = vector.multi_reduction <add>, %394, %cst_160 [1] : vector<16x32xf32> to vector<16xf32>
    %400 = vector.shape_cast %399 : vector<16xf32> to vector<16x1xf32>
    %cst_161 = arith.constant 3.200000e+01 : f32
    %401 = vector.broadcast %cst_161 : f32 to vector<16x1xf32>
    %402 = arith.divf %400, %401 : vector<16x1xf32>
    %403 = vector.broadcast %402 : vector<16x1xf32> to vector<16x32xf32>
    %404 = arith.subf %394, %403 : vector<16x32xf32>
    %405 = arith.mulf %404, %404 : vector<16x32xf32>
    %cst_162 = arith.constant dense<0.000000e+00> : vector<16xf32>
    %406 = vector.multi_reduction <add>, %405, %cst_162 [1] : vector<16x32xf32> to vector<16xf32>
    %407 = vector.shape_cast %406 : vector<16xf32> to vector<16x1xf32>
    %cst_163 = arith.constant 3.200000e+01 : f32
    %408 = vector.broadcast %cst_163 : f32 to vector<16x1xf32>
    %409 = arith.divf %407, %408 : vector<16x1xf32>
    %410 = vector.broadcast %402 : vector<16x1xf32> to vector<16x32xf32>
    %411 = arith.subf %394, %410 : vector<16x32xf32>
    %cst_164 = arith.constant 9.99999996E-13 : f32
    %412 = vector.broadcast %cst_164 : f32 to vector<16x1xf32>
    %413 = arith.addf %409, %412 : vector<16x1xf32>
    %414 = math.rsqrt %413 : vector<16x1xf32>
    %415 = vector.broadcast %414 : vector<16x1xf32> to vector<16x32xf32>
    %416 = arith.mulf %411, %415 : vector<16x32xf32>
    %417 = vector.broadcast %396 : vector<1x32xf32> to vector<16x32xf32>
    %418 = arith.mulf %416, %417 : vector<16x32xf32>
    %419 = vector.broadcast %398 : vector<1x32xf32> to vector<16x32xf32>
    %420 = arith.addf %418, %419 : vector<16x32xf32>
    %c1_165 = arith.constant 1 : index
    %c0_166 = arith.constant 0 : index
    %c0_167 = arith.constant 0 : index
    %421 = vector.load %arg12[%c1_165, %c0_166, %c0_167] : memref<2x32x64xbf16, #tpu.memory_space<vmem>>, vector<1x32x64xbf16>
    %422 = vector.shape_cast %421 : vector<1x32x64xbf16> to vector<32x64xbf16>
    %423 = arith.truncf %420 : vector<16x32xf32> to vector<16x32xbf16>
    %cst_168 = arith.constant dense<0.000000e+00> : vector<16x64xf32>
    %424 = tpu.matmul %423, %422, %cst_168 {dimension_numbers = #tpu.dot_dimension_numbers<[1], [0], [0], [1], [0, 0, 1, 1], [], []>} : vector<16x32xbf16>, vector<32x64xbf16>, vector<16x64xf32> -> vector<16x64xf32>
    %c1_169 = arith.constant 1 : index
    %c0_170 = arith.constant 0 : index
    %c0_171 = arith.constant 0 : index
    %425 = vector.load %arg13[%c1_169, %c0_170, %c0_171] : memref<2x1x64xf32, #tpu.memory_space<vmem>>, vector<1x1x64xf32>
    %426 = vector.shape_cast %425 : vector<1x1x64xf32> to vector<1x64xf32>
    %427 = vector.broadcast %426 : vector<1x64xf32> to vector<16x64xf32>
    %428 = arith.addf %424, %427 : vector<16x64xf32>
    %cst_172 = arith.constant 5.000000e-01 : f32
    %429 = vector.broadcast %cst_172 : f32 to vector<16x64xf32>
    %430 = arith.mulf %429, %428 : vector<16x64xf32>
    %cst_173 = arith.constant 4.471500e-02 : f32
    %431 = vector.broadcast %cst_173 : f32 to vector<16x64xf32>
    %432 = arith.mulf %431, %428 : vector<16x64xf32>
    %433 = arith.mulf %432, %428 : vector<16x64xf32>
    %434 = arith.mulf %433, %428 : vector<16x64xf32>
    %435 = arith.addf %428, %434 : vector<16x64xf32>
    %cst_174 = arith.constant 0.797884583 : f32
    %436 = vector.broadcast %cst_174 : f32 to vector<16x64xf32>
    %437 = arith.mulf %436, %435 : vector<16x64xf32>
    %438 = math.tanh %437 : vector<16x64xf32>
    %cst_175 = arith.constant 1.000000e+00 : f32
    %439 = vector.broadcast %cst_175 : f32 to vector<16x64xf32>
    %440 = arith.addf %439, %438 : vector<16x64xf32>
    %441 = arith.mulf %430, %440 : vector<16x64xf32>
    %c1_176 = arith.constant 1 : index
    %c0_177 = arith.constant 0 : index
    %c0_178 = arith.constant 0 : index
    %442 = vector.load %arg14[%c1_176, %c0_177, %c0_178] : memref<2x64x32xbf16, #tpu.memory_space<vmem>>, vector<1x64x32xbf16>
    %443 = vector.shape_cast %442 : vector<1x64x32xbf16> to vector<64x32xbf16>
    %444 = arith.truncf %441 : vector<16x64xf32> to vector<16x64xbf16>
    %cst_179 = arith.constant dense<0.000000e+00> : vector<16x32xf32>
    %445 = tpu.matmul %444, %443, %cst_179 {dimension_numbers = #tpu.dot_dimension_numbers<[1], [0], [0], [1], [0, 0, 1, 1], [], []>} : vector<16x64xbf16>, vector<64x32xbf16>, vector<16x32xf32> -> vector<16x32xf32>
    %c1_180 = arith.constant 1 : index
    %c0_181 = arith.constant 0 : index
    %c0_182 = arith.constant 0 : index
    %446 = vector.load %arg15[%c1_180, %c0_181, %c0_182] : memref<2x1x32xf32, #tpu.memory_space<vmem>>, vector<1x1x32xf32>
    %447 = vector.shape_cast %446 : vector<1x1x32xf32> to vector<1x32xf32>
    %448 = vector.broadcast %447 : vector<1x32xf32> to vector<16x32xf32>
    %449 = arith.addf %445, %448 : vector<16x32xf32>
    %450 = arith.addf %420, %449 : vector<16x32xf32>
    %c1_183 = arith.constant 1 : index
    %c0_184 = arith.constant 0 : index
    %c0_185 = arith.constant 0 : index
    %451 = vector.load %arg16[%c1_183, %c0_184, %c0_185] : memref<2x1x32xf32, #tpu.memory_space<vmem>>, vector<1x1x32xf32>
    %452 = vector.shape_cast %451 : vector<1x1x32xf32> to vector<1x32xf32>
    %c1_186 = arith.constant 1 : index
    %c0_187 = arith.constant 0 : index
    %c0_188 = arith.constant 0 : index
    %453 = vector.load %arg17[%c1_186, %c0_187, %c0_188] : memref<2x1x32xf32, #tpu.memory_space<vmem>>, vector<1x1x32xf32>
    %454 = vector.shape_cast %453 : vector<1x1x32xf32> to vector<1x32xf32>
    %cst_189 = arith.constant dense<0.000000e+00> : vector<16xf32>
    %455 = vector.multi_reduction <add>, %450, %cst_189 [1] : vector<16x32xf32> to vector<16xf32>
    %456 = vector.shape_cast %455 : vector<16xf32> to vector<16x1xf32>
    %cst_190 = arith.constant 3.200000e+01 : f32
    %457 = vector.broadcast %cst_190 : f32 to vector<16x1xf32>
    %458 = arith.divf %456, %457 : vector<16x1xf32>
    %459 = vector.broadcast %458 : vector<16x1xf32> to vector<16x32xf32>
    %460 = arith.subf %450, %459 : vector<16x32xf32>
    %461 = arith.mulf %460, %460 : vector<16x32xf32>
    %cst_191 = arith.constant dense<0.000000e+00> : vector<16xf32>
    %462 = vector.multi_reduction <add>, %461, %cst_191 [1] : vector<16x32xf32> to vector<16xf32>
    %463 = vector.shape_cast %462 : vector<16xf32> to vector<16x1xf32>
    %cst_192 = arith.constant 3.200000e+01 : f32
    %464 = vector.broadcast %cst_192 : f32 to vector<16x1xf32>
    %465 = arith.divf %463, %464 : vector<16x1xf32>
    %466 = vector.broadcast %458 : vector<16x1xf32> to vector<16x32xf32>
    %467 = arith.subf %450, %466 : vector<16x32xf32>
    %cst_193 = arith.constant 9.99999996E-13 : f32
    %468 = vector.broadcast %cst_193 : f32 to vector<16x1xf32>
    %469 = arith.addf %465, %468 : vector<16x1xf32>
    %470 = math.rsqrt %469 : vector<16x1xf32>
    %471 = vector.broadcast %470 : vector<16x1xf32> to vector<16x32xf32>
    %472 = arith.mulf %467, %471 : vector<16x32xf32>
    %473 = vector.broadcast %452 : vector<1x32xf32> to vector<16x32xf32>
    %474 = arith.mulf %472, %473 : vector<16x32xf32>
    %475 = vector.broadcast %454 : vector<1x32xf32> to vector<16x32xf32>
    %476 = arith.addf %474, %475 : vector<16x32xf32>
    %c0_194 = arith.constant 0 : index
    %c0_195 = arith.constant 0 : index
    %477 = vector.load %arg18[%c0_194, %c0_195] : memref<32x32xbf16, #tpu.memory_space<vmem>>, vector<32x32xbf16>
    %478 = arith.truncf %476 : vector<16x32xf32> to vector<16x32xbf16>
    %cst_196 = arith.constant dense<0.000000e+00> : vector<16x32xf32>
    %479 = tpu.matmul %478, %477, %cst_196 {dimension_numbers = #tpu.dot_dimension_numbers<[1], [0], [0], [1], [0, 0, 1, 1], [], []>} : vector<16x32xbf16>, vector<32x32xbf16>, vector<16x32xf32> -> vector<16x32xf32>
    %c0_197 = arith.constant 0 : index
    %c0_198 = arith.constant 0 : index
    %480 = vector.load %arg19[%c0_197, %c0_198] : memref<1x32xf32, #tpu.memory_space<vmem>>, vector<1x32xf32>
    %481 = vector.broadcast %480 : vector<1x32xf32> to vector<16x32xf32>
    %482 = arith.addf %479, %481 : vector<16x32xf32>
    %483 = math.tanh %482 : vector<16x32xf32>
    %c0_199 = arith.constant 0 : index
    %c0_200 = arith.constant 0 : index
    %484 = vector.load %arg20[%c0_199, %c0_200] : memref<32x128xbf16, #tpu.memory_space<vmem>>, vector<32x128xbf16>
    %485 = arith.truncf %483 : vector<16x32xf32> to vector<16x32xbf16>
    %cst_201 = arith.constant dense<0.000000e+00> : vector<16x128xf32>
    %486 = tpu.matmul %485, %484, %cst_201 {dimension_numbers = #tpu.dot_dimension_numbers<[1], [0], [0], [1], [0, 0, 1, 1], [], []>} : vector<16x32xbf16>, vector<32x128xbf16>, vector<16x128xf32> -> vector<16x128xf32>
    %c0_202 = arith.constant 0 : index
    %c0_203 = arith.constant 0 : index
    %487 = vector.load %arg21[%c0_202, %c0_203] : memref<1x128xf32, #tpu.memory_space<vmem>>, vector<1x128xf32>
    %488 = vector.broadcast %487 : vector<1x128xf32> to vector<16x128xf32>
    %489 = arith.addf %486, %488 : vector<16x128xf32>
    %c0_204 = arith.constant 0 : index
    %c0_205 = arith.constant 0 : index
    %490 = vector.load %arg22[%c0_204, %c0_205] : memref<16x128xf32, #tpu.memory_space<vmem>>, vector<16x128xf32>
    tpu.vector_store %arg22[%c0_204, %c0_205], %489 {strides = array<i32>} : memref<16x128xf32, #tpu.memory_space<vmem>>, vector<16x128xf32>,
    return
  }
}

</mosaic_0001>

<bundles_post_ra>
// kernel: slu_forward.1
= control target key start
LH: loop header
LB: loop body
LE: loop exit
PB: predicated region body
PF: predicated region fallthrough
CT: control target
= control target key end

     0   :  { %s4655_s0 = inlined_call_operand.vmem [shape: s32[16], index: 0, kind: input, shape index: {}]   ;;  %s4656_s1 = inlined_call_operand.vmem [shape: s32[2], index: 1, kind: input, shape index: {}]   ;;  %s4657_s2 = inlined_call_operand.vmem [shape: f32[100,1,32], index: 2, kind: input, shape index: {}]   ;;  %s4658_s3 = inlined_call_operand.vmem [shape: f32[8,32], index: 3, kind: input, shape index: {}]   ;;  %s4659_s4 = inlined_call_operand.vmem [shape: f32[1,32], index: 4, kind: input, shape index: {}]   ;;  %s4660_s5 = inlined_call_operand.vmem [shape: f32[1,32], index: 5, kind: input, shape index: {}]   ;;  %s4661_s6 = inlined_call_operand.vmem [shape: bf16[2,32,128], index: 6, kind: input, shape index: {}]   ;;  %s4662_s7 = inlined_call_operand.vmem [shape: f32[2,1,128], index: 7, kind: input, shape index: {}]   ;;  %s4663_s8 = inlined_call_operand.vmem [shape: bf16[2,32,32], index: 8, kind: input, shape index: {}]   ;;  %s4664_s9 = inlined_call_operand.vmem [shape: f32[2,1,32], index: 9, kind: input, shape index: {}]   ;;  %s4665_s10 = inlined_call_operand.vmem [shape: f32[2,1,32], index: 10, kind: input, shape index: {}]   ;;  %s4666_s11 = inlined_call_operand.vmem [shape: f32[2,1,32], index: 11, kind: input, shape index: {}]   ;;  %s4667_s12 = inlined_call_operand.vmem [shape: bf16[2,32,64], index: 12, kind: input, shape index: {}]   ;;  %s4668_s13 = inlined_call_operand.vmem [shape: f32[2,1,64], index: 13, kind: input, shape index: {}]   ;;  %s4669_s14 = inlined_call_operand.vmem [shape: bf16[2,64,32], index: 14, kind: input, shape index: {}]   ;;  %s4670_s15 = inlined_call_operand.vmem [shape: f32[2,1,32], index: 15, kind: input, shape index: {}]   ;;  %s4671_s16 = inlined_call_operand.vmem [shape: f32[2,1,32], index: 16, kind: input, shape index: {}]   ;;  %s4672_s17 = inlined_call_operand.vmem [shape: f32[2,1,32], index: 17, kind: input, shape index: {}]   ;;  %s4673_s18 = inlined_call_operand.vmem [shape: bf16[32,32], index: 18, kind: input, shape index: {}]   ;;  %s4674_s19 = inlined_call_operand.vmem [shape: f32[1,32], index: 19, kind: input, shape index: {}]   ;;  %s4675_s20 = inlined_call_operand.vmem [shape: bf16[32,128], index: 20, kind: input, shape index: {}]   ;;  %s4676_s21 = inlined_call_operand.vmem [shape: f32[1,128], index: 21, kind: input, shape index: {}]   ;;  %s4677_s22 = inlined_call_operand.vmem [shape: f32[16,128], index: 22, kind: output, shape index: {}]  }
   0x1   :  { %4686 = sst [smem:[#allocation8_spill]] %s4655_s0 }
   0x2   :  { %4687 = sst [smem:[#allocation9_spill]] %s4656_s1 }
   0x3   :  { %4688 = sst [smem:[#allocation10_spill]] %s4657_s2 }
   0x4   :  { %4689 = sst [smem:[#allocation11_spill]] %s4658_s3 }
   0x5   :  { %4690 = sst [smem:[#allocation12_spill]] %s4659_s4 }
   0x6   :  { %4691 = sst [smem:[#allocation13_spill]] %s4660_s5 }
   0x7   :  { %4692 = sst [smem:[#allocation14_spill]] %s4661_s6 }
   0x8   :  { %4693 = sst [smem:[#allocation15_spill]] %s4672_s17 }
   0x9   :  { %4694 = sst [smem:[#allocation16_spill]] %s4673_s18 }
   0xa   :  { %4695 = sst [smem:[#allocation17_spill]] %s4674_s19 }
   0xb   :  { %4696 = sst [smem:[#allocation18_spill]] %s4675_s20 }
   0xc   :  { %4697 = sst [smem:[#allocation19_spill]] %s4676_s21 }
   0xd   :  { %4698 = sst [smem:[#allocation20_spill]] %s4677_s22 }
   0xe   :  { %27 = vsyncpa [#allocation3], 0  ;;  %s4699_s29 = sld [smem:[#allocation8_spill]] }
  0x14   :  { %s35_s30 = sshll.u32 %s4699_s29, 4  ;;  %s36_s30 = int_to_ptr.vmem [resolvable:$true] %s35_s30 }
  0x15   :  { %28 = vsyncpa [#allocation5], 0  ;;  %s4700_s23 = sld [smem:[#allocation9_spill]]  ;;  %s3810_s5 = scalar_lea.vmem %s36_s30, 16 }
  0x16   :  { %p3811_p0 = scmp.ne.s32.totalorder %s36_s30, %s3810_s5  ;;  %p3815_p1 = scmp.lt.s32.totalorder %s36_s30, %s36_s30 }
  0x17   :  { %p3816_p2 = scmp.lt.s32.totalorder %s3810_s5, %s3810_s5 }
  0x19   :  { %p3817_p3 = por %p3816_p2, %p3815_p1 }
  0x1b   :  { %s45_s1 = sshll.u32 %s4700_s23, 4  ;;  %p3818_p4 = pnand %p3817_p3, %p3811_p0  ;;  %s46_s1 = int_to_ptr.vmem [resolvable:$true] %s45_s1 }
  0x1d   :  { %3821 = shalt.err (!%p3818_p4)
}
  0x1e   :  { %s3838_s24 = smov [#allocation2]   ;;  %s3822_s6 = scalar_lea.vmem %s46_s1, 16 }
  0x1f   :  { %38 = dma.vmem_to_smem %s36_s30, 16, %s3838_s24, [#allocation3]  }
  0x20   :  { %p3823_p5 = scmp.ne.s32.totalorder %s46_s1, %s3822_s6  ;;  %p3827_p6 = scmp.lt.s32.totalorder %s46_s1, %s46_s1 }
  0x21   :  { %p3828_p7 = scmp.lt.s32.totalorder %s3822_s6, %s3822_s6 }
  0x23   :  { %p3829_p8 = por %p3828_p7, %p3827_p6 }
  0x25   :  { %p3830_p9 = pnand %p3829_p8, %p3823_p5 }
  0x27   :  { %3833 = shalt.err (!%p3830_p9)
}
  0x28   :  { %s3839_s25 = smov [#allocation4]  }
  0x29   :  { %48 = dma.vmem_to_smem %s46_s1, 16, %s3839_s25, [#allocation5]  }
  0x2a   :  { %3834 = dma.done.wait [#allocation3], 16  }
  0x2b   :  { %3835 = vsyncadd [#allocation3], 4294967280 }
  0x2c   :  { %3836 = dma.done.wait [#allocation5], 16  }
  0x2d   :  { %3837 = vsyncadd [#allocation5], 4294967280 }
  0x2e   :  { %95 = sfence }
  0x2f   :  { %s97_s26 = sld [smem:[#allocation2]]  ;;  %vm229_vm0 = vcmask 1040384   ;;  %vm231_vm1 = vcmask 1041408   ;;  %vm233_vm2 = vcmask 1042432   ;;  %vm235_vm3 = vcmask 1043456   ;;  %s4684_s22 = smov 24  }
  0x30   :  { %s3119_s2 = sld [smem:[#allocation2 + $0x1]]  ;;  %vm237_vm4 = vcmask 1044480   ;;  %vm239_vm5 = vcmask 1045504   ;;  %vm241_vm6 = vcmask 1046528   ;;  %vm255_vm7 = vcmask 261120  }
  0x31   :  { %s3120_s27 = sld [smem:[#allocation2 + $0x2]]  ;;  %v3840_v46 = vmov 0.0   ;;  %vm3841_vm8 = vmmov 0   ;;  %vm384_vm9 = vcmask 64512   ;;  %vm1083_vm12 = vcmask 130048  }
  0x32   :  { %s3121_s3 = sld [smem:[#allocation2 + $0x3]]  ;;  %3361 = vmatprep.subr.bf16.mxu0 %v3840_v46  ;;  %3365 = vmatprep.mubr.msk.bf16.mxu0 %vm3841_vm8, %v3840_v46  ;;  %vm1085_vm13 = vcmask 195584   ;;  %vm1538_vm14 = vcmask 523264  }
  0x33   :  { %s3122_s28 = sld [smem:[#allocation2 + $0x4]]  ;;  %3369 = vmatprep.subr.bf16.mxu1 %v3840_v46  ;;  %3371 = vmatprep.mubr.msk.bf16.mxu1 %vm3841_vm8, %v3840_v46 }
  0x34   :  { %s3123_s29 = sld [smem:[#allocation2 + $0x5]] }
  0x35   :  { %s4701_s0 = sld [smem:[#allocation10_spill]] }
  0x36   :  { %s3124_s1 = sld [smem:[#allocation2 + $0x6]] }
  0x37   :  { %s3125_s25 = sld [smem:[#allocation2 + $0x7]] }
  0x38   :  { %s3126_s20 = sld [smem:[#allocation2 + $0x8]] }
  0x39   :  { %s3128_s5 = sld [smem:[#allocation2 + $0xa]] }
  0x3a   :  { %s3132_s17 = sld [smem:[#allocation2 + $0xe]] }
  0x3b   :  { %s98_s23 = scalar_lea.vmem %s4701_s0, %s97_s26  ;;  %s101_s6 = scalar_lea.vmem %s4701_s0, %s3119_s2 }
  0x3c   :  { %v99_v0 = vld [vmem:[%s98_s23] sm:$0x1]  ;;  %s104_s19 = scalar_lea.vmem %s4701_s0, %s3120_s27  ;;  %s107_s30 = scalar_lea.vmem %s4701_s0, %s3121_s3 }
  0x3d   :  { %v3134_v1 = vld [vmem:[%s101_s6] ss:$0 sm:$0xff]  ;;  %s3127_s26 = sld [smem:[#allocation2 + $0x9]]  ;;  %s110_s2 = scalar_lea.vmem %s4701_s0, %s3122_s28 }
  0x3e   :  { %v3135_v2 = vld [vmem:[%s104_s19] ss:$0 sm:$0xff]  ;;  %v230_v3 = vsel %vm229_vm0, %v99_v0, %v3134_v1  ;;  %s113_s19 = scalar_lea.vmem %s4701_s0, %s3123_s29  ;;  %s4702_s27 = sld [smem:[#allocation11_spill]] }
  0x3f   :  { %v3136_v4 = vld [vmem:[%s107_s30] ss:$0 sm:$0xff]  ;;  %v232_v5 = vsel %vm231_vm1, %v230_v3, %v3135_v2  ;;  %s3129_s3 = sld [smem:[#allocation2 + $0xb]]  ;;  %s116_s28 = scalar_lea.vmem %s4701_s0, %s3124_s1 }
  0x40   :  { %v3137_v6 = vld [vmem:[%s110_s2] ss:$0 sm:$0xff]  ;;  %v234_v7 = vsel %vm233_vm2, %v232_v5, %v3136_v4  ;;  %s3130_s30 = sld [smem:[#allocation2 + $0xc]]  ;;  %s119_s29 = scalar_lea.vmem %s4701_s0, %s3125_s25 }
  0x41   :  { %v3138_v9 = vld [vmem:[%s113_s19] ss:$0 sm:$0xff]  ;;  %v236_v10 = vsel %vm235_vm3, %v234_v7, %v3137_v6  ;;  %s3131_s2 = sld [smem:[#allocation2 + $0xd]]  ;;  %s122_s19 = scalar_lea.vmem %s4701_s0, %s3126_s20 }
  0x42   :  { %v3139_v11 = vld [vmem:[%s116_s28] ss:$0 sm:$0xff]  ;;  %v238_v12 = vsel %vm237_vm4, %v236_v10, %v3138_v9  ;;  %s3133_s24 = sld [smem:[#allocation2 + $0xf]]  ;;  %s128_s28 = scalar_lea.vmem %s4701_s0, %s3128_s5 }
  0x43   :  { %v3140_v13 = vld [vmem:[%s119_s29] ss:$0 sm:$0xff]  ;;  %v240_v14 = vsel %vm239_vm5, %v238_v12, %v3139_v11  ;;  %s140_s18 = scalar_lea.vmem %s4701_s0, %s3132_s17  ;;  %s4703_s17 = sld [smem:[#allocation14_spill]] }
  0x44   :  { %v250_v8 = vld [vmem:[%s4702_s27] sm:$0xff]  ;;  %v242_v15 = vsel %vm241_vm6, %v240_v14, %v3140_v13  ;;  %s125_s27 = scalar_lea.vmem %s4701_s0, %s3127_s26  ;;  %s4704_s23 = sld [smem:[#allocation12_spill]] }
  0x45   :  { %v123_v16 = vld [vmem:[%s122_s19] sm:$0x1]  ;;  %v251_v17 = vadd.f32 %v250_v8, %v242_v15  ;;  %s131_s20 = scalar_lea.vmem %s4701_s0, %s3129_s3  ;;  %s4705_s21 = sld [smem:[#allocation13_spill]] }
  0x46   :  { %v3141_v18 = vld [vmem:[%s125_s27] ss:$0 sm:$0xff]  ;;  %s134_s26 = scalar_lea.vmem %s4701_s0, %s3130_s30  ;;  %s3842_s5 = smov 88  }
  0x47   :  { %v3142_v19 = vld [vmem:[%s128_s28] ss:$0 sm:$0xff]  ;;  %v243_v20 = vsel %vm229_vm0, %v123_v16, %v3141_v18  ;;  %v256_v21 = vsel %vm255_vm7, %v251_v17, 0.0  ;;  %s137_s19 = scalar_lea.vmem %s4701_s0, %s3131_s2  ;;  %s3844_s3 = smov 80  }
  0x48   :  { %v3143_v22 = vld [vmem:[%s131_s20] ss:$0 sm:$0xff]  ;;  %v244_v23 = vsel %vm231_vm1, %v243_v20, %v3142_v19  ;;  %257 = vadd.xlane.f32.xlu0 %v256_v21  ;;  %s143_s25 = scalar_lea.vmem %s4701_s0, %s3133_s24  ;;  %s3845_s1 = smov 72  }
  0x49   :  { %v3144_v24 = vld [vmem:[%s134_s26] ss:$0 sm:$0xff]  ;;  %v245_v25 = vsel %vm233_vm2, %v244_v23, %v3143_v22  ;;  %v3690_v45 = vld [vmem:[%s4703_s17 + $0x8] sm:$0xff]   ;;  %s3847_s27 = smov 120   ;;  %s3848_s30 = smov 112  }
  0x4a   :  { %v3145_v26 = vld [vmem:[%s137_s19] ss:$0 sm:$0xff]  ;;  %v246_v27 = vsel %vm235_vm3, %v245_v25, %v3144_v24  ;;  %3362 = vmatpush3.bf16.msra.mxu0 %v3690_v45  ;;  %s3843_s19 = smov 96   ;;  %s3150_s0 = sld [smem:[#allocation4 + $0x1]] }
  0x4b   :  { %v3146_v28 = vld [vmem:[%s140_s18] ss:$0 sm:$0xff]  ;;  %v247_v29 = vsel %vm237_vm4, %v246_v27, %v3145_v26  ;;  %3363 = vmatprep.subr.bf16.mxu0 %v3840_v46  ;;  %s3846_s18 = smov 104   ;;  %s3850_s2 = smov 56  }
  0x4c   :  { %v3147_v30 = vld [vmem:[%s143_s25] ss:$0 sm:$0xff]  ;;  %v248_v31 = vsel %vm239_vm5, %v247_v29, %v3146_v28  ;;  %s301_s25 = sld [smem:[#allocation4]]  ;;  %s3851_s24 = smov 48  }
  0x4d   :  { %v249_v32 = vsel %vm241_vm6, %v248_v31, %v3147_v30  ;;  %v3691_v47 = vld [vmem:[%s4703_s17] sm:$0xff]   ;;  %s3852_s6 = smov 64   ;;  %s3853_s28 = smov 40  }
  0x4e   :  { %v252_v33 = vadd.f32 %v250_v8, %v249_v32  ;;  %3364 = vmatpush3.bf16.msra.mxu0 %v3691_v47  ;;  %v3148_v56 = vld [vmem:[%s4704_s23] ss:$0 sm:$0xff]  ;;  %s3854_s20 = smov 8   ;;  %s4685_s26 = smov 16  }
  0x4f   :  { %3375 = vmatprep.subr.bf16.mxu0 %v3840_v46  ;;  %v3149_v60 = vld [vmem:[%s4705_s21] ss:$0 sm:$0xff]  ;;  %s4712_s4 = sld [smem:[#allocation19_spill]] }
  0x50   :  { %v259_v34 = vsel %vm255_vm7, %v252_v33, 0.0  ;;  %v3151_v2 = vld [vmem:[%s4662_s7] ss:$0 sm:$0xff]  ;;  %s4713_s29 = sld [smem:[#allocation20_spill]] }
  0x51   :  { %260 = vadd.xlane.f32.xlu0 %v259_v34 }
  0xd1   :  { %v258_v35 = vpop.xlane.xlu0 %257 }
  0xd2   :  { %v263_v36 = vmul.f32 0.03125, %v258_v35 }
  0xd4   :  { %v265_v37 = vsub.f32 %v251_v17, %v263_v36  ;;  %v299_v36 = vlaneseq }
  0xd6   :  { %v267_v38 = vmul.f32 %v265_v37, %v265_v37 }
  0xd8   :  { %v269_v39 = vsel %vm255_vm7, %v267_v38, 0.0  ;;  %v302_v38 = vstv %s301_s25 }
  0xd9   :  { %270 = vadd.xlane.f32.xlu1 %v269_v39  ;;  %v3849_v39 = vmov -10000.0  }
  0xda   :  { %v261_v40 = vpop.xlane.xlu0 %260 }
  0xdb   :  { %v264_v41 = vmul.f32 0.03125, %v261_v40 }
  0xdd   :  { %v266_v42 = vsub.f32 %v252_v33, %v264_v41 }
  0xdf   :  { %v268_v43 = vmul.f32 %v266_v42, %v266_v42 }
  0xe1   :  { %v272_v44 = vsel %vm255_vm7, %v268_v43, 0.0 }
  0xe2   :  { %273 = vadd.xlane.f32.xlu1 %v272_v44 }
 0x162   :  { %v271_v48 = vpop.xlane.xlu1 %270 }
 0x163   :  { %v275_v49 = vmul.f32 0.03125, %v271_v48 }
 0x165   :  { %v277_v50 = vadd.f32 1e-12, %v275_v49 }
 0x167   :  { %3714 = vrsqrt.f32 %v277_v50 }
 0x16b   :  { %v274_v51 = vpop.xlane.xlu1 %273 }
 0x16c   :  { %v276_v52 = vmul.f32 0.03125, %v274_v51 }
 0x16e   :  { %v278_v53 = vadd.f32 1e-12, %v276_v52 }
 0x170   :  { %3716 = vrsqrt.f32 %v278_v53 }
 0x174   :  { %v3715_v54 = vpop.eup %3714 }
 0x175   :  { %v281_v55 = vmul.f32 %v3715_v54, %v265_v37  ;;  %v300_v37 = vand.u32 127, %v299_v36 }
 0x177   :  { %v289_v59 = vmul.f32 %v3148_v56, %v281_v55  ;;  %vm303_vm10 = vcmp.lt.s32.totalorder %v300_v37, %v302_v38 }
 0x178   :  { %v4146_v40 = vsel %vm303_vm10, 0.0, %v3849_v39 }
 0x179   :  { %v4067_v62 = vadd.f32 %v3149_v60, %v289_v59 }
 0x17d   :  { %v3717_v57 = vpop.eup %3716 }
 0x17e   :  { %v282_v58 = vmul.f32 %v3717_v57, %v266_v42 }
 0x180   :  { %v290_v61 = vmul.f32 %v3148_v56, %v282_v58  ;;  %v306_v56 = vstv %s3150_s0 }
 0x181   :  { %vm307_vm11 = vcmp.lt.s32.totalorder %v300_v37, %v306_v56 }
 0x182   :  { %v4069_v63 = vadd.f32 %v3149_v60, %v290_v61 }
 0x184   :  { %v309_v0 = vpack.c.bf16 %v4069_v63, %v4067_v62 }
 0x186   :  { %3366 = vmatmul.mubr.msk.bf16.vlgmr.msra.gmra.mxu0 %vm255_vm7, %v309_v0 }
 0x187   :  { %3377 = vmatprep.mubr.msk.bf16.mxu0 %vm3841_vm8, %v3840_v46 }
 0x246   :  { %v370_v1 = vpop.f32.mrf.mxu0 }
 0x247   :  { %v371_v5 = vadd.f32 %v3151_v2, %v370_v1 }
 0x248   :  { %v3367_v3 = vpop.f32.mrf.mxu0 }
 0x249   :  { %v377_v10 = vmul.f32 0.35355338, %v371_v5 }
 0x24a   :  { %v373_v4 = vpop.f32.mrf.mxu0 }
 0x24b   :  { %v374_v6 = vadd.f32 %v3151_v2, %v373_v4  ;;  %v4163_v4 = vsel %vm307_vm11, 0.0, %v3849_v39 }
 0x24c   :  { %v3368_v7 = vpop.f32.mrf.mxu0 }
 0x24d   :  { %v4079_v8 = vpack.c.bf16 %v374_v6, %v371_v5  ;;  %v378_v9 = vmul.f32 0.35355338, %v374_v6 }
 0x24f   :  { %434 = vrot.lane.b32.xlu1 %v4079_v8, %s3842_s5  ;;  %382 = vrot.lane.b32.xlu0 %v4079_v8, %s3843_s19  ;;  %v379_v11 = vpack.c.bf16 %v378_v9, %v377_v10  ;;  %v4092_v12 = vrot.slane %v4079_v8, 4 }
 0x251   :  { %v582_v13 = vrot.slane %v379_v11, 4 }
 0x253   :  { %484 = vrot.lane.b32.xlu1 %v4079_v8, %s3844_s3  ;;  %534 = vrot.lane.b32.xlu0 %v4079_v8, %s3845_s1 }
 0x257   :  { %532 = vrot.lane.b32.xlu0 %v379_v11, %s3846_s18  ;;  %432 = vrot.lane.b32.xlu1 %v379_v11, %s3847_s27 }
 0x25b   :  { %634 = vrot.lane.b32.xlu0 %v4092_v12, %s3842_s5  ;;  %482 = vrot.lane.b32.xlu1 %v379_v11, %s3848_s30 }
 0x25f   :  { %684 = vrot.lane.b32.xlu0 %v4092_v12, %s3844_s3  ;;  %584 = vrot.lane.b32.xlu1 %v4092_v12, %s3843_s19 }
 0x263   :  { %682 = vrot.lane.b32.xlu0 %v582_v13, %s3848_s30  ;;  %632 = vrot.lane.b32.xlu1 %v582_v13, %s3847_s27 }
 0x267   :  { %734 = vrot.lane.b32.xlu1 %v4092_v12, %s3845_s1 }
 0x26b   :  { %732 = vrot.lane.b32.xlu1 %v582_v13, %s3846_s18 }
 0x2c1   :  { %v435_v14 = vpop.permute.xlu1 %434  ;;  %v383_v15 = vpop.permute.xlu0 %382 }
 0x2c2   :  { %v440_v16 = vsel %vm384_vm9, %v435_v14, 0  ;;  %v389_v17 = vsel %vm384_vm9, %v383_v15, 0 }
 0x2c3   :  { %3370 = vmatpush3.bf16.xpose.msra.mxu1 %v389_v17  ;;  %3376 = vmatpush3.bf16.xpose.msra.mxu0 %v440_v16 }
 0x2c4   :  { %3381 = vmatprep.subr.bf16.mxu1 %v3840_v46  ;;  %3387 = vmatprep.subr.bf16.mxu0 %v3840_v46 }
 0x2c5   :  { %v485_v18 = vpop.permute.xlu1 %484  ;;  %v535_v19 = vpop.permute.xlu0 %534 }
 0x2c6   :  { %v490_v22 = vsel %vm384_vm9, %v485_v18, 0  ;;  %v540_v23 = vsel %vm384_vm9, %v535_v19, 0 }
 0x2c9   :  { %v533_v20 = vpop.permute.xlu0 %532  ;;  %v433_v21 = vpop.permute.xlu1 %432 }
 0x2ca   :  { %3372 = vmatmul.mubr.msk.bf16.vlgmr.msra.gmra.mxu1 %vm384_vm9, %v379_v11  ;;  %3378 = vmatmul.mubr.msk.bf16.vlgmr.msra.gmra.mxu0 %vm384_vm9, %v433_v21 }
 0x2cb   :  { %3382 = vmatpush3.bf16.xpose.msra.mxu1 %v490_v22  ;;  %3388 = vmatpush3.bf16.xpose.msra.mxu0 %v540_v23 }
 0x2cc   :  { %3389 = vmatprep.mubr.msk.bf16.mxu0 %vm3841_vm8, %v3840_v46  ;;  %3383 = vmatprep.mubr.msk.bf16.mxu1 %vm3841_vm8, %v3840_v46 }
 0x2cd   :  { %v483_v24 = vpop.permute.xlu1 %482  ;;  %3393 = vmatprep.subr.bf16.mxu1 %v3840_v46  ;;  %3399 = vmatprep.subr.bf16.mxu0 %v3840_v46  ;;  %v635_v25 = vpop.permute.xlu0 %634 }
 0x2ce   :  { %v640_v27 = vsel %vm384_vm9, %v635_v25, 0 }
 0x2d1   :  { %v585_v26 = vpop.permute.xlu1 %584  ;;  %v685_v30 = vpop.permute.xlu0 %684 }
 0x2d2   :  { %v590_v28 = vsel %vm384_vm9, %v585_v26, 0  ;;  %3384 = vmatmul.mubr.msk.bf16.vlgmr.msra.gmra.mxu1 %vm384_vm9, %v483_v24  ;;  %3390 = vmatmul.mubr.msk.bf16.vlgmr.msra.gmra.mxu0 %vm384_vm9, %v533_v20  ;;  %v690_v32 = vsel %vm384_vm9, %v685_v30, 0 }
 0x2d3   :  { %3394 = vmatpush3.bf16.xpose.msra.mxu1 %v590_v28  ;;  %3400 = vmatpush3.bf16.xpose.msra.mxu0 %v640_v27 }
 0x2d4   :  { %3401 = vmatprep.mubr.msk.bf16.mxu0 %vm3841_vm8, %v3840_v46  ;;  %3395 = vmatprep.mubr.msk.bf16.mxu1 %vm3841_vm8, %v3840_v46 }
 0x2d5   :  { %v633_v29 = vpop.permute.xlu1 %632  ;;  %3405 = vmatprep.subr.bf16.mxu1 %v3840_v46  ;;  %3411 = vmatprep.subr.bf16.mxu0 %v3840_v46  ;;  %v683_v34 = vpop.permute.xlu0 %682 }
 0x2d9   :  { %v735_v31 = vpop.permute.xlu1 %734 }
 0x2da   :  { %v740_v33 = vsel %vm384_vm9, %v735_v31, 0  ;;  %3396 = vmatmul.mubr.msk.bf16.vlgmr.msra.gmra.mxu1 %vm384_vm9, %v582_v13  ;;  %3402 = vmatmul.mubr.msk.bf16.vlgmr.msra.gmra.mxu0 %vm384_vm9, %v633_v29 }
 0x2db   :  { %3406 = vmatpush3.bf16.xpose.msra.mxu1 %v690_v32  ;;  %3412 = vmatpush3.bf16.xpose.msra.mxu0 %v740_v33 }
 0x2dc   :  { %3407 = vmatprep.mubr.msk.bf16.mxu1 %vm3841_vm8, %v3840_v46  ;;  %3413 = vmatprep.mubr.msk.bf16.mxu0 %vm3841_vm8, %v3840_v46 }
 0x2dd   :  { %3423 = vmatprep.subr.bf16.mxu0 %v3840_v46  ;;  %3417 = vmatprep.subr.bf16.mxu1 %v3840_v46  ;;  %v733_v35 = vpop.permute.xlu1 %732 }
 0x2e2   :  { %3408 = vmatmul.mubr.msk.bf16.vlgmr.msra.gmra.mxu1 %vm384_vm9, %v683_v34  ;;  %3414 = vmatmul.mubr.msk.bf16.vlgmr.msra.gmra.mxu0 %vm384_vm9, %v733_v35 }
 0x2e3   :  { %3419 = vmatprep.mubr.msk.bf16.mxu1 %vm3841_vm8, %v3840_v46  ;;  %3425 = vmatprep.mubr.msk.bf16.mxu0 %vm3841_vm8, %v3840_v46 }
 0x38a   :  { %v425_v41 = vpop.f32.mrf.mxu1  ;;  %v476_v42 = vpop.f32.mrf.mxu0 }
 0x38b   :  { %v4149_v43 = vadd.f32 %v425_v41, %v4146_v40  ;;  %v4152_v44 = vadd.f32 %v476_v42, %v4146_v40 }
 0x38c   :  { %v3373_v45 = vpop.f32.mrf.mxu1  ;;  %v3379_v47 = vpop.f32.mrf.mxu0 }
 0x38d   :  { %v782_v48 = vsel %vm384_vm9, %v4149_v43, -inf  ;;  %v785_v49 = vsel %vm384_vm9, %v4152_v44, -inf }
 0x38e   :  { %783 = vmax.xlane.f32.xlu0 %v782_v48  ;;  %v428_v50 = vpop.f32.mrf.mxu1  ;;  %786 = vmax.xlane.f32.xlu1 %v785_v49  ;;  %v479_v51 = vpop.f32.mrf.mxu0 }
 0x390   :  { %v3374_v52 = vpop.f32.mrf.mxu1  ;;  %v3380_v53 = vpop.f32.mrf.mxu0 }
 0x392   :  { %v526_v54 = vpop.f32.mrf.mxu1  ;;  %v576_v55 = vpop.f32.mrf.mxu0 }
 0x393   :  { %v527_v57 = vadd.f32 %v526_v54, %v4146_v40  ;;  %v4160_v60 = vadd.f32 %v576_v55, %v4146_v40 }
 0x394   :  { %v3385_v58 = vpop.f32.mrf.mxu1  ;;  %v3391_v59 = vpop.f32.mrf.mxu0 }
 0x395   :  { %v788_v61 = vsel %vm384_vm9, %v527_v57, -inf  ;;  %v791_v5 = vsel %vm384_vm9, %v4160_v60, -inf }
 0x396   :  { %789 = vmax.xlane.f32.xlu0 %v788_v61  ;;  %v529_v0 = vpop.f32.mrf.mxu1  ;;  %v579_v1 = vpop.f32.mrf.mxu0 }
 0x398   :  { %v3386_v2 = vpop.f32.mrf.mxu1  ;;  %v3392_v3 = vpop.f32.mrf.mxu0 }
 0x39a   :  { %v626_v6 = vpop.f32.mrf.mxu1  ;;  %792 = vmax.xlane.f32.xlu0 %v791_v5  ;;  %v676_v7 = vpop.f32.mrf.mxu0 }
 0x39b   :  { %v4168_v9 = vadd.f32 %v626_v6, %v4163_v4  ;;  %v4171_v10 = vadd.f32 %v676_v7, %v4163_v4 }
 0x39c   :  { %v3397_v11 = vpop.f32.mrf.mxu1  ;;  %v3403_v13 = vpop.f32.mrf.mxu0 }
 0x39d   :  { %v794_v14 = vsel %vm384_vm9, %v4168_v9, -inf  ;;  %v797_v15 = vsel %vm384_vm9, %v4171_v10, -inf }
 0x39e   :  { %v629_v16 = vpop.f32.mrf.mxu1  ;;  %795 = vmax.xlane.f32.xlu0 %v794_v14  ;;  %798 = vmax.xlane.f32.xlu1 %v797_v15  ;;  %v679_v17 = vpop.f32.mrf.mxu0 }
 0x3a0   :  { %v3398_v18 = vpop.f32.mrf.mxu1  ;;  %v3404_v19 = vpop.f32.mrf.mxu0 }
 0x3a2   :  { %v726_v20 = vpop.f32.mrf.mxu1  ;;  %v776_v21 = vpop.f32.mrf.mxu0 }
 0x3a3   :  { %v4178_v22 = vadd.f32 %v726_v20, %v4163_v4  ;;  %v777_v30 = vadd.f32 %v776_v21, %v4163_v4 }
 0x3a4   :  { %v3409_v23 = vpop.f32.mrf.mxu1  ;;  %v3415_v24 = vpop.f32.mrf.mxu0 }
 0x3a5   :  { %v800_v25 = vsel %vm384_vm9, %v4178_v22, -inf  ;;  %v803_v31 = vsel %vm384_vm9, %v777_v30, -inf }
 0x3a6   :  { %v729_v26 = vpop.f32.mrf.mxu1  ;;  %801 = vmax.xlane.f32.xlu0 %v800_v25  ;;  %v779_v27 = vpop.f32.mrf.mxu0 }
 0x3a8   :  { %v3410_v28 = vpop.f32.mrf.mxu1  ;;  %v3416_v29 = vpop.f32.mrf.mxu0 }
 0x3af   :  { %924 = vrot.lane.b32.xlu1 %v4079_v8, %s3850_s2 }
 0x3b3   :  { %972 = vrot.lane.b32.xlu1 %v4079_v8, %s3851_s24 }
 0x3bc   :  { %874 = vrot.lane.b32.xlu0 %v4079_v8, %s3852_s6 }
 0x3d7   :  { %804 = vmax.xlane.f32.xlu1 %v803_v31 }
 0x3e8   :  { %1022 = vrot.lane.b32.xlu1 %v4079_v8, %s3853_s28 }
 0x417   :  { %v784_v32 = vpop.xlane.xlu0 %783  ;;  %v787_v33 = vpop.xlane.xlu1 %786 }
 0x418   :  { %v806_v34 = vsub.f32 %v4149_v43, %v784_v32  ;;  %v807_v35 = vsub.f32 %v4152_v44, %v787_v33 }
 0x41a   :  { %v814_v36 = vmul.f32 1.442695, %v806_v34  ;;  %v816_v37 = vmul.f32 1.442695, %v807_v35 }
 0x41c   :  { %3718 = vpow2.f32 %v814_v36 }
 0x41d   :  { %3720 = vpow2.f32 %v816_v37 }
 0x41f   :  { %v790_v38 = vpop.xlane.xlu0 %789 }
 0x420   :  { %v808_v39 = vsub.f32 %v527_v57, %v790_v38 }
 0x422   :  { %v818_v41 = vmul.f32 1.442695, %v808_v39 }
 0x423   :  { %v793_v42 = vpop.xlane.xlu0 %792 }
 0x424   :  { %3722 = vpow2.f32 %v818_v41  ;;  %v809_v56 = vsub.f32 %v4160_v60, %v793_v42 }
 0x426   :  { %v820_v57 = vmul.f32 1.442695, %v809_v56 }
 0x427   :  { %v799_v45 = vpop.xlane.xlu1 %798  ;;  %v796_v49 = vpop.xlane.xlu0 %795 }
 0x428   :  { %v811_v58 = vsub.f32 %v4171_v10, %v799_v45  ;;  %v810_v59 = vsub.f32 %v4168_v9, %v796_v49  ;;  %3724 = vpow2.f32 %v820_v57 }
 0x429   :  { %v3719_v47 = vpop.eup %3718 }
 0x42a   :  { %v3721_v48 = vpop.eup %3720  ;;  %v830_v8 = vsel %vm384_vm9, %v3719_v47, 0.0  ;;  %v824_v61 = vmul.f32 1.442695, %v811_v58  ;;  %v822_v0 = vmul.f32 1.442695, %v810_v59 }
 0x42b   :  { %831 = vadd.xlane.f32.xlu0 %v830_v8  ;;  %v925_v50 = vpop.permute.xlu1 %924  ;;  %v833_v43 = vsel %vm384_vm9, %v3721_v48, 0.0 }
 0x42c   :  { %v930_v44 = vsel %vm235_vm3, %v925_v50, 0  ;;  %834 = vadd.xlane.f32.xlu1 %v833_v43  ;;  %3726 = vpow2.f32 %v824_v61 }
 0x42d   :  { %3424 = vmatpush3.bf16.msra.mxu0 %v930_v44  ;;  %3728 = vpow2.f32 %v822_v0 }
 0x42e   :  { %3435 = vmatprep.subr.bf16.mxu0 %v3840_v46 }
 0x42f   :  { %v802_v51 = vpop.xlane.xlu0 %801  ;;  %v973_v3 = vpop.permute.xlu1 %972 }
 0x430   :  { %v812_v1 = vsub.f32 %v4178_v22, %v802_v51  ;;  %v978_v27 = vsel %vm235_vm3, %v973_v3, 0 }
 0x431   :  { %v4198_v52 = vpop.eup %3722 }
 0x432   :  { %v836_v53 = vsel %vm384_vm9, %v4198_v52, 0.0  ;;  %v826_v2 = vmul.f32 1.442695, %v812_v1 }
 0x433   :  { %837 = vadd.xlane.f32.xlu0 %v836_v53  ;;  %v875_v54 = vpop.permute.xlu0 %874 }
 0x434   :  { %v880_v55 = vsel %vm235_vm3, %v875_v54, 0  ;;  %3730 = vpow2.f32 %v826_v2 }
 0x435   :  { %3418 = vmatpush3.bf16.msra.mxu1 %v880_v55  ;;  %v3725_v5 = vpop.eup %3724 }
 0x436   :  { %3429 = vmatprep.subr.bf16.mxu1 %v3840_v46  ;;  %v839_v60 = vsel %vm384_vm9, %v3725_v5, 0.0 }
 0x439   :  { %v4213_v7 = vpop.eup %3726 }
 0x43a   :  { %v4215_v9 = vpop.eup %3728  ;;  %v845_v13 = vsel %vm384_vm9, %v4213_v7, 0.0 }
 0x43b   :  { %v842_v14 = vsel %vm384_vm9, %v4215_v9, 0.0 }
 0x43d   :  { %1137 = vrot.lane.b32.xlu1 %v4092_v12, %s3850_s2 }
 0x441   :  { %v4221_v15 = vpop.eup %3730 }
 0x442   :  { %v848_v16 = vsel %vm384_vm9, %v4221_v15, 0.0 }
 0x449   :  { %1087 = vrot.lane.b32.xlu0 %v4092_v12, %s3852_s6 }
 0x460   :  { %v805_v6 = vpop.xlane.xlu1 %804 }
 0x461   :  { %840 = vadd.xlane.f32.xlu1 %v839_v60  ;;  %v813_v10 = vsub.f32 %v777_v30, %v805_v6 }
 0x463   :  { %v828_v11 = vmul.f32 1.442695, %v813_v10 }
 0x464   :  { %v1023_v19 = vpop.permute.xlu1 %1022 }
 0x465   :  { %3732 = vpow2.f32 %v828_v11  ;;  %846 = vadd.xlane.f32.xlu1 %v845_v13 }
 0x468   :  { %843 = vadd.xlane.f32.xlu0 %v842_v14 }
 0x46c   :  { %849 = vadd.xlane.f32.xlu0 %v848_v16 }
 0x472   :  { %v4225_v17 = vpop.eup %3732 }
 0x473   :  { %v851_v18 = vsel %vm384_vm9, %v4225_v17, 0.0 }
 0x474   :  { %852 = vadd.xlane.f32.xlu1 %v851_v18 }
 0x482   :  { %1185 = vrot.lane.b32.xlu0 %v4092_v12, %s3851_s24 }
 0x485   :  { %1235 = vrot.lane.b32.xlu1 %v4092_v12, %s3853_s28  ;;  %v1028_v12 = vsel %vm235_vm3, %v1023_v19, 0 }
 0x4b4   :  { %v832_v20 = vpop.xlane.xlu0 %831 }
 0x4b5   :  { %3734 = vrcp.f32 %v832_v20  ;;  %v835_v21 = vpop.xlane.xlu1 %834  ;;  %v3692_v20 = vld [vmem:[%s4663_s8 + $0x8] sm:$0xff]  }
 0x4b6   :  { %3736 = vrcp.f32 %v835_v21 }
 0x4b9   :  { %v1138_v29 = vpop.permute.xlu1 %1137 }
 0x4ba   :  { %v1143_v49 = vsel %vm235_vm3, %v1138_v29, 0 }
 0x4bc   :  { %v838_v30 = vpop.xlane.xlu0 %837 }
 0x4bd   :  { %3738 = vrcp.f32 %v838_v30 }
 0x4c0   :  { %v1088_v32 = vpop.permute.xlu0 %1087 }
 0x4c1   :  { %v1093_v45 = vsel %vm235_vm3, %v1088_v32, 0 }
 0x4c2   :  { %v3735_v22 = vpop.eup %3734 }
 0x4c3   :  { %v3737_v23 = vpop.eup %3736  ;;  %v862_v24 = vmul.f32 %v3735_v22, %v3719_v47 }
 0x4c4   :  { %v863_v25 = vmul.f32 %v3737_v23, %v3721_v48 }
 0x4c6   :  { %v870_v26 = vpack.c.bf16 %v863_v25, %v862_v24 }
 0x4c8   :  { %3420 = vmatmul.mubr.msk.bf16.vlgmr.msra.gmra.mxu1 %vm384_vm9, %v870_v26  ;;  %v923_v28 = vrot.slane %v870_v26, 4  ;;  %v3693_v26 = vld [vmem:[%s4663_s8] sm:$0xff]  }
 0x4c9   :  { %3430 = vmatpush3.bf16.msra.mxu1 %v978_v27  ;;  %3431 = vmatprep.mubr.msk.bf16.mxu1 %vm3841_vm8, %v3840_v46 }
 0x4ca   :  { %3426 = vmatmul.mubr.msk.bf16.vlgmr.msra.gmra.mxu0 %vm384_vm9, %v923_v28  ;;  %3441 = vmatprep.subr.bf16.mxu1 %v3840_v46  ;;  %v3739_v35 = vpop.eup %3738 }
 0x4cb   :  { %3436 = vmatpush3.bf16.msra.mxu0 %v1028_v12  ;;  %3437 = vmatprep.mubr.msk.bf16.mxu0 %vm3841_vm8, %v3840_v46  ;;  %v864_v38 = vmul.f32 %v3739_v35, %v4198_v52 }
 0x4cc   :  { %3447 = vmatprep.subr.bf16.mxu0 %v3840_v46 }
 0x4ea   :  { %v841_v31 = vpop.xlane.xlu1 %840 }
 0x4eb   :  { %3740 = vrcp.f32 %v841_v31 }
 0x4ee   :  { %v847_v33 = vpop.xlane.xlu1 %846 }
 0x4ef   :  { %3742 = vrcp.f32 %v847_v33 }
 0x4f1   :  { %v844_v34 = vpop.xlane.xlu0 %843 }
 0x4f2   :  { %3744 = vrcp.f32 %v844_v34 }
 0x4f5   :  { %v850_v37 = vpop.xlane.xlu0 %849 }
 0x4f6   :  { %3746 = vrcp.f32 %v850_v37 }
 0x4f8   :  { %v3741_v36 = vpop.eup %3740 }
 0x4f9   :  { %v865_v39 = vmul.f32 %v3741_v36, %v3725_v5  ;;  %v1186_v44 = vpop.permute.xlu0 %1185 }
 0x4fa   :  { %v1191_v54 = vsel %vm235_vm3, %v1186_v44, 0 }
 0x4fb   :  { %v871_v41 = vpack.c.bf16 %v865_v39, %v864_v38 }
 0x4fc   :  { %v3743_v42 = vpop.eup %3742 }
 0x4fd   :  { %3432 = vmatmul.mubr.msk.bf16.vlgmr.msra.gmra.mxu1 %vm384_vm9, %v871_v41  ;;  %v853_v47 = vpop.xlane.xlu1 %852  ;;  %v1021_v48 = vrot.slane %v871_v41, 4  ;;  %v867_v43 = vmul.f32 %v3743_v42, %v4213_v7 }
 0x4fe   :  { %3442 = vmatpush3.bf16.msra.mxu1 %v1093_v45  ;;  %3748 = vrcp.f32 %v853_v47  ;;  %3443 = vmatprep.mubr.msk.bf16.mxu1 %vm3841_vm8, %v3840_v46 }
 0x4ff   :  { %v3745_v8 = vpop.eup %3744  ;;  %3438 = vmatmul.mubr.msk.bf16.vlgmr.msra.gmra.mxu0 %vm384_vm9, %v1021_v48  ;;  %3453 = vmatprep.subr.bf16.mxu1 %v3840_v46 }
 0x500   :  { %3448 = vmatpush3.bf16.msra.mxu0 %v1143_v49  ;;  %v866_v50 = vmul.f32 %v3745_v8, %v4215_v9  ;;  %3449 = vmatprep.mubr.msk.bf16.mxu0 %vm3841_vm8, %v3840_v46 }
 0x501   :  { %3459 = vmatprep.subr.bf16.mxu0 %v3840_v46  ;;  %v1236_v52 = vpop.permute.xlu1 %1235 }
 0x502   :  { %v872_v51 = vpack.c.bf16 %v867_v43, %v866_v50  ;;  %v1241_v55 = vsel %vm235_vm3, %v1236_v52, 0 }
 0x503   :  { %v3747_v56 = vpop.eup %3746 }
 0x504   :  { %v1136_v53 = vrot.slane %v872_v51, 4  ;;  %v868_v58 = vmul.f32 %v3747_v56, %v4221_v15  ;;  %v3171_v56 = vld [vmem:[%s4664_s9] ss:$0 sm:$0xff] }
 0x505   :  { %3444 = vmatmul.mubr.msk.bf16.vlgmr.msra.gmra.mxu1 %vm384_vm9, %v872_v51 }
 0x506   :  { %3454 = vmatpush3.bf16.msra.mxu1 %v1191_v54  ;;  %3455 = vmatprep.mubr.msk.bf16.mxu1 %vm3841_vm8, %v3840_v46 }
 0x507   :  { %3450 = vmatmul.mubr.msk.bf16.vlgmr.msra.gmra.mxu0 %vm384_vm9, %v1136_v53  ;;  %3465 = vmatprep.subr.bf16.mxu1 %v3840_v46 }
 0x508   :  { %3460 = vmatpush3.bf16.msra.mxu0 %v1241_v55  ;;  %3461 = vmatprep.mubr.msk.bf16.mxu0 %vm3841_vm8, %v3840_v46 }
 0x509   :  { %3473 = vmatprep.subr.bf16.mxu0 %v3840_v46 }
 0x50b   :  { %v3749_v57 = vpop.eup %3748 }
 0x50c   :  { %v869_v59 = vmul.f32 %v3749_v57, %v4225_v17 }
 0x50e   :  { %v873_v61 = vpack.c.bf16 %v869_v59, %v868_v58 }
 0x510   :  { %3456 = vmatmul.mubr.msk.bf16.vlgmr.msra.gmra.mxu1 %vm384_vm9, %v873_v61  ;;  %v1234_v0 = vrot.slane %v873_v61, 4 }
 0x511   :  { %3469 = vmatprep.mubr.msk.bf16.mxu1 %vm3841_vm8, %v3840_v46  ;;  %3466 = vmatpush3.bf16.msra.mxu1 %v3692_v20 }
 0x512   :  { %3462 = vmatmul.mubr.msk.bf16.vlgmr.msra.gmra.mxu0 %vm384_vm9, %v1234_v0  ;;  %3467 = vmatprep.subr.bf16.mxu1 %v3840_v46 }
 0x513   :  { %3477 = vmatprep.mubr.msk.bf16.mxu0 %vm3841_vm8, %v3840_v46 }
 0x515   :  { %3468 = vmatpush3.bf16.msra.mxu1 %v3693_v26  ;;  %v3175_v26 = vld [vmem:[%s4665_s10] ss:$0 sm:$0xff] }
 0x516   :  { %3481 = vmatprep.subr.bf16.mxu1 %v3840_v46 }
 0x588   :  { %v916_v1 = vpop.f32.mrf.mxu1 }
 0x58a   :  { %v3421_v2 = vpop.f32.mrf.mxu1  ;;  %v966_v3 = vpop.f32.mrf.mxu0 }
 0x58c   :  { %v919_v5 = vpop.f32.mrf.mxu1  ;;  %v3427_v60 = vpop.f32.mrf.mxu0 }
 0x58e   :  { %v3422_v6 = vpop.f32.mrf.mxu1  ;;  %v969_v7 = vpop.f32.mrf.mxu0 }
 0x590   :  { %v3428_v10 = vpop.f32.mrf.mxu0 }
 0x5bd   :  { %v1014_v11 = vpop.f32.mrf.mxu1 }
 0x5bf   :  { %v3433_v9 = vpop.f32.mrf.mxu1  ;;  %v1064_v13 = vpop.f32.mrf.mxu0 }
 0x5c1   :  { %v1017_v14 = vpop.f32.mrf.mxu1  ;;  %v3439_v15 = vpop.f32.mrf.mxu0 }
 0x5c3   :  { %v3434_v16 = vpop.f32.mrf.mxu1  ;;  %v1067_v17 = vpop.f32.mrf.mxu0 }
 0x5c4   :  { %v3695_v17 = vld [vmem:[%s4667_s12] sm:$0xff]  }
 0x5c5   :  { %v3440_v18 = vpop.f32.mrf.mxu0  ;;  %v1129_v19 = vpop.f32.mrf.mxu1 }
 0x5c7   :  { %v3445_v21 = vpop.f32.mrf.mxu1  ;;  %v1179_v22 = vpop.f32.mrf.mxu0 }
 0x5c8   :  { %v3660_v23 = vpack.i.bf16 %v1179_v22, %v966_v3 }
 0x5c9   :  { %v1132_v24 = vpop.f32.mrf.mxu1  ;;  %v3451_v25 = vpop.f32.mrf.mxu0 }
 0x5ca   :  { %3661 = vrot.lane.b32.xlu0 %v3660_v23, %s3854_s20 }
 0x5cb   :  { %v3446_v27 = vpop.f32.mrf.mxu1  ;;  %v1182_v28 = vpop.f32.mrf.mxu0 }
 0x5cd   :  { %v3452_v12 = vpop.f32.mrf.mxu0 }
 0x5d0   :  { %v1227_v29 = vpop.f32.mrf.mxu1 }
 0x5d1   :  { %v3665_v30 = vpack.i.bf16 %v1227_v29, %v1014_v11  ;;  %v3176_v29 = vld [vmem:[%s4666_s11] ss:$0 sm:$0xff] }
 0x5d2   :  { %v3457_v31 = vpop.f32.mrf.mxu1  ;;  %v1277_v32 = vpop.f32.mrf.mxu0 }
 0x5d3   :  { %v3670_v33 = vpack.i.bf16 %v1277_v32, %v1064_v13  ;;  %3666 = vrot.lane.b32.xlu1 %v3665_v30, %s4685_s26 }
 0x5d4   :  { %v1230_v34 = vpop.f32.mrf.mxu1  ;;  %v3463_v35 = vpop.f32.mrf.mxu0 }
 0x5d5   :  { %3671 = vrot.lane.b32.xlu0 %v3670_v33, %s4684_s22  ;;  %v3696_v34 = vld [vmem:[%s4669_s14 + $0x18] sm:$0xff]   ;;  %v3697_v35 = vld [vmem:[%s4669_s14 + $0x10] sm:$0xff]   ;;  %s4706_s22 = sld [smem:[#allocation15_spill]] }
 0x5d6   :  { %v3458_v36 = vpop.f32.mrf.mxu1  ;;  %v1280_v37 = vpop.f32.mrf.mxu0 }
 0x5d7   :  { %v3698_v36 = vld [vmem:[%s4669_s14 + $0x8] sm:$0xff]   ;;  %v3699_v37 = vld [vmem:[%s4669_s14] sm:$0xff]  }
 0x5d8   :  { %v3464_v38 = vpop.f32.mrf.mxu0 }
 0x5d9   :  { %v3177_v38 = vld [vmem:[%s4668_s13] ss:$0 sm:$0xff] }
 0x63c   :  { %v3662_v39 = vpop.permute.xlu0 %3661 }
 0x63d   :  { %v3664_v41 = vunpack.i.h.bf16 %v3662_v39  ;;  %v3663_v42 = vunpack.i.l.bf16 %v3662_v39 }
 0x63f   :  { %v1295_v8 = vsel %vm384_vm9, %v1129_v19, %v3664_v41  ;;  %v1082_v49 = vsel %vm384_vm9, %v916_v1, %v3663_v42 }
 0x645   :  { %v3667_v45 = vpop.permute.xlu1 %3666 }
 0x646   :  { %v3669_v47 = vunpack.i.h.bf16 %v3667_v45  ;;  %v3668_v48 = vunpack.i.l.bf16 %v3667_v45 }
 0x647   :  { %v3672_v50 = vpop.permute.xlu0 %3671 }
 0x648   :  { %v1084_v43 = vsel %vm1083_vm12, %v1082_v49, %v3668_v48  ;;  %v1296_v44 = vsel %vm1083_vm12, %v1295_v8, %v3669_v47  ;;  %v3674_v51 = vunpack.i.h.bf16 %v3672_v50  ;;  %v3673_v52 = vunpack.i.l.bf16 %v3672_v50 }
 0x64a   :  { %v1297_v53 = vsel %vm1085_vm13, %v1296_v44, %v3674_v51  ;;  %v1086_v54 = vsel %vm1085_vm13, %v1084_v43, %v3673_v52 }
 0x64b   :  { %v1302_v55 = vpack.c.bf16 %v1297_v53, %v1086_v54 }
 0x64d   :  { %3470 = vmatmul.mubr.msk.bf16.vlgmr.msra.gmra.mxu1 %vm255_vm7, %v1302_v55 }
 0x64e   :  { %3489 = vmatprep.mubr.msk.bf16.mxu1 %vm3841_vm8, %v3840_v46  ;;  %3482 = vmatpush3.bf16.msra.mxu1 %v3696_v34  ;;  %v3187_v34 = vld [vmem:[%s4671_s16] ss:$0 sm:$0xff] }
 0x64f   :  { %3483 = vmatprep.subr.bf16.mxu1 %v3840_v46 }
 0x652   :  { %3484 = vmatpush3.bf16.msra.mxu1 %v3697_v35 }
 0x653   :  { %3485 = vmatprep.subr.bf16.mxu1 %v3840_v46 }
 0x656   :  { %3486 = vmatpush3.bf16.msra.mxu1 %v3698_v36 }
 0x657   :  { %3487 = vmatprep.subr.bf16.mxu1 %v3840_v46 }
 0x65a   :  { %3488 = vmatpush3.bf16.msra.mxu1 %v3699_v37 }
 0x65b   :  { %3507 = vmatprep.subr.bf16.mxu1 %v3840_v46 }
 0x70d   :  { %v1359_v57 = vpop.f32.mrf.mxu1 }
 0x70e   :  { %v1360_v58 = vadd.f32 %v3171_v56, %v1359_v57 }
 0x70f   :  { %v3471_v59 = vpop.f32.mrf.mxu1 }
 0x710   :  { %v1366_v61 = vadd.f32 %v1360_v58, %v4067_v62 }
 0x711   :  { %v1362_v0 = vpop.f32.mrf.mxu1 }
 0x712   :  { %v1363_v1 = vadd.f32 %v3171_v56, %v1362_v0  ;;  %v1370_v2 = vsel %vm255_vm7, %v1366_v61, 0.0 }
 0x713   :  { %1371 = vadd.xlane.f32.xlu1 %v1370_v2  ;;  %v3472_v3 = vpop.f32.mrf.mxu1 }
 0x714   :  { %v1367_v5 = vadd.f32 %v1363_v1, %v4069_v63  ;;  %v3694_v63 = vld [vmem:[%s4667_s12 + $0x8] sm:$0xff]  }
 0x715   :  { %3474 = vmatpush3.bf16.msra.mxu0 %v3694_v63 }
 0x716   :  { %v1373_v60 = vsel %vm255_vm7, %v1367_v5, 0.0  ;;  %3475 = vmatprep.subr.bf16.mxu0 %v3840_v46 }
 0x717   :  { %1374 = vadd.xlane.f32.xlu0 %v1373_v60 }
 0x719   :  { %3476 = vmatpush3.bf16.msra.mxu0 %v3695_v17 }
 0x71a   :  { %3493 = vmatprep.subr.bf16.mxu0 %v3840_v46 }
 0x79c   :  { %v1372_v6 = vpop.xlane.xlu1 %1371 }
 0x79d   :  { %v1376_v7 = vmul.f32 0.03125, %v1372_v6 }
 0x79f   :  { %v1378_v10 = vsub.f32 %v1366_v61, %v1376_v7 }
 0x7a0   :  { %v1375_v11 = vpop.xlane.xlu0 %1374 }
 0x7a1   :  { %v1377_v9 = vmul.f32 0.03125, %v1375_v11  ;;  %v1380_v13 = vmul.f32 %v1378_v10, %v1378_v10 }
 0x7a3   :  { %v1379_v14 = vsub.f32 %v1367_v5, %v1377_v9  ;;  %v1382_v62 = vsel %vm255_vm7, %v1380_v13, 0.0  ;;  %v3181_v5 = vld [vmem:[%s4670_s15] ss:$0 sm:$0xff] }
 0x7a4   :  { %1383 = vadd.xlane.f32.xlu0 %v1382_v62 }
 0x7a5   :  { %v1381_v15 = vmul.f32 %v1379_v14, %v1379_v14 }
 0x7a7   :  { %v1385_v16 = vsel %vm255_vm7, %v1381_v15, 0.0 }
 0x7a8   :  { %1386 = vadd.xlane.f32.xlu0 %v1385_v16 }
 0x82d   :  { %v1384_v18 = vpop.xlane.xlu0 %1383 }
 0x82e   :  { %v1388_v19 = vmul.f32 0.03125, %v1384_v18 }
 0x830   :  { %v1390_v20 = vadd.f32 1e-12, %v1388_v19 }
 0x831   :  { %v1387_v21 = vpop.xlane.xlu0 %1386 }
 0x832   :  { %3750 = vrsqrt.f32 %v1390_v20  ;;  %v1389_v22 = vmul.f32 0.03125, %v1387_v21 }
 0x834   :  { %v1391_v23 = vadd.f32 1e-12, %v1389_v22 }
 0x836   :  { %3752 = vrsqrt.f32 %v1391_v23 }
 0x83f   :  { %v3751_v24 = vpop.eup %3750 }
 0x840   :  { %v1394_v25 = vmul.f32 %v3751_v24, %v1378_v10 }
 0x842   :  { %v1402_v12 = vmul.f32 %v3175_v26, %v1394_v25  ;;  %v3700_v25 = vld [vmem:[%s4703_s17 + $0x18] sm:$0xff]  }
 0x843   :  { %v3753_v27 = vpop.eup %3752 }
 0x844   :  { %v1395_v28 = vmul.f32 %v3753_v27, %v1379_v14  ;;  %v1410_v31 = vadd.f32 %v3176_v29, %v1402_v12 }
 0x846   :  { %v1403_v30 = vmul.f32 %v3175_v26, %v1395_v28  ;;  %v3701_v26 = vld [vmem:[%s4703_s17 + $0x10] sm:$0xff]  }
 0x848   :  { %v1411_v32 = vadd.f32 %v3176_v29, %v1403_v30 }
 0x84a   :  { %v1416_v33 = vpack.c.bf16 %v1411_v32, %v1410_v31 }
 0x84c   :  { %3478 = vmatmul.mubr.msk.bf16.vlgmr.msra.gmra.mxu0 %vm255_vm7, %v1416_v33 }
 0x84d   :  { %3497 = vmatprep.mubr.msk.bf16.mxu0 %vm3841_vm8, %v3840_v46  ;;  %3494 = vmatpush3.bf16.msra.mxu0 %v3700_v25 }
 0x84e   :  { %3495 = vmatprep.subr.bf16.mxu0 %v3840_v46 }
 0x851   :  { %3496 = vmatpush3.bf16.msra.mxu0 %v3701_v26 }
 0x852   :  { %3501 = vmatprep.subr.bf16.mxu0 %v3840_v46 }
 0x90c   :  { %v1473_v39 = vpop.f32.mrf.mxu0 }
 0x90d   :  { %v1474_v41 = vadd.f32 %v3177_v38, %v1473_v39 }
 0x90e   :  { %v3479_v42 = vpop.f32.mrf.mxu0 }
 0x90f   :  { %v1482_v45 = vmul.f32 0.044715, %v1474_v41  ;;  %v1480_v59 = vmul.f32 0.5, %v1474_v41 }
 0x910   :  { %v1476_v47 = vpop.f32.mrf.mxu0 }
 0x911   :  { %v1484_v48 = vmul.f32 %v1482_v45, %v1474_v41  ;;  %v1477_v8 = vadd.f32 %v3177_v38, %v1476_v47  ;;  %v3188_v38 = vld [vmem:[%s4706_s22] ss:$0 sm:$0xff] }
 0x912   :  { %v3480_v49 = vpop.f32.mrf.mxu0 }
 0x913   :  { %v1486_v50 = vmul.f32 %v1484_v48, %v1474_v41  ;;  %v1483_v43 = vmul.f32 0.044715, %v1477_v8  ;;  %v1481_v61 = vmul.f32 0.5, %v1477_v8  ;;  %v3194_v48 = vld [vmem:[%s4662_s7 + $0x1] ss:$0 sm:$0xff] }
 0x915   :  { %v1488_v44 = vadd.f32 %v1486_v50, %v1474_v41  ;;  %v1485_v51 = vmul.f32 %v1483_v43, %v1477_v8 }
 0x917   :  { %v1490_v52 = vmul.f32 0.7978846, %v1488_v44  ;;  %v1487_v53 = vmul.f32 %v1485_v51, %v1477_v8 }
 0x919   :  { %3754 = vtanh.f32 %v1490_v52  ;;  %v1489_v54 = vadd.f32 %v1487_v53, %v1477_v8 }
 0x91b   :  { %v1491_v55 = vmul.f32 0.7978846, %v1489_v54 }
 0x91d   :  { %3756 = vtanh.f32 %v1491_v55 }
 0x926   :  { %v3755_v56 = vpop.eup %3754 }
 0x927   :  { %v1494_v57 = vadd.f32 1.0, %v3755_v56 }
 0x929   :  { %v1496_v1 = vmul.f32 %v1494_v57, %v1480_v59 }
 0x92a   :  { %v3757_v58 = vpop.eup %3756 }
 0x92b   :  { %v1495_v0 = vadd.f32 1.0, %v3757_v58 }
 0x92d   :  { %v1497_v2 = vmul.f32 %v1495_v0, %v1481_v61 }
 0x92f   :  { %v1506_v3 = vpack.c.bf16 %v1497_v2, %v1496_v1 }
 0x931   :  { %3490 = vmatmul.mubr.msk.bf16.vlgmr.msra.gmra.mxu1 %vm1538_vm14, %v1506_v3 }
 0x932   :  { %3509 = vmatprep.mubr.msk.bf16.mxu1 %vm3841_vm8, %v3840_v46 }
 0x9f1   :  { %v1576_v60 = vpop.f32.mrf.mxu1 }
 0x9f2   :  { %v1577_v6 = vadd.f32 %v3181_v5, %v1576_v60 }
 0x9f3   :  { %v3491_v7 = vpop.f32.mrf.mxu1 }
 0x9f4   :  { %v1583_v10 = vadd.f32 %v1577_v6, %v1410_v31 }
 0x9f5   :  { %v1579_v11 = vpop.f32.mrf.mxu1 }
 0x9f6   :  { %v1580_v9 = vadd.f32 %v3181_v5, %v1579_v11  ;;  %v1587_v13 = vsel %vm255_vm7, %v1583_v10, 0.0 }
 0x9f7   :  { %1588 = vadd.xlane.f32.xlu1 %v1587_v13  ;;  %v3492_v14 = vpop.f32.mrf.mxu1 }
 0x9f8   :  { %v1584_v62 = vadd.f32 %v1580_v9, %v1411_v32 }
 0x9fa   :  { %v1590_v15 = vsel %vm255_vm7, %v1584_v62, 0.0 }
 0x9fb   :  { %1591 = vadd.xlane.f32.xlu0 %v1590_v15 }
 0xa80   :  { %v1589_v16 = vpop.xlane.xlu1 %1588 }
 0xa81   :  { %v1593_v63 = vmul.f32 0.03125, %v1589_v16 }
 0xa83   :  { %v1595_v17 = vsub.f32 %v1583_v10, %v1593_v63 }
 0xa84   :  { %v1592_v18 = vpop.xlane.xlu0 %1591 }
 0xa85   :  { %v1594_v19 = vmul.f32 0.03125, %v1592_v18  ;;  %v1597_v20 = vmul.f32 %v1595_v17, %v1595_v17 }
 0xa87   :  { %v1596_v21 = vsub.f32 %v1584_v62, %v1594_v19  ;;  %v1599_v22 = vsel %vm255_vm7, %v1597_v20, 0.0 }
 0xa88   :  { %1600 = vadd.xlane.f32.xlu1 %v1599_v22 }
 0xa89   :  { %v1598_v23 = vmul.f32 %v1596_v21, %v1596_v21 }
 0xa8b   :  { %v1602_v24 = vsel %vm255_vm7, %v1598_v23, 0.0 }
 0xa8c   :  { %1603 = vadd.xlane.f32.xlu0 %v1602_v24 }
 0xb11   :  { %v1601_v27 = vpop.xlane.xlu1 %1600 }
 0xb12   :  { %v1605_v28 = vmul.f32 0.03125, %v1601_v27 }
 0xb14   :  { %v1607_v12 = vadd.f32 1e-12, %v1605_v28 }
 0xb15   :  { %v1604_v29 = vpop.xlane.xlu0 %1603 }
 0xb16   :  { %3758 = vrsqrt.f32 %v1607_v12  ;;  %v1606_v30 = vmul.f32 0.03125, %v1604_v29 }
 0xb18   :  { %v1608_v31 = vadd.f32 1e-12, %v1606_v30 }
 0xb1a   :  { %3760 = vrsqrt.f32 %v1608_v31 }
 0xb23   :  { %v3759_v32 = vpop.eup %3758 }
 0xb24   :  { %v1611_v33 = vmul.f32 %v3759_v32, %v1595_v17 }
 0xb26   :  { %v1619_v37 = vmul.f32 %v3187_v34, %v1611_v33 }
 0xb27   :  { %v3761_v35 = vpop.eup %3760 }
 0xb28   :  { %v1612_v36 = vmul.f32 %v3761_v35, %v1596_v21  ;;  %v4363_v41 = vadd.f32 %v3188_v38, %v1619_v37 }
 0xb2a   :  { %v1620_v39 = vmul.f32 %v3187_v34, %v1612_v36 }
 0xb2c   :  { %v4365_v42 = vadd.f32 %v3188_v38, %v1620_v39 }
 0xb2e   :  { %v1629_v45 = vpack.c.bf16 %v4365_v42, %v4363_v41 }
 0xb30   :  { %3498 = vmatmul.mubr.msk.bf16.vlgmr.msra.gmra.mxu0 %vm255_vm7, %v1629_v45 }
 0xb31   :  { %3503 = vmatprep.mubr.msk.bf16.mxu0 %vm3841_vm8, %v3840_v46 }
 0xbf0   :  { %v1692_v47 = vpop.f32.mrf.mxu0 }
 0xbf1   :  { %v1693_v50 = vadd.f32 %v3194_v48, %v1692_v47 }
 0xbf2   :  { %v3499_v8 = vpop.f32.mrf.mxu0 }
 0xbf3   :  { %v1699_v53 = vmul.f32 0.35355338, %v1693_v50 }
 0xbf4   :  { %v1695_v49 = vpop.f32.mrf.mxu0 }
 0xbf5   :  { %v1696_v43 = vadd.f32 %v3194_v48, %v1695_v49 }
 0xbf6   :  { %v3500_v44 = vpop.f32.mrf.mxu0 }
 0xbf7   :  { %v1700_v51 = vmul.f32 0.35355338, %v1696_v43  ;;  %v4375_v52 = vpack.c.bf16 %v1696_v43, %v1693_v50 }
 0xbf9   :  { %1755 = vrot.lane.b32.xlu0 %v4375_v52, %s3842_s5  ;;  %1704 = vrot.lane.b32.xlu1 %v4375_v52, %s3843_s19  ;;  %v1701_v54 = vpack.c.bf16 %v1700_v51, %v1699_v53  ;;  %v4385_v55 = vrot.slane %v4375_v52, 4 }
 0xbfb   :  { %v1903_v56 = vrot.slane %v1701_v54, 4 }
 0xbfd   :  { %1805 = vrot.lane.b32.xlu1 %v4375_v52, %s3844_s3  ;;  %1803 = vrot.lane.b32.xlu0 %v1701_v54, %s3848_s30 }
 0xc01   :  { %1855 = vrot.lane.b32.xlu1 %v4375_v52, %s3845_s1  ;;  %1905 = vrot.lane.b32.xlu0 %v4385_v55, %s3843_s19 }
 0xc05   :  { %1753 = vrot.lane.b32.xlu1 %v1701_v54, %s3847_s27  ;;  %1953 = vrot.lane.b32.xlu0 %v1903_v56, %s3847_s27 }
 0xc09   :  { %1853 = vrot.lane.b32.xlu1 %v1701_v54, %s3846_s18  ;;  %2055 = vrot.lane.b32.xlu0 %v4385_v55, %s3845_s1  ;;  %s4707_s1 = smov 16  }
 0xc0d   :  { %1955 = vrot.lane.b32.xlu1 %v4385_v55, %s3842_s5  ;;  %2053 = vrot.lane.b32.xlu0 %v1903_v56, %s3846_s18  ;;  %s4708_s18 = smov 24   ;;  %s4709_s5 = sld [smem:[#allocation16_spill]] }
 0xc11   :  { %2005 = vrot.lane.b32.xlu1 %v4385_v55, %s3844_s3 }
 0xc15   :  { %2003 = vrot.lane.b32.xlu1 %v1903_v56, %s3848_s30 }
 0xc19   :  { %2195 = vrot.lane.b32.xlu1 %v4375_v52, %s3852_s6 }
 0xc6b   :  { %v1756_v57 = vpop.permute.xlu0 %1755  ;;  %v1705_v58 = vpop.permute.xlu1 %1704 }
 0xc6c   :  { %v1761_v59 = vsel %vm384_vm9, %v1756_v57, 0  ;;  %v1710_v61 = vsel %vm384_vm9, %v1705_v58, 0 }
 0xc6d   :  { %3502 = vmatpush3.bf16.xpose.msra.mxu0 %v1710_v61  ;;  %3508 = vmatpush3.bf16.xpose.msra.mxu1 %v1761_v59 }
 0xc6e   :  { %3513 = vmatprep.subr.bf16.mxu0 %v3840_v46  ;;  %3519 = vmatprep.subr.bf16.mxu1 %v3840_v46 }
 0xc6f   :  { %v1806_v0 = vpop.permute.xlu1 %1805  ;;  %v1804_v1 = vpop.permute.xlu0 %1803 }
 0xc70   :  { %v1811_v3 = vsel %vm384_vm9, %v1806_v0, 0 }
 0xc73   :  { %v1856_v2 = vpop.permute.xlu1 %1855  ;;  %v1906_v6 = vpop.permute.xlu0 %1905 }
 0xc74   :  { %3504 = vmatmul.mubr.msk.bf16.vlgmr.msra.gmra.mxu0 %vm384_vm9, %v1701_v54  ;;  %v1861_v60 = vsel %vm384_vm9, %v1856_v2, 0  ;;  %v1911_v10 = vsel %vm384_vm9, %v1906_v6, 0 }
 0xc75   :  { %3514 = vmatpush3.bf16.xpose.msra.mxu0 %v1811_v3  ;;  %3515 = vmatprep.mubr.msk.bf16.mxu0 %vm3841_vm8, %v3840_v46 }
 0xc76   :  { %3525 = vmatprep.subr.bf16.mxu0 %v3840_v46 }
 0xc77   :  { %v1754_v5 = vpop.permute.xlu1 %1753  ;;  %v1954_v11 = vpop.permute.xlu0 %1953 }
 0xc78   :  { %3510 = vmatmul.mubr.msk.bf16.vlgmr.msra.gmra.mxu1 %vm384_vm9, %v1754_v5 }
 0xc79   :  { %3520 = vmatpush3.bf16.xpose.msra.mxu1 %v1861_v60  ;;  %3521 = vmatprep.mubr.msk.bf16.mxu1 %vm3841_vm8, %v3840_v46 }
 0xc7a   :  { %3531 = vmatprep.subr.bf16.mxu1 %v3840_v46 }
 0xc7b   :  { %v1854_v7 = vpop.permute.xlu1 %1853  ;;  %v2056_v15 = vpop.permute.xlu0 %2055 }
 0xc7c   :  { %3516 = vmatmul.mubr.msk.bf16.vlgmr.msra.gmra.mxu0 %vm384_vm9, %v1804_v1  ;;  %v2061_v63 = vsel %vm384_vm9, %v2056_v15, 0 }
 0xc7d   :  { %3526 = vmatpush3.bf16.xpose.msra.mxu0 %v1911_v10  ;;  %3527 = vmatprep.mubr.msk.bf16.mxu0 %vm3841_vm8, %v3840_v46 }
 0xc7e   :  { %3537 = vmatprep.subr.bf16.mxu0 %v3840_v46 }
 0xc7f   :  { %v1956_v9 = vpop.permute.xlu1 %1955  ;;  %v2054_v19 = vpop.permute.xlu0 %2053 }
 0xc80   :  { %v1961_v13 = vsel %vm384_vm9, %v1956_v9, 0  ;;  %3522 = vmatmul.mubr.msk.bf16.vlgmr.msra.gmra.mxu1 %vm384_vm9, %v1854_v7 }
 0xc81   :  { %3532 = vmatpush3.bf16.xpose.msra.mxu1 %v1961_v13  ;;  %3533 = vmatprep.mubr.msk.bf16.mxu1 %vm3841_vm8, %v3840_v46 }
 0xc82   :  { %3543 = vmatprep.subr.bf16.mxu1 %v3840_v46 }
 0xc83   :  { %v2006_v14 = vpop.permute.xlu1 %2005 }
 0xc84   :  { %v2011_v62 = vsel %vm384_vm9, %v2006_v14, 0  ;;  %3528 = vmatmul.mubr.msk.bf16.vlgmr.msra.gmra.mxu0 %vm384_vm9, %v1903_v56 }
 0xc85   :  { %3538 = vmatpush3.bf16.xpose.msra.mxu0 %v2011_v62  ;;  %3539 = vmatprep.mubr.msk.bf16.mxu0 %vm3841_vm8, %v3840_v46 }
 0xc86   :  { %3549 = vmatprep.subr.bf16.mxu0 %v3840_v46 }
 0xc87   :  { %v2004_v16 = vpop.permute.xlu1 %2003 }
 0xc88   :  { %3534 = vmatmul.mubr.msk.bf16.vlgmr.msra.gmra.mxu1 %vm384_vm9, %v1954_v11 }
 0xc89   :  { %3544 = vmatpush3.bf16.xpose.msra.mxu1 %v2061_v63  ;;  %3545 = vmatprep.mubr.msk.bf16.mxu1 %vm3841_vm8, %v3840_v46 }
 0xc8a   :  { %3555 = vmatprep.subr.bf16.mxu1 %v3840_v46 }
 0xc8b   :  { %v2196_v17 = vpop.permute.xlu1 %2195 }
 0xc8c   :  { %v2201_v18 = vsel %vm235_vm3, %v2196_v17, 0  ;;  %3540 = vmatmul.mubr.msk.bf16.vlgmr.msra.gmra.mxu0 %vm384_vm9, %v2004_v16 }
 0xc8d   :  { %3550 = vmatpush3.bf16.msra.mxu0 %v2201_v18  ;;  %3551 = vmatprep.mubr.msk.bf16.mxu0 %vm3841_vm8, %v3840_v46 }
 0xc8e   :  { %3561 = vmatprep.subr.bf16.mxu0 %v3840_v46 }
 0xc90   :  { %3546 = vmatmul.mubr.msk.bf16.vlgmr.msra.gmra.mxu1 %vm384_vm9, %v2054_v19 }
 0xc91   :  { %3557 = vmatprep.mubr.msk.bf16.mxu1 %vm3841_vm8, %v3840_v46 }
 0xd34   :  { %v1746_v20 = vpop.f32.mrf.mxu0 }
 0xd35   :  { %v1747_v21 = vadd.f32 %v1746_v20, %v4146_v40 }
 0xd36   :  { %v3505_v22 = vpop.f32.mrf.mxu0 }
 0xd37   :  { %v2103_v23 = vsel %vm384_vm9, %v1747_v21, -inf }
 0xd38   :  { %v1797_v24 = vpop.f32.mrf.mxu1  ;;  %2104 = vmax.xlane.f32.xlu1 %v2103_v23  ;;  %v1749_v25 = vpop.f32.mrf.mxu0 }
 0xd39   :  { %v1798_v26 = vadd.f32 %v1797_v24, %v4146_v40 }
 0xd3a   :  { %v3506_v27 = vpop.f32.mrf.mxu0  ;;  %v3511_v28 = vpop.f32.mrf.mxu1 }
 0xd3b   :  { %v2106_v12 = vsel %vm384_vm9, %v1798_v26, -inf }
 0xd3c   :  { %v1800_v29 = vpop.f32.mrf.mxu1  ;;  %2107 = vmax.xlane.f32.xlu0 %v2106_v12  ;;  %v1847_v30 = vpop.f32.mrf.mxu0 }
 0xd3d   :  { %v4451_v31 = vadd.f32 %v1847_v30, %v4146_v40 }
 0xd3e   :  { %v3512_v32 = vpop.f32.mrf.mxu1  ;;  %v3517_v33 = vpop.f32.mrf.mxu0 }
 0xd3f   :  { %v2109_v34 = vsel %vm384_vm9, %v4451_v31, -inf }
 0xd40   :  { %v1897_v35 = vpop.f32.mrf.mxu1  ;;  %2110 = vmax.xlane.f32.xlu0 %v2109_v34  ;;  %v1850_v36 = vpop.f32.mrf.mxu0 }
 0xd41   :  { %v1898_v37 = vadd.f32 %v1897_v35, %v4146_v40 }
 0xd42   :  { %v3518_v38 = vpop.f32.mrf.mxu0  ;;  %v3523_v39 = vpop.f32.mrf.mxu1 }
 0xd43   :  { %v2112_v45 = vsel %vm384_vm9, %v1898_v37, -inf }
 0xd44   :  { %v1900_v47 = vpop.f32.mrf.mxu1  ;;  %2113 = vmax.xlane.f32.xlu0 %v2112_v45  ;;  %v1947_v48 = vpop.f32.mrf.mxu0 }
 0xd45   :  { %v4458_v8 = vadd.f32 %v1947_v48, %v4163_v4 }
 0xd46   :  { %v3524_v49 = vpop.f32.mrf.mxu1  ;;  %v3529_v50 = vpop.f32.mrf.mxu0 }
 0xd47   :  { %v2115_v43 = vsel %vm384_vm9, %v4458_v8, -inf }
 0xd48   :  { %v1997_v44 = vpop.f32.mrf.mxu1  ;;  %2116 = vmax.xlane.f32.xlu1 %v2115_v43  ;;  %v1950_v51 = vpop.f32.mrf.mxu0 }
 0xd49   :  { %v1998_v40 = vadd.f32 %v1997_v44, %v4163_v4 }
 0xd4a   :  { %v3530_v53 = vpop.f32.mrf.mxu0  ;;  %v3535_v54 = vpop.f32.mrf.mxu1 }
 0xd4b   :  { %v2118_v56 = vsel %vm384_vm9, %v1998_v40, -inf }
 0xd4c   :  { %v2000_v57 = vpop.f32.mrf.mxu1  ;;  %2119 = vmax.xlane.f32.xlu0 %v2118_v56  ;;  %v2047_v58 = vpop.f32.mrf.mxu0 }
 0xd4d   :  { %v2048_v59 = vadd.f32 %v2047_v58, %v4163_v4 }
 0xd4e   :  { %v3536_v61 = vpop.f32.mrf.mxu1  ;;  %v3541_v0 = vpop.f32.mrf.mxu0 }
 0xd4f   :  { %v2121_v1 = vsel %vm384_vm9, %v2048_v59, -inf }
 0xd50   :  { %v2097_v2 = vpop.f32.mrf.mxu1  ;;  %2122 = vmax.xlane.f32.xlu1 %v2121_v1  ;;  %v2050_v3 = vpop.f32.mrf.mxu0 }
 0xd51   :  { %v2098_v5 = vadd.f32 %v2097_v2, %v4163_v4 }
 0xd52   :  { %v3542_v60 = vpop.f32.mrf.mxu0  ;;  %v3547_v6 = vpop.f32.mrf.mxu1 }
 0xd53   :  { %v2124_v7 = vsel %vm384_vm9, %v2098_v5, -inf }
 0xd54   :  { %v2100_v10 = vpop.f32.mrf.mxu1  ;;  %2125 = vmax.xlane.f32.xlu0 %v2124_v7 }
 0xd56   :  { %v3548_v11 = vpop.f32.mrf.mxu1 }
 0xd61   :  { %2293 = vrot.lane.b32.xlu1 %v4375_v52, %s3851_s24 }
 0xd65   :  { %2343 = vrot.lane.b32.xlu1 %v4375_v52, %s3853_s28 }
 0xd6a   :  { %2245 = vrot.lane.b32.xlu0 %v4375_v52, %s3850_s2 }
 0xdc1   :  { %v2105_v9 = vpop.xlane.xlu1 %2104 }
 0xdc2   :  { %v2127_v13 = vsub.f32 %v1747_v21, %v2105_v9 }
 0xdc4   :  { %v2135_v14 = vmul.f32 1.442695, %v2127_v13 }
 0xdc5   :  { %v2108_v4 = vpop.xlane.xlu0 %2107 }
 0xdc6   :  { %3762 = vpow2.f32 %v2135_v14  ;;  %v2128_v62 = vsub.f32 %v1798_v26, %v2108_v4 }
 0xdc8   :  { %v2137_v15 = vmul.f32 1.442695, %v2128_v62 }
 0xdc9   :  { %v2111_v16 = vpop.xlane.xlu0 %2110 }
 0xdca   :  { %3764 = vpow2.f32 %v2137_v15  ;;  %v2129_v32 = vsub.f32 %v4451_v31, %v2111_v16 }
 0xdcc   :  { %v2139_v34 = vmul.f32 1.442695, %v2129_v32 }
 0xdcd   :  { %v2114_v63 = vpop.xlane.xlu0 %2113 }
 0xdce   :  { %v2130_v17 = vsub.f32 %v1898_v37, %v2114_v63 }
 0xdd0   :  { %v2141_v18 = vmul.f32 1.442695, %v2130_v17 }
 0xdd1   :  { %v2117_v33 = vpop.xlane.xlu1 %2116 }
 0xdd2   :  { %3766 = vpow2.f32 %v2141_v18  ;;  %v2131_v35 = vsub.f32 %v4458_v8, %v2117_v33 }
 0xdd3   :  { %v3763_v19 = vpop.eup %3762 }
 0xdd4   :  { %v2151_v20 = vsel %vm384_vm9, %v3763_v19, 0.0  ;;  %v2143_v37 = vmul.f32 1.442695, %v2131_v35 }
 0xdd5   :  { %v2120_v22 = vpop.xlane.xlu0 %2119  ;;  %2152 = vadd.xlane.f32.xlu1 %v2151_v20 }
 0xdd6   :  { %v2132_v23 = vsub.f32 %v1998_v40, %v2120_v22 }
 0xdd7   :  { %v3765_v52 = vpop.eup %3764 }
 0xdd8   :  { %v2145_v24 = vmul.f32 1.442695, %v2132_v23  ;;  %v2154_v21 = vsel %vm384_vm9, %v3765_v52, 0.0 }
 0xdd9   :  { %2155 = vadd.xlane.f32.xlu0 %v2154_v21  ;;  %v2123_v36 = vpop.xlane.xlu1 %2122 }
 0xdda   :  { %3768 = vpow2.f32 %v2145_v24  ;;  %v2133_v38 = vsub.f32 %v2048_v59, %v2123_v36 }
 0xddb   :  { %3770 = vpow2.f32 %v2139_v34 }
 0xddc   :  { %3772 = vpow2.f32 %v2143_v37  ;;  %v2147_v39 = vmul.f32 1.442695, %v2133_v38 }
 0xddd   :  { %v2126_v25 = vpop.xlane.xlu0 %2125  ;;  %v2294_v40 = vpop.permute.xlu1 %2293 }
 0xdde   :  { %3774 = vpow2.f32 %v2147_v39  ;;  %v2134_v45 = vsub.f32 %v2098_v5, %v2126_v25  ;;  %v2299_v1 = vsel %vm235_vm3, %v2294_v40, 0 }
 0xddf   :  { %v4476_v26 = vpop.eup %3766 }
 0xde0   :  { %v2160_v27 = vsel %vm384_vm9, %v4476_v26, 0.0  ;;  %v2149_v48 = vmul.f32 1.442695, %v2134_v45 }
 0xde1   :  { %2161 = vadd.xlane.f32.xlu0 %v2160_v27  ;;  %v2246_v28 = vpop.permute.xlu0 %2245  ;;  %v2344_v53 = vpop.permute.xlu1 %2343 }
 0xde2   :  { %v2251_v12 = vsel %vm235_vm3, %v2246_v28, 0  ;;  %3776 = vpow2.f32 %v2149_v48 }
 0xde3   :  { %3556 = vmatpush3.bf16.msra.mxu1 %v2251_v12 }
 0xde4   :  { %3567 = vmatprep.subr.bf16.mxu1 %v3840_v46 }
 0xde6   :  { %2406 = vrot.lane.b32.xlu1 %v4385_v55, %s3852_s6 }
 0xde7   :  { %v4484_v29 = vpop.eup %3768 }
 0xde8   :  { %v2166_v30 = vsel %vm384_vm9, %v4484_v29, 0.0  ;;  %v3771_v47 = vpop.eup %3770 }
 0xde9   :  { %2167 = vadd.xlane.f32.xlu0 %v2166_v30  ;;  %v2157_v49 = vsel %vm384_vm9, %v3771_v47, 0.0  ;;  %v3773_v31 = vpop.eup %3772 }
 0xdea   :  { %v2163_v8 = vsel %vm384_vm9, %v3773_v31, 0.0 }
 0xdeb   :  { %v4494_v50 = vpop.eup %3774 }
 0xdec   :  { %v2169_v43 = vsel %vm384_vm9, %v4494_v50, 0.0 }
 0xdef   :  { %v4498_v44 = vpop.eup %3776 }
 0xdf0   :  { %v2172_v51 = vsel %vm384_vm9, %v4498_v44, 0.0 }
 0xdff   :  { %2456 = vrot.lane.b32.xlu0 %v4385_v55, %s3850_s2  ;;  %s4710_s2 = sld [smem:[#allocation18_spill]] }
 0xe0a   :  { %2158 = vadd.xlane.f32.xlu1 %v2157_v49 }
 0xe0e   :  { %2164 = vadd.xlane.f32.xlu1 %v2163_v8 }
 0xe12   :  { %2170 = vadd.xlane.f32.xlu1 %v2169_v43 }
 0xe1e   :  { %2173 = vadd.xlane.f32.xlu0 %v2172_v51 }
 0xe23   :  { %2504 = vrot.lane.b32.xlu1 %v4385_v55, %s3851_s24 }
 0xe34   :  { %2554 = vrot.lane.b32.xlu0 %v4385_v55, %s3853_s28  ;;  %v2349_v55 = vsel %vm235_vm3, %v2344_v53, 0  ;;  %s4711_s28 = sld [smem:[#allocation17_spill]] }
 0xe5e   :  { %v2153_v54 = vpop.xlane.xlu1 %2152 }
 0xe5f   :  { %3778 = vrcp.f32 %v2153_v54  ;;  %v3702_v54 = vld [vmem:[%s4663_s8 + $0x18] sm:$0xff]  }
 0xe62   :  { %v2156_v56 = vpop.xlane.xlu0 %2155  ;;  %v2407_v3 = vpop.permute.xlu1 %2406 }
 0xe63   :  { %3780 = vrcp.f32 %v2156_v56  ;;  %v2412_v63 = vsel %vm235_vm3, %v2407_v3, 0 }
 0xe6a   :  { %v2162_v5 = vpop.xlane.xlu0 %2161 }
 0xe6b   :  { %3782 = vrcp.f32 %v2162_v5 }
 0xe6c   :  { %v3779_v57 = vpop.eup %3778 }
 0xe6d   :  { %v2183_v59 = vmul.f32 %v3779_v57, %v3763_v19 }
 0xe70   :  { %v3781_v58 = vpop.eup %3780 }
 0xe71   :  { %v2184_v61 = vmul.f32 %v3781_v58, %v3765_v52 }
 0xe72   :  { %v2168_v6 = vpop.xlane.xlu0 %2167 }
 0xe73   :  { %v2191_v0 = vpack.c.bf16 %v2184_v61, %v2183_v59 }
 0xe75   :  { %3552 = vmatmul.mubr.msk.bf16.vlgmr.msra.gmra.mxu0 %vm384_vm9, %v2191_v0  ;;  %v2244_v2 = vrot.slane %v2191_v0, 4  ;;  %v3703_v0 = vld [vmem:[%s4663_s8 + $0x10] sm:$0xff]  }
 0xe76   :  { %3562 = vmatpush3.bf16.msra.mxu0 %v2299_v1  ;;  %3563 = vmatprep.mubr.msk.bf16.mxu0 %vm3841_vm8, %v3840_v46  ;;  %v2457_v14 = vpop.permute.xlu0 %2456 }
 0xe77   :  { %3558 = vmatmul.mubr.msk.bf16.vlgmr.msra.gmra.mxu1 %vm384_vm9, %v2244_v2  ;;  %3573 = vmatprep.subr.bf16.mxu0 %v3840_v46  ;;  %v2462_v20 = vsel %vm235_vm3, %v2457_v14, 0 }
 0xe78   :  { %3568 = vmatpush3.bf16.msra.mxu1 %v2349_v55  ;;  %3569 = vmatprep.mubr.msk.bf16.mxu1 %vm3841_vm8, %v3840_v46  ;;  %v3783_v10 = vpop.eup %3782 }
 0xe79   :  { %3579 = vmatprep.subr.bf16.mxu1 %v3840_v46  ;;  %v2186_v13 = vmul.f32 %v3783_v10, %v4476_v26 }
 0xe93   :  { %v2159_v60 = vpop.xlane.xlu1 %2158 }
 0xe94   :  { %3784 = vrcp.f32 %v2159_v60 }
 0xe95   :  { %3786 = vrcp.f32 %v2168_v6 }
 0xe97   :  { %v2165_v7 = vpop.xlane.xlu1 %2164 }
 0xe98   :  { %3788 = vrcp.f32 %v2165_v7 }
 0xe9b   :  { %v2171_v4 = vpop.xlane.xlu1 %2170 }
 0xe9c   :  { %3790 = vrcp.f32 %v2171_v4 }
 0xe9f   :  { %v2505_v52 = vpop.permute.xlu1 %2504 }
 0xea0   :  { %v2510_v21 = vsel %vm235_vm3, %v2505_v52, 0 }
 0xea1   :  { %v3785_v11 = vpop.eup %3784 }
 0xea2   :  { %v2185_v9 = vmul.f32 %v3785_v11, %v3771_v47  ;;  %v3787_v62 = vpop.eup %3786 }
 0xea3   :  { %v2188_v22 = vmul.f32 %v3787_v62, %v4484_v29 }
 0xea4   :  { %v2192_v15 = vpack.c.bf16 %v2186_v13, %v2185_v9 }
 0xea5   :  { %v3789_v16 = vpop.eup %3788 }
 0xea6   :  { %3564 = vmatmul.mubr.msk.bf16.vlgmr.msra.gmra.mxu0 %vm384_vm9, %v2192_v15  ;;  %v2342_v17 = vrot.slane %v2192_v15, 4  ;;  %v2187_v18 = vmul.f32 %v3789_v16, %v3773_v31 }
 0xea7   :  { %3574 = vmatpush3.bf16.msra.mxu0 %v2412_v63  ;;  %v2174_v19 = vpop.xlane.xlu0 %2173  ;;  %3575 = vmatprep.mubr.msk.bf16.mxu0 %vm3841_vm8, %v3840_v46 }
 0xea8   :  { %3792 = vrcp.f32 %v2174_v19  ;;  %3570 = vmatmul.mubr.msk.bf16.vlgmr.msra.gmra.mxu1 %vm384_vm9, %v2342_v17  ;;  %3585 = vmatprep.subr.bf16.mxu0 %v3840_v46  ;;  %v2193_v23 = vpack.c.bf16 %v2188_v22, %v2187_v18 }
 0xea9   :  { %3580 = vmatpush3.bf16.msra.mxu1 %v2462_v20  ;;  %3581 = vmatprep.mubr.msk.bf16.mxu1 %vm3841_vm8, %v3840_v46  ;;  %v3791_v27 = vpop.eup %3790 }
 0xeaa   :  { %3591 = vmatprep.subr.bf16.mxu1 %v3840_v46  ;;  %v2455_v25 = vrot.slane %v2193_v23, 4  ;;  %v2189_v12 = vmul.f32 %v3791_v27, %v4494_v50 }
 0xeab   :  { %v2555_v24 = vpop.permute.xlu0 %2554 }
 0xeac   :  { %v2560_v26 = vsel %vm235_vm3, %v2555_v24, 0 }
 0xeae   :  { %3576 = vmatmul.mubr.msk.bf16.vlgmr.msra.gmra.mxu0 %vm384_vm9, %v2193_v23 }
 0xeaf   :  { %3586 = vmatpush3.bf16.msra.mxu0 %v2510_v21  ;;  %3587 = vmatprep.mubr.msk.bf16.mxu0 %vm3841_vm8, %v3840_v46 }
 0xeb0   :  { %3582 = vmatmul.mubr.msk.bf16.vlgmr.msra.gmra.mxu1 %vm384_vm9, %v2455_v25  ;;  %3597 = vmatprep.subr.bf16.mxu0 %v3840_v46  ;;  %v3219_v25 = vld [vmem:[%s4664_s9 + $0x1] ss:$0 sm:$0xff] }
 0xeb1   :  { %3592 = vmatpush3.bf16.msra.mxu1 %v2560_v26  ;;  %3593 = vmatprep.mubr.msk.bf16.mxu1 %vm3841_vm8, %v3840_v46 }
 0xeb2   :  { %3605 = vmatprep.subr.bf16.mxu1 %v3840_v46 }
 0xeb5   :  { %v3793_v28 = vpop.eup %3792 }
 0xeb6   :  { %v2190_v29 = vmul.f32 %v3793_v28, %v4498_v44 }
 0xeb8   :  { %v2194_v30 = vpack.c.bf16 %v2190_v29, %v2189_v12 }
 0xeba   :  { %3588 = vmatmul.mubr.msk.bf16.vlgmr.msra.gmra.mxu0 %vm384_vm9, %v2194_v30  ;;  %v2553_v32 = vrot.slane %v2194_v30, 4 }
 0xebb   :  { %3601 = vmatprep.mubr.msk.bf16.mxu0 %vm3841_vm8, %v3840_v46  ;;  %3598 = vmatpush3.bf16.msra.mxu0 %v3702_v54 }
 0xebc   :  { %3594 = vmatmul.mubr.msk.bf16.vlgmr.msra.gmra.mxu1 %vm384_vm9, %v2553_v32  ;;  %3599 = vmatprep.subr.bf16.mxu0 %v3840_v46 }
 0xebd   :  { %3609 = vmatprep.mubr.msk.bf16.mxu1 %vm3841_vm8, %v3840_v46 }
 0xebf   :  { %3600 = vmatpush3.bf16.msra.mxu0 %v3703_v0  ;;  %v3226_v0 = vld [vmem:[%s4666_s11 + $0x1] ss:$0 sm:$0xff] }
 0xec0   :  { %3613 = vmatprep.subr.bf16.mxu0 %v3840_v46 }
 0xf35   :  { %v2237_v33 = vpop.f32.mrf.mxu0 }
 0xf37   :  { %v3553_v34 = vpop.f32.mrf.mxu0  ;;  %v2287_v35 = vpop.f32.mrf.mxu1 }
 0xf39   :  { %v2240_v36 = vpop.f32.mrf.mxu0  ;;  %v3559_v37 = vpop.f32.mrf.mxu1 }
 0xf3b   :  { %v3554_v38 = vpop.f32.mrf.mxu0  ;;  %v2290_v39 = vpop.f32.mrf.mxu1 }
 0xf3d   :  { %v3560_v45 = vpop.f32.mrf.mxu1 }
 0xf66   :  { %v2335_v47 = vpop.f32.mrf.mxu0 }
 0xf68   :  { %v3565_v48 = vpop.f32.mrf.mxu0  ;;  %v2385_v49 = vpop.f32.mrf.mxu1 }
 0xf6a   :  { %v2338_v31 = vpop.f32.mrf.mxu0  ;;  %v3571_v8 = vpop.f32.mrf.mxu1 }
 0xf6b   :  { %v3705_v8 = vld [vmem:[%s4667_s12 + $0x10] sm:$0xff]  }
 0xf6c   :  { %v3566_v50 = vpop.f32.mrf.mxu0  ;;  %v2388_v43 = vpop.f32.mrf.mxu1 }
 0xf6e   :  { %v3572_v44 = vpop.f32.mrf.mxu1  ;;  %v2448_v51 = vpop.f32.mrf.mxu0 }
 0xf70   :  { %v3577_v40 = vpop.f32.mrf.mxu0  ;;  %v2498_v53 = vpop.f32.mrf.mxu1 }
 0xf71   :  { %v3675_v56 = vpack.i.bf16 %v2498_v53, %v2287_v35 }
 0xf72   :  { %v2451_v57 = vpop.f32.mrf.mxu0  ;;  %v3583_v58 = vpop.f32.mrf.mxu1 }
 0xf73   :  { %3676 = vrot.lane.b32.xlu1 %v3675_v56, %s3854_s20  ;;  %v3225_v57 = vld [vmem:[%s4665_s10 + $0x1] ss:$0 sm:$0xff] }
 0xf74   :  { %v3578_v59 = vpop.f32.mrf.mxu0  ;;  %v2501_v61 = vpop.f32.mrf.mxu1 }
 0xf76   :  { %v3584_v1 = vpop.f32.mrf.mxu1 }
 0xf7a   :  { %v2546_v2 = vpop.f32.mrf.mxu0 }
 0xf7b   :  { %v3680_v55 = vpack.i.bf16 %v2546_v2, %v2335_v47 }
 0xf7c   :  { %v3589_v3 = vpop.f32.mrf.mxu0  ;;  %v2596_v5 = vpop.f32.mrf.mxu1 }
 0xf7d   :  { %v3685_v60 = vpack.i.bf16 %v2596_v5, %v2385_v49  ;;  %3681 = vrot.lane.b32.xlu0 %v3680_v55, %s4707_s1  ;;  %v3706_v5 = vld [vmem:[%s4669_s14 + $0x38] sm:$0xff]  }
 0xf7e   :  { %v2549_v6 = vpop.f32.mrf.mxu0  ;;  %v3595_v7 = vpop.f32.mrf.mxu1 }
 0xf7f   :  { %3686 = vrot.lane.b32.xlu1 %v3685_v60, %s4708_s18  ;;  %v3707_v60 = vld [vmem:[%s4669_s14 + $0x30] sm:$0xff]   ;;  %v3708_v6 = vld [vmem:[%s4669_s14 + $0x28] sm:$0xff]   ;;  %v3709_v7 = vld [vmem:[%s4669_s14 + $0x20] sm:$0xff]  }
 0xf80   :  { %v3590_v10 = vpop.f32.mrf.mxu0  ;;  %v2599_v11 = vpop.f32.mrf.mxu1 }
 0xf81   :  { %v3232_v10 = vld [vmem:[%s4668_s13 + $0x1] ss:$0 sm:$0xff] }
 0xf82   :  { %v3596_v9 = vpop.f32.mrf.mxu1 }
 0xfe5   :  { %v3677_v13 = vpop.permute.xlu1 %3676 }
 0xfe6   :  { %v3679_v14 = vunpack.i.h.bf16 %v3677_v13  ;;  %v3678_v4 = vunpack.i.l.bf16 %v3677_v13 }
 0xfe8   :  { %v2403_v63 = vsel %vm384_vm9, %v2237_v33, %v3678_v4  ;;  %v2614_v17 = vsel %vm384_vm9, %v2448_v51, %v3679_v14 }
 0xfef   :  { %v3682_v62 = vpop.permute.xlu0 %3681 }
 0xff0   :  { %v3684_v15 = vunpack.i.h.bf16 %v3682_v62  ;;  %v3683_v16 = vunpack.i.l.bf16 %v3682_v62 }
 0xff1   :  { %v3687_v18 = vpop.permute.xlu1 %3686 }
 0xff2   :  { %v2615_v19 = vsel %vm1083_vm12, %v2614_v17, %v3684_v15  ;;  %v2404_v20 = vsel %vm1083_vm12, %v2403_v63, %v3683_v16  ;;  %v3689_v22 = vunpack.i.h.bf16 %v3687_v18  ;;  %v3688_v23 = vunpack.i.l.bf16 %v3687_v18 }
 0xff4   :  { %v2405_v52 = vsel %vm1085_vm13, %v2404_v20, %v3688_v23  ;;  %v2616_v24 = vsel %vm1085_vm13, %v2615_v19, %v3689_v22 }
 0xff5   :  { %v2622_v21 = vpack.c.bf16 %v2616_v24, %v2405_v52 }
 0xff7   :  { %3602 = vmatmul.mubr.msk.bf16.vlgmr.msra.gmra.mxu0 %vm255_vm7, %v2622_v21 }
 0xff8   :  { %3621 = vmatprep.mubr.msk.bf16.mxu0 %vm3841_vm8, %v3840_v46  ;;  %3614 = vmatpush3.bf16.msra.mxu0 %v3706_v5 }
 0xff9   :  { %3615 = vmatprep.subr.bf16.mxu0 %v3840_v46 }
 0xffc   :  { %3616 = vmatpush3.bf16.msra.mxu0 %v3707_v60 }
 0xffd   :  { %3617 = vmatprep.subr.bf16.mxu0 %v3840_v46 }
0x1000   :  { %3618 = vmatpush3.bf16.msra.mxu0 %v3708_v6  ;;  %v3254_v6 = vld [vmem:[%s4706_s22 + $0x1] ss:$0 sm:$0xff] }
0x1001   :  { %3619 = vmatprep.subr.bf16.mxu0 %v3840_v46 }
0x1004   :  { %3620 = vmatpush3.bf16.msra.mxu0 %v3709_v7 }
0x10b7   :  { %v2680_v26 = vpop.f32.mrf.mxu0 }
0x10b8   :  { %v2681_v27 = vadd.f32 %v3219_v25, %v2680_v26 }
0x10b9   :  { %v3603_v28 = vpop.f32.mrf.mxu0 }
0x10ba   :  { %v2687_v12 = vadd.f32 %v2681_v27, %v4363_v41 }
0x10bb   :  { %v2683_v29 = vpop.f32.mrf.mxu0 }
0x10bc   :  { %v2684_v30 = vadd.f32 %v3219_v25, %v2683_v29  ;;  %v2693_v32 = vsel %vm255_vm7, %v2687_v12, 0.0 }
0x10bd   :  { %2694 = vadd.xlane.f32.xlu0 %v2693_v32  ;;  %v3604_v33 = vpop.f32.mrf.mxu0  ;;  %v3245_v32 = vld [vmem:[%s4670_s15 + $0x1] ss:$0 sm:$0xff] }
0x10be   :  { %v2688_v34 = vadd.f32 %v2684_v30, %v4365_v42  ;;  %v3704_v42 = vld [vmem:[%s4667_s12 + $0x18] sm:$0xff]  }
0x10bf   :  { %3606 = vmatpush3.bf16.msra.mxu1 %v3704_v42 }
0x10c0   :  { %v2696_v35 = vsel %vm255_vm7, %v2688_v34, 0.0  ;;  %3607 = vmatprep.subr.bf16.mxu1 %v3840_v46 }
0x10c1   :  { %2697 = vadd.xlane.f32.xlu1 %v2696_v35 }
0x10c3   :  { %3608 = vmatpush3.bf16.msra.mxu1 %v3705_v8 }
0x10c4   :  { %3625 = vmatprep.subr.bf16.mxu1 %v3840_v46 }
0x1146   :  { %v2695_v36 = vpop.xlane.xlu0 %2694 }
0x1147   :  { %v2699_v37 = vmul.f32 0.03125, %v2695_v36 }
0x1149   :  { %v2701_v38 = vsub.f32 %v2687_v12, %v2699_v37 }
0x114a   :  { %v2698_v39 = vpop.xlane.xlu1 %2697 }
0x114b   :  { %v2700_v45 = vmul.f32 0.03125, %v2698_v39  ;;  %v2703_v47 = vmul.f32 %v2701_v38, %v2701_v38 }
0x114d   :  { %v2702_v48 = vsub.f32 %v2688_v34, %v2700_v45  ;;  %v2705_v41 = vsel %vm255_vm7, %v2703_v47, 0.0 }
0x114e   :  { %2706 = vadd.xlane.f32.xlu0 %v2705_v41 }
0x114f   :  { %v2704_v49 = vmul.f32 %v2702_v48, %v2702_v48 }
0x1151   :  { %v2708_v31 = vsel %vm255_vm7, %v2704_v49, 0.0 }
0x1152   :  { %2709 = vadd.xlane.f32.xlu0 %v2708_v31 }
0x11d7   :  { %v2707_v50 = vpop.xlane.xlu0 %2706 }
0x11d8   :  { %v2711_v43 = vmul.f32 0.03125, %v2707_v50 }
0x11da   :  { %v2713_v44 = vadd.f32 1e-12, %v2711_v43 }
0x11db   :  { %v2710_v51 = vpop.xlane.xlu0 %2709 }
0x11dc   :  { %3794 = vrsqrt.f32 %v2713_v44  ;;  %v2712_v40 = vmul.f32 0.03125, %v2710_v51 }
0x11de   :  { %v2714_v53 = vadd.f32 1e-12, %v2712_v40 }
0x11e0   :  { %3796 = vrsqrt.f32 %v2714_v53  ;;  %v3710_v53 = vld [vmem:[%s4709_s5 + $0x8] sm:$0xff]  }
0x11e9   :  { %v3795_v54 = vpop.eup %3794 }
0x11ea   :  { %v2717_v56 = vmul.f32 %v3795_v54, %v2701_v38  ;;  %v3711_v54 = vld [vmem:[%s4709_s5] sm:$0xff]  }
0x11ec   :  { %v2725_v61 = vmul.f32 %v3225_v57, %v2717_v56 }
0x11ed   :  { %v3797_v58 = vpop.eup %3796 }
0x11ee   :  { %v2718_v59 = vmul.f32 %v3797_v58, %v2702_v48  ;;  %v2733_v2 = vadd.f32 %v3226_v0, %v2725_v61 }
0x11f0   :  { %v2726_v1 = vmul.f32 %v3225_v57, %v2718_v59 }
0x11f2   :  { %v2734_v55 = vadd.f32 %v3226_v0, %v2726_v1 }
0x11f4   :  { %v2740_v3 = vpack.c.bf16 %v2734_v55, %v2733_v2 }
0x11f6   :  { %3610 = vmatmul.mubr.msk.bf16.vlgmr.msra.gmra.mxu1 %vm255_vm7, %v2740_v3 }
0x11f7   :  { %3629 = vmatprep.mubr.msk.bf16.mxu1 %vm3841_vm8, %v3840_v46  ;;  %3626 = vmatpush3.bf16.msra.mxu1 %v3710_v53 }
0x11f8   :  { %3627 = vmatprep.subr.bf16.mxu1 %v3840_v46 }
0x11fb   :  { %3628 = vmatpush3.bf16.msra.mxu1 %v3711_v54 }
0x11fc   :  { %3633 = vmatprep.subr.bf16.mxu1 %v3840_v46 }
0x12b6   :  { %v2798_v11 = vpop.f32.mrf.mxu1 }
0x12b7   :  { %v2799_v9 = vadd.f32 %v3232_v10, %v2798_v11 }
0x12b8   :  { %v3611_v13 = vpop.f32.mrf.mxu1 }
0x12b9   :  { %v2807_v14 = vmul.f32 0.044715, %v2799_v9  ;;  %v2805_v26 = vmul.f32 0.5, %v2799_v9  ;;  %v3712_v13 = vld [vmem:[%s4710_s2 + $0x8] sm:$0xff]  }
0x12ba   :  { %v2801_v4 = vpop.f32.mrf.mxu1 }
0x12bb   :  { %v2809_v62 = vmul.f32 %v2807_v14, %v2799_v9  ;;  %v2802_v15 = vadd.f32 %v3232_v10, %v2801_v4  ;;  %v3713_v14 = vld [vmem:[%s4710_s2] sm:$0xff]  }
0x12bc   :  { %v3612_v16 = vpop.f32.mrf.mxu1  ;;  %v3255_v4 = vld [vmem:[%s4711_s28] ss:$0 sm:$0xff] }
0x12bd   :  { %v2811_v63 = vmul.f32 %v2809_v62, %v2799_v9  ;;  %v2808_v17 = vmul.f32 0.044715, %v2802_v15  ;;  %v2806_v27 = vmul.f32 0.5, %v2802_v15 }
0x12bf   :  { %v2813_v18 = vadd.f32 %v2811_v63, %v2799_v9  ;;  %v2810_v19 = vmul.f32 %v2808_v17, %v2802_v15 }
0x12c1   :  { %v2815_v20 = vmul.f32 0.7978846, %v2813_v18  ;;  %v2812_v22 = vmul.f32 %v2810_v19, %v2802_v15 }
0x12c3   :  { %3798 = vtanh.f32 %v2815_v20  ;;  %v2814_v23 = vadd.f32 %v2812_v22, %v2802_v15 }
0x12c5   :  { %v2816_v52 = vmul.f32 0.7978846, %v2814_v23 }
0x12c7   :  { %3800 = vtanh.f32 %v2816_v52 }
0x12d0   :  { %v3799_v24 = vpop.eup %3798 }
0x12d1   :  { %v2819_v21 = vadd.f32 1.0, %v3799_v24 }
0x12d3   :  { %v2821_v12 = vmul.f32 %v2819_v21, %v2805_v26 }
0x12d4   :  { %v3801_v25 = vpop.eup %3800 }
0x12d5   :  { %v2820_v28 = vadd.f32 1.0, %v3801_v25 }
0x12d7   :  { %v2822_v29 = vmul.f32 %v2820_v28, %v2806_v27 }
0x12d9   :  { %v2832_v30 = vpack.c.bf16 %v2822_v29, %v2821_v12 }
0x12db   :  { %3622 = vmatmul.mubr.msk.bf16.vlgmr.msra.gmra.mxu0 %vm1538_vm14, %v2832_v30 }
0x139b   :  { %v2902_v33 = vpop.f32.mrf.mxu0 }
0x139c   :  { %v2903_v34 = vadd.f32 %v3245_v32, %v2902_v33 }
0x139d   :  { %v3623_v35 = vpop.f32.mrf.mxu0 }
0x139e   :  { %v2909_v36 = vadd.f32 %v2903_v34, %v2733_v2 }
0x139f   :  { %v2905_v37 = vpop.f32.mrf.mxu0 }
0x13a0   :  { %v2906_v38 = vadd.f32 %v3245_v32, %v2905_v37  ;;  %v2915_v39 = vsel %vm255_vm7, %v2909_v36, 0.0 }
0x13a1   :  { %2916 = vadd.xlane.f32.xlu0 %v2915_v39  ;;  %v3624_v45 = vpop.f32.mrf.mxu0 }
0x13a2   :  { %v2910_v47 = vadd.f32 %v2906_v38, %v2734_v55  ;;  %v3253_v55 = vld [vmem:[%s4671_s16 + $0x1] ss:$0 sm:$0xff] }
0x13a4   :  { %v2918_v48 = vsel %vm255_vm7, %v2910_v47, 0.0 }
0x13a5   :  { %2919 = vadd.xlane.f32.xlu1 %v2918_v48 }
0x142a   :  { %v2917_v41 = vpop.xlane.xlu0 %2916 }
0x142b   :  { %v2921_v49 = vmul.f32 0.03125, %v2917_v41 }
0x142d   :  { %v2923_v31 = vsub.f32 %v2909_v36, %v2921_v49 }
0x142e   :  { %v2920_v42 = vpop.xlane.xlu1 %2919 }
0x142f   :  { %v2922_v8 = vmul.f32 0.03125, %v2920_v42  ;;  %v2925_v50 = vmul.f32 %v2923_v31, %v2923_v31 }
0x1431   :  { %v2924_v43 = vsub.f32 %v2910_v47, %v2922_v8  ;;  %v2927_v44 = vsel %vm255_vm7, %v2925_v50, 0.0 }
0x1432   :  { %2928 = vadd.xlane.f32.xlu0 %v2927_v44 }
0x1433   :  { %v2926_v51 = vmul.f32 %v2924_v43, %v2924_v43 }
0x1435   :  { %v2930_v40 = vsel %vm255_vm7, %v2926_v51, 0.0 }
0x1436   :  { %2931 = vadd.xlane.f32.xlu1 %v2930_v40 }
0x14bb   :  { %v2929_v56 = vpop.xlane.xlu0 %2928 }
0x14bc   :  { %v2933_v57 = vmul.f32 0.03125, %v2929_v56 }
0x14be   :  { %v2935_v58 = vadd.f32 1e-12, %v2933_v57 }
0x14bf   :  { %v2932_v59 = vpop.xlane.xlu1 %2931 }
0x14c0   :  { %3802 = vrsqrt.f32 %v2935_v58  ;;  %v2934_v61 = vmul.f32 0.03125, %v2932_v59 }
0x14c2   :  { %v2936_v0 = vadd.f32 1e-12, %v2934_v61 }
0x14c4   :  { %3804 = vrsqrt.f32 %v2936_v0 }
0x14cd   :  { %v3803_v1 = vpop.eup %3802 }
0x14ce   :  { %v2939_v2 = vmul.f32 %v3803_v1, %v2923_v31 }
0x14d0   :  { %v2947_v60 = vmul.f32 %v3253_v55, %v2939_v2 }
0x14d1   :  { %v3805_v3 = vpop.eup %3804 }
0x14d2   :  { %v2940_v5 = vmul.f32 %v3805_v3, %v2924_v43  ;;  %v2955_v10 = vadd.f32 %v3254_v6, %v2947_v60 }
0x14d4   :  { %v2948_v7 = vmul.f32 %v3253_v55, %v2940_v5 }
0x14d6   :  { %v2956_v11 = vadd.f32 %v3254_v6, %v2948_v7 }
0x14d8   :  { %v2961_v9 = vpack.c.bf16 %v2956_v11, %v2955_v10 }
0x14da   :  { %3630 = vmatmul.mubr.msk.bf16.vlgmr.msra.gmra.mxu1 %vm255_vm7, %v2961_v9 }
0x14db   :  { %3637 = vmatprep.mubr.msk.bf16.mxu1 %vm3841_vm8, %v3840_v46  ;;  %3634 = vmatpush3.bf16.msra.mxu1 %v3712_v13 }
0x14dc   :  { %3635 = vmatprep.subr.bf16.mxu1 %v3840_v46  ;;  %v3259_v46 = vld [vmem:[%s4712_s4] ss:$0 sm:$0xff] }
0x14df   :  { %3636 = vmatpush3.bf16.msra.mxu1 %v3713_v14 }
0x159a   :  { %v3018_v62 = vpop.f32.mrf.mxu1 }
0x159b   :  { %v3019_v15 = vadd.f32 %v3255_v4, %v3018_v62 }
0x159c   :  { %v3631_v16 = vpop.f32.mrf.mxu1 }
0x159d   :  { %3806 = vtanh.f32 %v3019_v15 }
0x159e   :  { %v3021_v63 = vpop.f32.mrf.mxu1 }
0x159f   :  { %v3022_v17 = vadd.f32 %v3255_v4, %v3021_v63 }
0x15a0   :  { %v3632_v18 = vpop.f32.mrf.mxu1 }
0x15a1   :  { %3808 = vtanh.f32 %v3022_v17 }
0x15aa   :  { %v3807_v19 = vpop.eup %3806 }
0x15ae   :  { %v3809_v20 = vpop.eup %3808 }
0x15af   :  { %v3031_v22 = vpack.c.bf16 %v3809_v20, %v3807_v19 }
0x15b1   :  { %3638 = vmatmul.mubr.msk.bf16.vlgmr.msra.gmra.mxu1 %vm255_vm7, %v3031_v22 }
0x1671   :  { %v3088_v23 = vpop.f32.mrf.mxu1 }
0x1672   :  { %v3089_v52 = vadd.f32 %v3259_v46, %v3088_v23 }
0x1673   :  { %v3639_v24 = vpop.f32.mrf.mxu1 }
0x1674   :  { %3095 = vst [vmem:[%s4713_s29] sm:$0xff] %v3089_v52 }
0x1675   :  { %v3091_v21 = vpop.f32.mrf.mxu1 }
0x1676   :  { %v3092_v25 = vadd.f32 %v3259_v46, %v3091_v21 }
0x1677   :  { %v3640_v26 = vpop.f32.mrf.mxu1 }
0x1678   :  { %3096 = vst [vmem:[%s4713_s29 + $0x8] sm:$0xff] %v3092_v25 }
0x1679   :  { %3101 = vsyncpa [#allocation3], 1 }
0x167a   :  { %3102 = vsyncpa [#allocation5], 1 }

</bundles_post_ra>
